<compile_context>
chip_gen: v7x
topology: tpu7x:2x2x1
jax: 0.10.0
libtpu: 0.0.40
codegen_flags: <defaults>
</compile_context>

<pallas_src>
import functools

import jax
import jax.numpy as jnp
import numpy as np
from jax import lax
from jax.experimental import pallas as pl
from jax.experimental.pallas import tpu as pltpu

BN_EPS = 1e-5
BN_SCALE = float(1.0 / np.sqrt(1.0 + BN_EPS))


def _round_up(x, m):
    return ((x + m - 1) // m) * m


# ----------------------------------------------------------------------------
# Pallas kernel: fused  out = act(A @ B * scale + shift [+ residual])
#   A: (tm, tk) bf16,  B: (tk, tn) bf16,  f32 VMEM accumulator over the K grid
# ----------------------------------------------------------------------------
def _mm_kernel(*refs, act, has_res):
    if has_res:
        a_ref, b_ref, s_ref, t_ref, r_ref, o_ref, acc_ref = refs
    else:
        a_ref, b_ref, s_ref, t_ref, o_ref, acc_ref = refs
        r_ref = None

    k = pl.program_id(2)

    @pl.when(k == 0)
    def _():
        acc_ref[...] = jnp.zeros_like(acc_ref)

    acc_ref[...] += jnp.dot(a_ref[...], b_ref[...],
                            preferred_element_type=jnp.float32)

    @pl.when(k == pl.num_programs(2) - 1)
    def _():
        out = acc_ref[...] * s_ref[...] + t_ref[...]          # f32 epilogue
        if r_ref is not None:
            out = out + r_ref[...].astype(jnp.float32)        # fused residual
        if act == "relu":
            out = jnp.maximum(out, 0.0)
        elif act == "sigmoid":
            out = 1.0 / (1.0 + jnp.exp(-out))                 # EUP exp+recip
        o_ref[...] = out.astype(o_ref.dtype)


def _pick_tiles(M, Kp, Np):
    # M tile: never pad tiny M up to 128 -- smallest 16-granular tile >= M
    # (bf16 sublane pack); capped at 512 for the large-M decoder-head matmuls.
    tm = 512
    for c in (16, 32, 64, 128, 256, 512):
        if c >= M:
            tm = c
            break
    # K tile: single block unless K is very large (always single in this net).
    if Kp <= 4608:
        tk = Kp
    else:
        tk = next(c for c in (2048, 1024, 512, 256, 128) if Kp % c == 0)
    # N tile: 256 fills the 256-wide v6e/v7x MXU when channels allow it.
    tn = 256 if Np % 256 == 0 else 128
    return tm, tk, tn


@functools.lru_cache(maxsize=None)
def _get_mm_call(Mp, Kp, Np, tm, tk, tn, act, has_res, out_dtype):
    """Build (once per config) a jitted pallas_call for the fused matmul."""
    in_specs = [
        pl.BlockSpec((tm, tk), lambda i, j, k: (i, k)),
        pl.BlockSpec((tk, tn), lambda i, j, k: (k, j)),
        pl.BlockSpec((1, tn), lambda i, j, k: (0, j)),
        pl.BlockSpec((1, tn), lambda i, j, k: (0, j)),
    ]
    if has_res:
        in_specs.append(pl.BlockSpec((tm, tn), lambda i, j, k: (i, j)))

    call = pl.pallas_call(
        functools.partial(_mm_kernel, act=act, has_res=has_res),
        out_shape=jax.ShapeDtypeStruct((Mp, Np), out_dtype),
        grid=(Mp // tm, Np // tn, Kp // tk),
        in_specs=in_specs,
        out_specs=pl.BlockSpec((tm, tn), lambda i, j, k: (i, j)),
        scratch_shapes=[pltpu.VMEM((tm, tn), jnp.float32)],
        compiler_params=pltpu.CompilerParams(
            dimension_semantics=("parallel", "parallel", "arbitrary"),
            vmem_limit_bytes=32 * 1024 * 1024,
        ),
    )
    return jax.jit(call)


def pallas_matmul(a, prep, act="none", residual=None, out_dtype=jnp.bfloat16):
    """a: (M, K) -> (M, N) = act(a @ W * scale + shift [+ residual]).

    `prep` holds the pre-transposed / pre-padded bf16 weight matrix plus the
    f32 per-output-channel scale & shift (built once at init time).
    """
    M, K = a.shape
    N = prep["N"]
    assert K == prep["K"], (K, prep["K"])
    b_p, s_p, t_p = prep["b"], prep["s"], prep["t"]
    Kp, Np = b_p.shape

    tm, tk, tn = _pick_tiles(M, Kp, Np)
    Mp = _round_up(M, tm)

    a_bf = a.astype(jnp.bfloat16)
    if (Mp, Kp) != (M, K):
        a_bf = jnp.pad(a_bf, ((0, Mp - M), (0, Kp - K)))

    inputs = [a_bf, b_p, s_p, t_p]
    has_res = residual is not None
    if has_res:
        r = residual.astype(jnp.bfloat16)
        if (Mp, Np) != (M, N):
            r = jnp.pad(r, ((0, Mp - M), (0, Np - N)))
        inputs.append(r)

    fn = _get_mm_call(Mp, Kp, Np, tm, tk, tn, act, has_res, out_dtype)
    out = fn(*inputs)

    if (Mp, Np) != (M, N):
        out = out[:M, :N]
    return out


# ----------------------------------------------------------------------------
# Weight preparation (hoisted out of the per-forward path)
# ----------------------------------------------------------------------------
def _bn_scale(cout):
    return jnp.full((cout,), BN_SCALE, jnp.float32)


def _prep_mm(w_kn, scale=None, shift=None):
    K, N = w_kn.shape
    if scale is None:
        scale = jnp.ones((N,), jnp.float32)
    if shift is None:
        shift = jnp.zeros((N,), jnp.float32)
    Kp, Np = _round_up(K, 128), _round_up(N, 128)
    b_p = jnp.zeros((Kp, Np), jnp.bfloat16).at[:K, :N].set(w_kn.astype(jnp.bfloat16))
    s_p = jnp.zeros((1, Np), jnp.float32).at[0, :N].set(scale.astype(jnp.float32))
    t_p = jnp.zeros((1, Np), jnp.float32).at[0, :N].set(shift.astype(jnp.float32))
    return {"b": b_p, "s": s_p, "t": t_p, "K": K, "N": N}


def prep_conv(w_oihw, scale=None, shift=None):
    """PyTorch Conv2d weight (Cout, Cin, kh, kw) -> padded bf16 (kh*kw*Cin, Cout)."""
    cout, cin, kh, kw = w_oihw.shape
    w2 = jnp.transpose(w_oihw, (2, 3, 1, 0)).reshape(kh * kw * cin, cout)
    p = _prep_mm(w2, scale, shift)
    p.update(kh=kh, kw=kw, cin=cin)
    return p


def prep_convT(w_iohw, bias):
    """ConvTranspose2d weight (Cin, Cout, 2, 2) -> (Cin, 4*Cout) with tiled bias."""
    cin, cout, kh, kw = w_iohw.shape
    w2 = jnp.transpose(w_iohw, (0, 2, 3, 1)).reshape(cin, kh * kw * cout)
    p = _prep_mm(w2, shift=jnp.tile(bias, kh * kw))
    p.update(kh=kh, kw=kw, cin=cin, cout=cout)
    return p


# ----------------------------------------------------------------------------
# Convolution via im2col + fused Pallas matmul
# TODO(synk): im2col still materializes the kh*kw-expanded patches in HBM; an
#             in-kernel tap-accumulating direct conv would cut decoder traffic.
# ----------------------------------------------------------------------------
def _im2col(x, kh, kw, stride, pad):
    B, H, W, C = x.shape
    if pad > 0:
        x = jnp.pad(x, ((0, 0), (pad, pad), (pad, pad), (0, 0)))
    Hp, Wp = H + 2 * pad, W + 2 * pad
    Ho = (Hp - kh) // stride + 1
    Wo = (Wp - kw) // stride + 1
    cols = []
    for i in range(kh):
        for j in range(kw):
            cols.append(
                x[:, i : i + (Ho - 1) * stride + 1 : stride,
                     j : j + (Wo - 1) * stride + 1 : stride, :])
    patches = jnp.concatenate(cols, axis=-1)             # (B, Ho, Wo, kh*kw*C)
    return patches.reshape(B * Ho * Wo, kh * kw * C), B, Ho, Wo


def conv2d(x, prep, stride, pad, act="none", residual=None,
           out_dtype=jnp.bfloat16):
    patches, B, Ho, Wo = _im2col(x, prep["kh"], prep["kw"], stride, pad)
    res2d = None
    if residual is not None:
        res2d = residual.reshape(B * Ho * Wo, prep["N"])
    y = pallas_matmul(patches, prep, act=act, residual=res2d,
                      out_dtype=out_dtype)
    return y.reshape(B, Ho, Wo, prep["N"])


def conv_transpose_2x2(x, prep):
    """ConvTranspose2d(kernel=2, stride=2) as one matmul + pixel-shuffle."""
    B, H, W, Cin = x.shape
    kh, kw, cout = prep["kh"], prep["kw"], prep["cout"]
    y = pallas_matmul(x.reshape(B * H * W, Cin), prep, act="none")
    y = y.reshape(B, H, W, kh, kw, cout)
    y = jnp.transpose(y, (0, 1, 3, 2, 4, 5)).reshape(B, H * kh, W * kw, cout)
    return y


# ----------------------------------------------------------------------------
# Small glue ops (plain JAX)
# ----------------------------------------------------------------------------
def max_pool_3x3_s2(x):
    init = jnp.array(-jnp.inf, dtype=x.dtype)
    return lax.reduce_window(
        x, init, lax.max,
        window_dimensions=(1, 3, 3, 1),
        window_strides=(1, 2, 2, 1),
        padding=((0, 0), (1, 1), (1, 1), (0, 0)),
    )


def upsample_bilinear_x2(x):
    """Bilinear x2 upsample, align_corners=True (matches nn.Upsample in spec)."""
    B, H, W, C = x.shape

    def interp_matrix(n_in, n_out):
        if n_in == 1:
            return jnp.ones((n_out, 1), jnp.float32)
        src = jnp.arange(n_out, dtype=jnp.float32) * (n_in - 1) / (n_out - 1)
        i0 = jnp.floor(src).astype(jnp.int32)
        i1 = jnp.minimum(i0 + 1, n_in - 1)
        frac = src - i0.astype(jnp.float32)
        M = jnp.zeros((n_out, n_in), jnp.float32)
        M = M.at[jnp.arange(n_out), i0].add(1.0 - frac)
        M = M.at[jnp.arange(n_out), i1].add(frac)
        return M

    Mh = interp_matrix(H, 2 * H)
    Mw = interp_matrix(W, 2 * W)
    xf = x.astype(jnp.float32)
    xf = jnp.einsum("Hh,bhwc->bHwc", Mh, xf)
    xf = jnp.einsum("Ww,bhwc->bhWc", Mw, xf)
    return xf.astype(x.dtype)


def se_fwd(x, se):
    # M = batch (=2): far too small for the MXU -- plain XLA.
    y = jnp.mean(x.astype(jnp.float32), axis=(1, 2))     # global avg pool
    y = jnp.maximum(y @ se["fc1"].T, 0.0)                # Linear (no bias) + ReLU
    y = jax.nn.sigmoid(y @ se["fc2"].T)                  # Linear (no bias) + Sigmoid
    return (x.astype(jnp.float32) * y[:, None, None, :]).astype(x.dtype)


# ----------------------------------------------------------------------------
# Parameter initialization (deterministic, synthetic) with hoisted weight prep
# ----------------------------------------------------------------------------
class KeyGen:
    def __init__(self, seed):
        self.key = jax.random.PRNGKey(seed)

    def __call__(self):
        self.key, sub = jax.random.split(self.key)
        return sub


def init_params(kg, input_channels=31):
    def w(shape):
        return 0.05 * jax.random.normal(kg(), shape, jnp.float32)

    P = {}
    P["enc1_conv"] = prep_conv(w((64, input_channels, 7, 7)), scale=_bn_scale(64))

    def basic_block(cin, cout, stride):
        blk = {"conv1": prep_conv(w((cout, cin, 3, 3)), scale=_bn_scale(cout)),
               "conv2": prep_conv(w((cout, cout, 3, 3)), scale=_bn_scale(cout)),
               "stride": stride}
        if stride != 1 or cin != cout:
            blk["down"] = prep_conv(w((cout, cin, 1, 1)), scale=_bn_scale(cout))
        return blk

    P["layer1"] = [basic_block(64, 64, 1) for _ in range(3)]
    P["layer2"] = [basic_block(64, 128, 2)] + [basic_block(128, 128, 1) for _ in range(3)]
    P["layer3"] = [basic_block(128, 256, 2)] + [basic_block(256, 256, 1) for _ in range(5)]
    P["layer4"] = [basic_block(256, 512, 2)] + [basic_block(512, 512, 1) for _ in range(2)]

    def decoder(cin, cmid, cout):
        return {"up": prep_convT(w((cin, cout, 2, 2)), w((cout,))),
                "conv": prep_conv(w((cout, cmid, 3, 3)), shift=w((cout,)))}

    P["dec5"] = decoder(512, 512, 256)
    P["dec4"] = decoder(256, 256, 128)
    P["dec3"] = decoder(128, 128, 64)
    P["dec2"] = decoder(64, 128, 64)

    P["dec1_conv1"] = prep_conv(w((32, 64, 3, 3)))   # no bias
    P["dec1_conv2"] = prep_conv(w((64, 32, 3, 3)))   # no bias
    P["last"] = prep_conv(w((7, 64, 1, 1)), shift=w((7,)))

    def se(ch):
        mid = ch // 16
        return {"fc1": w((mid, ch)), "fc2": w((ch, mid))}   # PyTorch (out, in)

    P["se0"] = se(input_channels)
    P["se1"] = se(64)
    P["se2"] = se(64)
    P["se3"] = se(128)
    P["se4"] = se(256)
    P["se5"] = se(512)
    return P


# ----------------------------------------------------------------------------
# Forward
# ----------------------------------------------------------------------------
def basic_block_fwd(x, blk):
    stride = blk["stride"]
    if "down" in blk:
        identity = conv2d(x, blk["down"], stride, 0, act="none")
    else:
        identity = x
    out = conv2d(x, blk["conv1"], stride, 1, act="relu")
    # conv2 + BN + residual add + ReLU fused into one kernel epilogue
    out = conv2d(out, blk["conv2"], 1, 1, act="relu", residual=identity)
    return out


def decoder_fwd(x1, x2, d):
    x1 = conv_transpose_2x2(x1, d["up"])
    x = jnp.concatenate([x1, x2], axis=-1)               # channel concat (NHWC)
    return conv2d(x, d["conv"], 1, 1, act="relu")


def hpe_forward(P, warp_cloth, pose_map18, parse7_occ, image_occ):
    """Inputs NCHW (PyTorch convention); output NCHW."""
    x = jnp.concatenate([warp_cloth, pose_map18, parse7_occ, image_occ], axis=1)
    x = jnp.transpose(x, (0, 2, 3, 1)).astype(jnp.float32)   # -> NHWC

    x = se_fwd(x, P["se0"]).astype(jnp.bfloat16)

    # encode1: conv7x7 s2 + BN + ReLU
    e1 = conv2d(x, P["enc1_conv"], 2, 3, act="relu")
    e1 = se_fwd(e1, P["se1"])

    # encode2: maxpool + layer1
    e2 = max_pool_3x3_s2(e1)
    for blk in P["layer1"]:
        e2 = basic_block_fwd(e2, blk)
    e2 = se_fwd(e2, P["se2"])

    e3 = e2
    for blk in P["layer2"]:
        e3 = basic_block_fwd(e3, blk)
    e3 = se_fwd(e3, P["se3"])

    e4 = e3
    for blk in P["layer3"]:
        e4 = basic_block_fwd(e4, blk)
    e4 = se_fwd(e4, P["se4"])

    f = e4
    for blk in P["layer4"]:
        f = basic_block_fwd(f, blk)
    f = se_fwd(f, P["se5"])

    d4 = decoder_fwd(f, e4, P["dec5"])
    d3 = decoder_fwd(d4, e3, P["dec4"])
    d2 = decoder_fwd(d3, e2, P["dec3"])
    d1 = decoder_fwd(d2, e1, P["dec2"])

    d0 = upsample_bilinear_x2(d1)
    d0 = conv2d(d0, P["dec1_conv1"], 1, 1, act="none")
    d0 = conv2d(d0, P["dec1_conv2"], 1, 1, act="none")

    parse = conv2d(d0, P["last"], 1, 0, act="sigmoid", out_dtype=jnp.float32)
    return jnp.transpose(parse, (0, 3, 1, 2))   # -> NCHW


# ----------------------------------------------------------------------------
# Main
# ----------------------------------------------------------------------------
if __name__ == "__main__":
    B, H, W = 2, 32, 32   # spatial must be a multiple of 32 (5x downsample)
    key = jax.random.PRNGKey(0)
    k1, k2, k3, k4 = jax.random.split(key, 4)
    warp_cloth = jax.random.normal(k1, (B, 3, H, W), jnp.float32)
    pose_map18 = jax.random.normal(k2, (B, 18, H, W), jnp.float32)
    parse7_occ = jax.random.normal(k3, (B, 7, H, W), jnp.float32)
    image_occ = jax.random.normal(k4, (B, 3, H, W), jnp.float32)

    params = init_params(KeyGen(42), input_channels=31)

    out = hpe_forward(params, warp_cloth, pose_map18, parse7_occ, image_occ)
    out = jax.block_until_ready(out)

    assert out.shape == (B, 7, H, W), out.shape
    assert bool(jnp.all(jnp.isfinite(out)))
    assert bool(jnp.all((out >= 0.0) & (out <= 1.0)))   # sigmoid output
    print("KERNEL_OK")
</pallas_src>

<mosaic_0001>
module attributes {stable_mosaic.version = 11 : i64} {
  func.func @_mm_kernel(%arg0: i32, %arg1: i32, %arg2: i32, %arg3: memref<512x1536xbf16, #tpu.memory_space<vmem>>, %arg4: memref<1536x128xbf16, #tpu.memory_space<vmem>>, %arg5: memref<1x128xf32, #tpu.memory_space<vmem>>, %arg6: memref<1x128xf32, #tpu.memory_space<vmem>>, %arg7: memref<512x128xbf16, #tpu.memory_space<vmem>>, %arg8: memref<512x128xf32, #tpu.memory_space<vmem>>) attributes {dimension_semantics = [#tpu.dimension_semantics<parallel>, #tpu.dimension_semantics<parallel>, #tpu.dimension_semantics<arbitrary>], iteration_bounds = array<i64: 1, 1, 1>, scalar_prefetch = 0 : i64, scratch_operands = 1 : i64, tpu.core_type = #tpu.core_type<tc>, window_params = [{transform_indices = @transform_0, window_bounds = array<i64: 512, 1536>}, {transform_indices = @transform_1, window_bounds = array<i64: 1536, 128>}, {transform_indices = @transform_2, window_bounds = array<i64: 1, 128>}, {transform_indices = @transform_3, window_bounds = array<i64: 1, 128>}, {transform_indices = @transform_4, window_bounds = array<i64: 512, 128>}]} {
    %c0_i32 = arith.constant 0 : i32
    %0 = arith.cmpi eq, %arg2, %c0_i32 : i32
    %1 = arith.extui %0 : i1 to i32
    %c0_i32_0 = arith.constant 0 : i32
    %2 = arith.cmpi ne, %1, %c0_i32_0 : i32
    scf.if %2 {
      %cst_10 = arith.constant 0.000000e+00 : f32
      %12 = vector.broadcast %cst_10 : f32 to vector<512x128xf32>
      %c0_11 = arith.constant 0 : index
      %c0_12 = arith.constant 0 : index
      %13 = vector.load %arg8[%c0_11, %c0_12] : memref<512x128xf32, #tpu.memory_space<vmem>>, vector<512x128xf32>
      tpu.vector_store %arg8[%c0_11, %c0_12], %12 {strides = array<i32>} : memref<512x128xf32, #tpu.memory_space<vmem>>, vector<512x128xf32>,
    } else {
    }
    %c0 = arith.constant 0 : index
    %c0_1 = arith.constant 0 : index
    %3 = vector.load %arg8[%c0, %c0_1] : memref<512x128xf32, #tpu.memory_space<vmem>>, vector<512x128xf32>
    %c0_2 = arith.constant 0 : index
    %c0_3 = arith.constant 0 : index
    %4 = vector.load %arg3[%c0_2, %c0_3] : memref<512x1536xbf16, #tpu.memory_space<vmem>>, vector<512x1536xbf16>
    %c0_4 = arith.constant 0 : index
    %c0_5 = arith.constant 0 : index
    %5 = vector.load %arg4[%c0_4, %c0_5] : memref<1536x128xbf16, #tpu.memory_space<vmem>>, vector<1536x128xbf16>
    %cst = arith.constant dense<0.000000e+00> : vector<512x128xf32>
    %6 = tpu.matmul %4, %5, %cst {dimension_numbers = #tpu.dot_dimension_numbers<[1], [0], [0], [1], [0, 0, 1, 1], [], []>} : vector<512x1536xbf16>, vector<1536x128xbf16>, vector<512x128xf32> -> vector<512x128xf32>
    %7 = arith.addf %3, %6 : vector<512x128xf32>
    %c0_6 = arith.constant 0 : index
    %c0_7 = arith.constant 0 : index
    %8 = vector.load %arg8[%c0_6, %c0_7] : memref<512x128xf32, #tpu.memory_space<vmem>>, vector<512x128xf32>
    tpu.vector_store %arg8[%c0_6, %c0_7], %7 {strides = array<i32>} : memref<512x128xf32, #tpu.memory_space<vmem>>, vector<512x128xf32>,
    %c0_i32_8 = arith.constant 0 : i32
    %9 = arith.cmpi eq, %arg2, %c0_i32_8 : i32
    %10 = arith.extui %9 : i1 to i32
    %c0_i32_9 = arith.constant 0 : i32
    %11 = arith.cmpi ne, %10, %c0_i32_9 : i32
    scf.if %11 {
      %c0_10 = arith.constant 0 : index
      %c0_11 = arith.constant 0 : index
      %12 = vector.load %arg8[%c0_10, %c0_11] : memref<512x128xf32, #tpu.memory_space<vmem>>, vector<512x128xf32>
      %c0_12 = arith.constant 0 : index
      %c0_13 = arith.constant 0 : index
      %13 = vector.load %arg5[%c0_12, %c0_13] : memref<1x128xf32, #tpu.memory_space<vmem>>, vector<1x128xf32>
      %14 = vector.broadcast %13 : vector<1x128xf32> to vector<512x128xf32>
      %15 = arith.mulf %12, %14 : vector<512x128xf32>
      %c0_14 = arith.constant 0 : index
      %c0_15 = arith.constant 0 : index
      %16 = vector.load %arg6[%c0_14, %c0_15] : memref<1x128xf32, #tpu.memory_space<vmem>>, vector<1x128xf32>
      %17 = vector.broadcast %16 : vector<1x128xf32> to vector<512x128xf32>
      %18 = arith.addf %15, %17 : vector<512x128xf32>
      %cst_16 = arith.constant 0.000000e+00 : f32
      %19 = vector.broadcast %cst_16 : f32 to vector<512x128xf32>
      %20 = arith.maximumf %18, %19 : vector<512x128xf32>
      %21 = arith.truncf %20 : vector<512x128xf32> to vector<512x128xbf16>
      %c0_17 = arith.constant 0 : index
      %c0_18 = arith.constant 0 : index
      %22 = vector.load %arg7[%c0_17, %c0_18] : memref<512x128xbf16, #tpu.memory_space<vmem>>, vector<512x128xbf16>
      tpu.vector_store %arg7[%c0_17, %c0_18], %21 {strides = array<i32>} : memref<512x128xbf16, #tpu.memory_space<vmem>>, vector<512x128xbf16>,
    } else {
    }
    return
  }
  func.func @transform_0(%arg0: i32, %arg1: i32, %arg2: i32) -> (i32, i32) {
    %c0_i32 = arith.constant 0 : i32
    return %arg0, %arg2 : i32, i32
  }
  func.func @transform_1(%arg0: i32, %arg1: i32, %arg2: i32) -> (i32, i32) {
    %c0_i32 = arith.constant 0 : i32
    return %arg2, %arg1 : i32, i32
  }
  func.func @transform_2(%arg0: i32, %arg1: i32, %arg2: i32) -> (i32, i32) {
    %c0_i32 = arith.constant 0 : i32
    %c0_i32_0 = arith.constant 0 : i32
    return %c0_i32, %arg1 : i32, i32
  }
  func.func @transform_3(%arg0: i32, %arg1: i32, %arg2: i32) -> (i32, i32) {
    %c0_i32 = arith.constant 0 : i32
    %c0_i32_0 = arith.constant 0 : i32
    return %c0_i32, %arg1 : i32, i32
  }
  func.func @transform_4(%arg0: i32, %arg1: i32, %arg2: i32) -> (i32, i32) {
    %c0_i32 = arith.constant 0 : i32
    return %arg0, %arg1 : i32, i32
  }
}

</mosaic_0001>

<bundles_post_ra>
// kernel: tpu_custom_call.1
= control target key start
LH: loop header
LB: loop body
LE: loop exit
PB: predicated region body
PF: predicated region fallthrough
CT: control target
= control target key end

     0   :  { %9 = vsyncpa [#allocation4], 0  ;;  %s8260_s0 = inlined_call_operand.hbm [shape: bf16[512,1536], index: 0, kind: input, shape index: {}]   ;;  %s8261_s1 = inlined_call_operand.hbm [shape: bf16[1536,128], index: 1, kind: input, shape index: {}]   ;;  %s8262_s2 = inlined_call_operand.hbm [shape: f32[1,128], index: 2, kind: input, shape index: {}]   ;;  %s8263_s3 = inlined_call_operand.hbm [shape: f32[1,128], index: 3, kind: input, shape index: {}]   ;;  %s8264_s4 = inlined_call_operand.hbm [shape: bf16[512,128], index: 4, kind: output, shape index: {}]  }
   0x1   :  { %10 = vsyncpa [#allocation7], 0 }
   0x2   :  { %11 = vsyncpa [#allocation10], 0 }
   0x3   :  { %12 = vsyncpa [#allocation5], 0  ;;  %s7927_s15 = smov [#allocation6]   ;;  %s7809_s19 = scalar_lea.hbm %s8261_s1, 12288 }
   0x4   :  { %s30_s16 = sshll.u32 %s7927_s15, 4  ;;  %p7810_p0 = scmp.ne.s32.totalorder %s8261_s1, %s7809_s19  ;;  %s31_s16 = int_to_ptr.vmem [resolvable:$true] %s30_s16 }
   0x5   :  { %p7813_p1 = scmp.lt.u32.totalorder %s7809_s19, %s8261_s1 }
   0x7   :  { %p7815_p2 = pnand %p7813_p1, %p7810_p0 }
   0x9   :  { %7818 = shalt.err (!%p7815_p2)
}
   0xa   :  { %s7819_s24 = scalar_lea.vmem %s31_s16, 12288  ;;  %p7824_p4 = scmp.lt.s32.totalorder %s31_s16, %s31_s16 }
   0xb   :  { %p7820_p3 = scmp.ne.s32.totalorder %s31_s16, %s7819_s24  ;;  %p7825_p5 = scmp.lt.s32.totalorder %s7819_s24, %s7819_s24 }
   0xd   :  { %p7826_p6 = por %p7825_p5, %p7824_p4 }
   0xf   :  { %p7827_p7 = pnand %p7826_p6, %p7820_p3 }
  0x11   :  { %7830 = shalt.err (!%p7827_p7)
}
  0x12   :  { %s7928_s25 = smov 64   ;;  %s7929_s26 = smov 4  }
  0x13   :  { %36 = dma.hbm_to_vmem [thread:$0]  %s8261_s1, 12288, %s31_s16, [#allocation7], %s7928_s25, %s7928_s25, %s7929_s26  }
  0x14   :  { %s7930_s29 = smov [#allocation3]   ;;  %s7831_s7 = scalar_lea.hbm %s8260_s0, 49152 }
  0x15   :  { %s18_s30 = sshll.u32 %s7930_s29, 4  ;;  %p7832_p8 = scmp.ne.s32.totalorder %s8260_s0, %s7831_s7  ;;  %s19_s30 = int_to_ptr.vmem [resolvable:$true] %s18_s30 }
  0x16   :  { %p7835_p9 = scmp.lt.u32.totalorder %s7831_s7, %s8260_s0 }
  0x18   :  { %p7837_p10 = pnand %p7835_p9, %p7832_p8 }
  0x1a   :  { %7840 = shalt.err (!%p7837_p10)
}
  0x1b   :  { %s7841_s12 = scalar_lea.vmem %s19_s30, 49152  ;;  %p7846_p12 = scmp.lt.s32.totalorder %s19_s30, %s19_s30 }
  0x1c   :  { %p7842_p11 = scmp.ne.s32.totalorder %s19_s30, %s7841_s12  ;;  %p7847_p13 = scmp.lt.s32.totalorder %s7841_s12, %s7841_s12 }
  0x1e   :  { %p7848_p0 = por %p7847_p13, %p7846_p12 }
  0x20   :  { %p7849_p1 = pnand %p7848_p0, %p7842_p11 }
  0x22   :  { %7852 = shalt.err (!%p7849_p1)
}
  0x23   :  { %s7931_s1 = smov 768   ;;  %s7932_s13 = smov 48  }
  0x24   :  { %24 = dma.hbm_to_vmem [thread:$0]  %s8260_s0, 49152, %s19_s30, [#allocation4], %s7931_s1, %s7931_s1, %s7932_s13  }
  0x25   :  { %s7933_s16 = smov [#allocation8]   ;;  %s7934_s18 = smov [#allocation9]  }
  0x26   :  { %s43_s17 = sshll.u32 %s7933_s16, 4  ;;  %s53_s19 = sshll.u32 %s7934_s18, 4  ;;  %s44_s17 = int_to_ptr.vmem [resolvable:$true] %s43_s17  ;;  %s54_s19 = int_to_ptr.vmem [resolvable:$true] %s53_s19 }
  0x27   :  { %s7853_s22 = scalar_lea.hbm %s8262_s2, 16 }
  0x28   :  { %p7854_p2 = scmp.ne.s32.totalorder %s8262_s2, %s7853_s22  ;;  %p7857_p3 = scmp.lt.u32.totalorder %s7853_s22, %s8262_s2 }
  0x2a   :  { %p7859_p4 = pnand %p7857_p3, %p7854_p2 }
  0x2c   :  { %7862 = shalt.err (!%p7859_p4)
}
  0x2d   :  { %s7863_s0 = scalar_lea.vmem %s44_s17, 16  ;;  %s7867_s29 = scalar_lea.vmem %s44_s17, 32 }
  0x2e   :  { %p7864_p5 = scmp.ne.s32.totalorder %s44_s17, %s7863_s0  ;;  %p7868_p6 = scmp.lt.s32.totalorder %s44_s17, %s44_s17 }
  0x2f   :  { %p7869_p7 = scmp.lt.s32.totalorder %s7867_s29, %s7863_s0 }
  0x31   :  { %p7870_p8 = por %p7869_p7, %p7868_p6 }
  0x33   :  { %p7871_p9 = pnand %p7870_p8, %p7864_p5 }
  0x35   :  { %7874 = shalt.err (!%p7871_p9)
}
  0x36   :  { %46 = dma.hbm_to_vmem [thread:$0]  %s8262_s2, 16, %s44_s17, [#allocation7]  }
  0x37   :  { %s7875_s8 = scalar_lea.hbm %s8263_s3, 16 }
  0x38   :  { %p7876_p10 = scmp.ne.s32.totalorder %s8263_s3, %s7875_s8  ;;  %p7879_p11 = scmp.lt.u32.totalorder %s7875_s8, %s8263_s3 }
  0x3a   :  { %p7881_p12 = pnand %p7879_p11, %p7876_p10 }
  0x3c   :  { %7884 = shalt.err (!%p7881_p12)
}
  0x3d   :  { %s7885_s1 = scalar_lea.vmem %s54_s19, 16  ;;  %s7889_s13 = scalar_lea.vmem %s54_s19, 32 }
  0x3e   :  { %p7886_p13 = scmp.ne.s32.totalorder %s54_s19, %s7885_s1  ;;  %p7890_p0 = scmp.lt.s32.totalorder %s54_s19, %s54_s19 }
  0x3f   :  { %p7891_p1 = scmp.lt.s32.totalorder %s7889_s13, %s7885_s1 }
  0x41   :  { %p7892_p2 = por %p7891_p1, %p7890_p0 }
  0x43   :  { %p7893_p3 = pnand %p7892_p2, %p7886_p13 }
  0x45   :  { %7896 = shalt.err (!%p7893_p3)
}
  0x46   :  { %56 = dma.hbm_to_vmem [thread:$0]  %s8263_s3, 16, %s54_s19, [#allocation10]  }
  0x47   :  { %7919 = dma.done.wait [#allocation4], 49152  }
  0x48   :  { %7920 = vsyncadd [#allocation4], 4294918144 }
  0x49   :  { %7921 = dma.done.wait [#allocation7], 12304  }
  0x4a   :  { %7922 = vsyncadd [#allocation7], 4294954992 }
  0x4b   :  { %7923 = dma.done.wait [#allocation10], 16  }
  0x4c   :  { %7924 = vsyncadd [#allocation10], 4294967280  ;;  %v7935_v0 = vmov 0   ;;  %v7135_v1 = vld [vmem:[#allocation6] sm:$0xff]   ;;  %v7137_v3 = vld [vmem:[#allocation6 + $0x8] sm:$0xff]   ;;  %s7936_s3 = smov [#allocation11]  }
  0x4d   :  { %3274 = vmatprep.subr.bf16.mxu1 %v7935_v0  ;;  %4141 = vmatprep.subr.bf16.mxu0 %v7935_v0  ;;  %v7136_v2 = vld [vmem:[#allocation6 + $0x180] sm:$0xff]   ;;  %v7138_v4 = vld [vmem:[#allocation6 + $0x188] sm:$0xff]   ;;  %v7139_v5 = vld [vmem:[#allocation6 + $0x10] sm:$0xff]   ;;  %s5734_s15 = sshll.u32 %s7936_s3, 4  ;;  %s5735_s15 = int_to_ptr.vmem [resolvable:$true] %s5734_s15 }
  0x4e   :  { %3275 = vmatpush1.bf16.msra.mxu1 %v7135_v1  ;;  %4142 = vmatpush1.bf16.msra.mxu0 %v7136_v2  ;;  %v7140_v6 = vld [vmem:[#allocation6 + $0x190] sm:$0xff]   ;;  %v7141_v7 = vld [vmem:[#allocation6 + $0x18] sm:$0xff]   ;;  %v7143_v9 = vld [vmem:[#allocation6 + $0x20] sm:$0xff]   ;;  %s7897_s16 = scalar_lea.vmem %s5735_s15, 4096  ;;  %p7902_p5 = scmp.lt.s32.totalorder %s5735_s15, %s5735_s15 }
  0x4f   :  { %3276 = vmatprep.subr.bf16.mxu1 %v7935_v0  ;;  %4143 = vmatprep.subr.bf16.mxu0 %v7935_v0  ;;  %v7142_v8 = vld [vmem:[#allocation6 + $0x198] sm:$0xff]   ;;  %v7144_v10 = vld [vmem:[#allocation6 + $0x1a0] sm:$0xff]   ;;  %v7145_v11 = vld [vmem:[#allocation6 + $0x28] sm:$0xff]   ;;  %p7898_p4 = scmp.ne.s32.totalorder %s5735_s15, %s7897_s16  ;;  %p7903_p6 = scmp.lt.s32.totalorder %s7897_s16, %s7897_s16 }
  0x50   :  { %v7146_v12 = vld [vmem:[#allocation6 + $0x1a8] sm:$0xff]   ;;  %v7147_v13 = vld [vmem:[#allocation6 + $0x30] sm:$0xff]   ;;  %v7149_v15 = vld [vmem:[#allocation6 + $0x38] sm:$0xff]  }
  0x51   :  { %v7148_v14 = vld [vmem:[#allocation6 + $0x1b0] sm:$0xff]   ;;  %v7150_v16 = vld [vmem:[#allocation6 + $0x1b8] sm:$0xff]   ;;  %v7151_v17 = vld [vmem:[#allocation6 + $0x40] sm:$0xff]   ;;  %p7904_p7 = por %p7903_p6, %p7902_p5 }
  0x52   :  { %3277 = vmatpush1.bf16.msra.mxu1 %v7137_v3  ;;  %4144 = vmatpush1.bf16.msra.mxu0 %v7138_v4  ;;  %v7152_v18 = vld [vmem:[#allocation6 + $0x1c0] sm:$0xff]   ;;  %v7153_v20 = vld [vmem:[#allocation6 + $0x48] sm:$0xff]   ;;  %v7155_v23 = vld [vmem:[#allocation6 + $0x50] sm:$0xff]  }
  0x53   :  { %3278 = vmatprep.subr.bf16.mxu1 %v7935_v0  ;;  %4145 = vmatprep.subr.bf16.mxu0 %v7935_v0  ;;  %v7169_v19 = vld [vmem:[#allocation3 + $0x4] ss:$48 sps:$4 sm:$0xff]   ;;  %v7172_v21 = vld [vmem:[#allocation3 + $0x1c] ss:$48 sps:$4 sm:$0xff]   ;;  %v7167_v35 = vld [vmem:[#allocation3] ss:$48 sps:$4 sm:$0xff]   ;;  %p7905_p8 = pnand %p7904_p7, %p7898_p4 }
  0x54   :  { %v7154_v22 = vld [vmem:[#allocation6 + $0x1c8] sm:$0xff]   ;;  %3306 = vmatprep.mubr.bf16.mxu1 %v7169_v19  ;;  %4173 = vmatprep.mubr.bf16.mxu0 %v7172_v21  ;;  %v7156_v24 = vld [vmem:[#allocation6 + $0x1d0] sm:$0xff]   ;;  %v7157_v25 = vld [vmem:[#allocation6 + $0x58] sm:$0xff]  }
  0x55   :  { %v7158_v26 = vld [vmem:[#allocation6 + $0x1d8] sm:$0xff]   ;;  %v7159_v27 = vld [vmem:[#allocation6 + $0x60] sm:$0xff]   ;;  %v7161_v29 = vld [vmem:[#allocation6 + $0x68] sm:$0xff]  }
  0x56   :  { %3279 = vmatpush1.bf16.msra.mxu1 %v7139_v5  ;;  %4146 = vmatpush1.bf16.msra.mxu0 %v7140_v6  ;;  %v7160_v28 = vld [vmem:[#allocation6 + $0x1e0] sm:$0xff]   ;;  %v7162_v30 = vld [vmem:[#allocation6 + $0x1e8] sm:$0xff]   ;;  %v7163_v31 = vld [vmem:[#allocation6 + $0x70] sm:$0xff]  }
  0x57   :  { %3280 = vmatprep.subr.bf16.mxu1 %v7935_v0  ;;  %4147 = vmatprep.subr.bf16.mxu0 %v7935_v0  ;;  %v7164_v32 = vld [vmem:[#allocation6 + $0x1f0] sm:$0xff]   ;;  %v7165_v33 = vld [vmem:[#allocation6 + $0x78] sm:$0xff]   ;;  %v7173_v37 = vld [vmem:[#allocation6 + $0x80] sm:$0xff]  }
  0x58   :  { %v7166_v34 = vld [vmem:[#allocation6 + $0x1f8] sm:$0xff]   ;;  %v7174_v38 = vld [vmem:[#allocation6 + $0x200] sm:$0xff]   ;;  %v7187_v41 = vld [vmem:[#allocation6 + $0x88] sm:$0xff]  }
  0x59   :  { %v7170_v36 = vld [vmem:[#allocation3 + $0x18] ss:$48 sps:$4 sm:$0xff]   ;;  %v7175_v39 = vld [vmem:[#allocation3 + $0x64] ss:$48 sps:$4 sm:$0xff]   ;;  %v7177_v40 = vld [vmem:[#allocation3 + $0x7c] ss:$48 sps:$4 sm:$0xff]  }
  0x5a   :  { %3281 = vmatpush1.bf16.msra.mxu1 %v7141_v7  ;;  %4148 = vmatpush1.bf16.msra.mxu0 %v7142_v8  ;;  %v7188_v42 = vld [vmem:[#allocation6 + $0x208] sm:$0xff]   ;;  %v7179_v43 = vld [vmem:[#allocation3 + $0x60] ss:$48 sps:$4 sm:$0xff]   ;;  %v7181_v45 = vld [vmem:[#allocation3 + $0xc4] ss:$48 sps:$4 sm:$0xff]  }
  0x5b   :  { %3282 = vmatprep.subr.bf16.mxu1 %v7935_v0  ;;  %4149 = vmatprep.subr.bf16.mxu0 %v7935_v0  ;;  %v7180_v44 = vld [vmem:[#allocation3 + $0x78] ss:$48 sps:$4 sm:$0xff]   ;;  %v7183_v46 = vld [vmem:[#allocation3 + $0xdc] ss:$48 sps:$4 sm:$0xff]   ;;  %v7201_v47 = vld [vmem:[#allocation6 + $0x90] sm:$0xff]  }
  0x5c   :  { %v7202_v48 = vld [vmem:[#allocation6 + $0x210] sm:$0xff]   ;;  %v7215_v50 = vld [vmem:[#allocation6 + $0x98] sm:$0xff]   ;;  %v7229_v55 = vld [vmem:[#allocation6 + $0xa0] sm:$0xff]  }
  0x5d   :  { %v7185_v49 = vld [vmem:[#allocation3 + $0xc0] ss:$48 sps:$4 sm:$0xff]   ;;  %v7216_v51 = vld [vmem:[#allocation6 + $0x218] sm:$0xff]   ;;  %v7189_v53 = vld [vmem:[#allocation3 + $0x124] ss:$48 sps:$4 sm:$0xff]  }
  0x5e   :  { %3283 = vmatpush1.bf16.msra.mxu1 %v7143_v9  ;;  %4150 = vmatpush1.bf16.msra.mxu0 %v7144_v10  ;;  %v7186_v52 = vld [vmem:[#allocation3 + $0xd8] ss:$48 sps:$4 sm:$0xff]   ;;  %v7191_v54 = vld [vmem:[#allocation3 + $0x13c] ss:$48 sps:$4 sm:$0xff]   ;;  %v7230_v56 = vld [vmem:[#allocation6 + $0x220] sm:$0xff]  }
  0x5f   :  { %3284 = vmatprep.subr.bf16.mxu1 %v7935_v0  ;;  %4151 = vmatprep.subr.bf16.mxu0 %v7935_v0  ;;  %v7243_v57 = vld [vmem:[#allocation6 + $0xa8] sm:$0xff]   ;;  %v7193_v59 = vld [vmem:[#allocation3 + $0x120] ss:$48 sps:$4 sm:$0xff]   ;;  %v7195_v61 = vld [vmem:[#allocation3 + $0x184] ss:$48 sps:$4 sm:$0xff]  }
  0x60   :  { %v7244_v58 = vld [vmem:[#allocation6 + $0x228] sm:$0xff]   ;;  %v7257_v63 = vld [vmem:[#allocation6 + $0xb0] sm:$0xff]   ;;  %v7271_v3 = vld [vmem:[#allocation6 + $0xb8] sm:$0xff]  }
  0x61   :  { %v7194_v60 = vld [vmem:[#allocation3 + $0x138] ss:$48 sps:$4 sm:$0xff]   ;;  %v7197_v62 = vld [vmem:[#allocation3 + $0x19c] ss:$48 sps:$4 sm:$0xff]   ;;  %v7258_v1 = vld [vmem:[#allocation6 + $0x230] sm:$0xff]  }
  0x62   :  { %3285 = vmatpush1.bf16.msra.mxu1 %v7145_v11  ;;  %4152 = vmatpush1.bf16.msra.mxu0 %v7146_v12  ;;  %v7199_v2 = vld [vmem:[#allocation3 + $0x180] ss:$48 sps:$4 sm:$0xff]   ;;  %v7200_v4 = vld [vmem:[#allocation3 + $0x198] ss:$48 sps:$4 sm:$0xff]   ;;  %v7203_v6 = vld [vmem:[#allocation3 + $0x1e4] ss:$48 sps:$4 sm:$0xff]  }
  0x63   :  { %3286 = vmatprep.subr.bf16.mxu1 %v7935_v0  ;;  %4153 = vmatprep.subr.bf16.mxu0 %v7935_v0  ;;  %v7272_v5 = vld [vmem:[#allocation6 + $0x238] sm:$0xff]   ;;  %v7285_v8 = vld [vmem:[#allocation6 + $0xc0] sm:$0xff]   ;;  %v7314_v19 = vld [vmem:[#allocation6 + $0x250] sm:$0xff]  }
  0x64   :  { %v7205_v7 = vld [vmem:[#allocation3 + $0x1fc] ss:$48 sps:$4 sm:$0xff]   ;;  %v7286_v9 = vld [vmem:[#allocation6 + $0x240] sm:$0xff]   ;;  %v7208_v11 = vld [vmem:[#allocation3 + $0x1f8] ss:$48 sps:$4 sm:$0xff]  }
  0x65   :  { %v7207_v10 = vld [vmem:[#allocation3 + $0x1e0] ss:$48 sps:$4 sm:$0xff]   ;;  %v7209_v12 = vld [vmem:[#allocation3 + $0x244] ss:$48 sps:$4 sm:$0xff]   ;;  %v7219_v21 = vld [vmem:[#allocation3 + $0x2bc] ss:$48 sps:$4 sm:$0xff]  }
  0x66   :  { %3287 = vmatpush1.bf16.msra.mxu1 %v7147_v13  ;;  %4154 = vmatpush1.bf16.msra.mxu0 %v7148_v14  ;;  %v7299_v13 = vld [vmem:[#allocation6 + $0xc8] sm:$0xff]  }
  0x67   :  { %3288 = vmatprep.subr.bf16.mxu1 %v7935_v0  ;;  %4155 = vmatprep.subr.bf16.mxu0 %v7935_v0  ;;  %v7300_v14 = vld [vmem:[#allocation6 + $0x248] sm:$0xff]  }
  0x6a   :  { %3289 = vmatpush1.bf16.msra.mxu1 %v7149_v15  ;;  %4156 = vmatpush1.bf16.msra.mxu0 %v7150_v16  ;;  %v7211_v15 = vld [vmem:[#allocation3 + $0x25c] ss:$48 sps:$4 sm:$0xff]   ;;  %v7213_v16 = vld [vmem:[#allocation3 + $0x240] ss:$48 sps:$4 sm:$0xff]  }
  0x6b   :  { %3290 = vmatprep.subr.bf16.mxu1 %v7935_v0  ;;  %4157 = vmatprep.subr.bf16.mxu0 %v7935_v0 }
  0x6e   :  { %3291 = vmatpush1.bf16.msra.mxu1 %v7151_v17  ;;  %4158 = vmatpush1.bf16.msra.mxu0 %v7152_v18  ;;  %v7214_v17 = vld [vmem:[#allocation3 + $0x258] ss:$48 sps:$4 sm:$0xff]   ;;  %v7313_v18 = vld [vmem:[#allocation6 + $0xd0] sm:$0xff]  }
  0x6f   :  { %3292 = vmatprep.subr.bf16.mxu1 %v7935_v0  ;;  %4159 = vmatprep.subr.bf16.mxu0 %v7935_v0 }
  0x72   :  { %3293 = vmatpush1.bf16.msra.mxu1 %v7153_v20  ;;  %4160 = vmatpush1.bf16.msra.mxu0 %v7154_v22  ;;  %v7217_v20 = vld [vmem:[#allocation3 + $0x2a4] ss:$48 sps:$4 sm:$0xff]   ;;  %v7221_v22 = vld [vmem:[#allocation3 + $0x2a0] ss:$48 sps:$4 sm:$0xff]  }
  0x73   :  { %3294 = vmatprep.subr.bf16.mxu1 %v7935_v0  ;;  %4161 = vmatprep.subr.bf16.mxu0 %v7935_v0 }
  0x76   :  { %3295 = vmatpush1.bf16.msra.mxu1 %v7155_v23  ;;  %4162 = vmatpush1.bf16.msra.mxu0 %v7156_v24  ;;  %v7222_v23 = vld [vmem:[#allocation3 + $0x2b8] ss:$48 sps:$4 sm:$0xff]  }
  0x77   :  { %3296 = vmatprep.subr.bf16.mxu1 %v7935_v0  ;;  %4163 = vmatprep.subr.bf16.mxu0 %v7935_v0  ;;  %v7327_v24 = vld [vmem:[#allocation6 + $0xd8] sm:$0xff]  }
  0x7a   :  { %3297 = vmatpush1.bf16.msra.mxu1 %v7157_v25  ;;  %4164 = vmatpush1.bf16.msra.mxu0 %v7158_v26  ;;  %v7328_v25 = vld [vmem:[#allocation6 + $0x258] sm:$0xff]   ;;  %v7223_v26 = vld [vmem:[#allocation3 + $0x304] ss:$48 sps:$4 sm:$0xff]  }
  0x7b   :  { %3298 = vmatprep.subr.bf16.mxu1 %v7935_v0  ;;  %4165 = vmatprep.subr.bf16.mxu0 %v7935_v0 }
  0x7e   :  { %3299 = vmatpush1.bf16.msra.mxu1 %v7159_v27  ;;  %4166 = vmatpush1.bf16.msra.mxu0 %v7160_v28  ;;  %v7225_v27 = vld [vmem:[#allocation3 + $0x31c] ss:$48 sps:$4 sm:$0xff]   ;;  %v7227_v28 = vld [vmem:[#allocation3 + $0x300] ss:$48 sps:$4 sm:$0xff]  }
  0x7f   :  { %3300 = vmatprep.subr.bf16.mxu1 %v7935_v0  ;;  %4167 = vmatprep.subr.bf16.mxu0 %v7935_v0 }
  0x82   :  { %3301 = vmatpush1.bf16.msra.mxu1 %v7161_v29  ;;  %4168 = vmatpush1.bf16.msra.mxu0 %v7162_v30  ;;  %v7228_v29 = vld [vmem:[#allocation3 + $0x318] ss:$48 sps:$4 sm:$0xff]   ;;  %v7231_v30 = vld [vmem:[#allocation3 + $0x364] ss:$48 sps:$4 sm:$0xff]  }
  0x83   :  { %3302 = vmatprep.subr.bf16.mxu1 %v7935_v0  ;;  %4169 = vmatprep.subr.bf16.mxu0 %v7935_v0 }
  0x86   :  { %3303 = vmatpush1.bf16.msra.mxu1 %v7163_v31  ;;  %4170 = vmatpush1.bf16.msra.mxu0 %v7164_v32  ;;  %v7233_v31 = vld [vmem:[#allocation3 + $0x37c] ss:$48 sps:$4 sm:$0xff]   ;;  %v7341_v32 = vld [vmem:[#allocation6 + $0xe0] sm:$0xff]  }
  0x87   :  { %3304 = vmatprep.subr.bf16.mxu1 %v7935_v0  ;;  %4171 = vmatprep.subr.bf16.mxu0 %v7935_v0 }
  0x8a   :  { %3305 = vmatpush1.bf16.msra.mxu1 %v7165_v33  ;;  %4172 = vmatpush1.bf16.msra.mxu0 %v7166_v34  ;;  %v7342_v33 = vld [vmem:[#allocation6 + $0x260] sm:$0xff]  }
  0x8b   :  { %3563 = vmatprep.subr.bf16.mxu1 %v7935_v0  ;;  %4430 = vmatprep.subr.bf16.mxu0 %v7935_v0  ;;  %v7235_v34 = vld [vmem:[#allocation3 + $0x360] ss:$48 sps:$4 sm:$0xff]  }
  0x8d   :  { %3307 = vmatmul.mubr.bf16.vlgmr.msra.gmra.mrb[0].mxu1 %v7167_v35  ;;  %4174 = vmatmul.mubr.bf16.vlgmr.msra.gmra.mrb[0].mxu0 %v7170_v36  ;;  %v7236_v35 = vld [vmem:[#allocation3 + $0x378] ss:$48 sps:$4 sm:$0xff]   ;;  %v7237_v36 = vld [vmem:[#allocation3 + $0x3c4] ss:$48 sps:$4 sm:$0xff]  }
  0x8e   :  { %3564 = vmatpush1.bf16.msra.mxu1 %v7173_v37  ;;  %4431 = vmatpush1.bf16.msra.mxu0 %v7174_v38  ;;  %v7239_v37 = vld [vmem:[#allocation3 + $0x3dc] ss:$48 sps:$4 sm:$0xff]   ;;  %v7241_v38 = vld [vmem:[#allocation3 + $0x3c0] ss:$48 sps:$4 sm:$0xff]  }
  0x8f   :  { %3314 = vmatprep.mubr.bf16.mxu1 %v7175_v39  ;;  %4181 = vmatprep.mubr.bf16.mxu0 %v7177_v40  ;;  %v7242_v39 = vld [vmem:[#allocation3 + $0x3d8] ss:$48 sps:$4 sm:$0xff]   ;;  %v7245_v40 = vld [vmem:[#allocation3 + $0x424] ss:$48 sps:$4 sm:$0xff]  }
  0x90   :  { %3565 = vmatprep.subr.bf16.mxu1 %v7935_v0  ;;  %4432 = vmatprep.subr.bf16.mxu0 %v7935_v0 }
  0x92   :  { %3566 = vmatpush1.bf16.msra.mxu1 %v7187_v41  ;;  %4433 = vmatpush1.bf16.msra.mxu0 %v7188_v42  ;;  %v7247_v41 = vld [vmem:[#allocation3 + $0x43c] ss:$48 sps:$4 sm:$0xff]  }
  0x93   :  { %3567 = vmatprep.subr.bf16.mxu1 %v7935_v0  ;;  %4434 = vmatprep.subr.bf16.mxu0 %v7935_v0  ;;  %v7355_v42 = vld [vmem:[#allocation6 + $0xe8] sm:$0xff]  }
  0x95   :  { %3315 = vmatmul.mubr.bf16.gmra.mrb[4].mxu1 %v7179_v43  ;;  %4182 = vmatmul.mubr.bf16.gmra.mrb[4].mxu0 %v7180_v44  ;;  %v7356_v43 = vld [vmem:[#allocation6 + $0x268] sm:$0xff]   ;;  %v7249_v44 = vld [vmem:[#allocation3 + $0x420] ss:$48 sps:$4 sm:$0xff]  }
  0x96   :  { %3322 = vmatprep.mubr.bf16.mxu1 %v7181_v45  ;;  %4189 = vmatprep.mubr.bf16.mxu0 %v7183_v46  ;;  %v7250_v45 = vld [vmem:[#allocation3 + $0x438] ss:$48 sps:$4 sm:$0xff]   ;;  %v7251_v46 = vld [vmem:[#allocation3 + $0x484] ss:$48 sps:$4 sm:$0xff]  }
  0x97   :  { %3568 = vmatpush1.bf16.msra.mxu1 %v7201_v47  ;;  %4435 = vmatpush1.bf16.msra.mxu0 %v7202_v48  ;;  %v7253_v47 = vld [vmem:[#allocation3 + $0x49c] ss:$48 sps:$4 sm:$0xff]   ;;  %v7255_v48 = vld [vmem:[#allocation3 + $0x480] ss:$48 sps:$4 sm:$0xff]  }
  0x98   :  { %3569 = vmatprep.subr.bf16.mxu1 %v7935_v0  ;;  %4436 = vmatprep.subr.bf16.mxu0 %v7935_v0 }
  0x9b   :  { %3570 = vmatpush1.bf16.msra.mxu1 %v7215_v50  ;;  %4437 = vmatpush1.bf16.msra.mxu0 %v7216_v51  ;;  %v7259_v50 = vld [vmem:[#allocation3 + $0x4e4] ss:$48 sps:$4 sm:$0xff]   ;;  %v7261_v51 = vld [vmem:[#allocation3 + $0x4fc] ss:$48 sps:$4 sm:$0xff]  }
  0x9c   :  { %3571 = vmatprep.subr.bf16.mxu1 %v7935_v0  ;;  %4438 = vmatprep.subr.bf16.mxu0 %v7935_v0 }
  0x9d   :  { %3323 = vmatmul.mubr.bf16.gmra.mrb[8].mxu1 %v7185_v49  ;;  %4190 = vmatmul.mubr.bf16.gmra.mrb[8].mxu0 %v7186_v52  ;;  %v7256_v49 = vld [vmem:[#allocation3 + $0x498] ss:$48 sps:$4 sm:$0xff]   ;;  %v7369_v52 = vld [vmem:[#allocation6 + $0xf0] sm:$0xff]  }
  0x9e   :  { %3330 = vmatprep.mubr.bf16.mxu1 %v7189_v53  ;;  %4197 = vmatprep.mubr.bf16.mxu0 %v7191_v54  ;;  %v7370_v53 = vld [vmem:[#allocation6 + $0x270] sm:$0xff]  }
  0x9f   :  { %3572 = vmatpush1.bf16.msra.mxu1 %v7229_v55  ;;  %4439 = vmatpush1.bf16.msra.mxu0 %v7230_v56  ;;  %v7263_v54 = vld [vmem:[#allocation3 + $0x4e0] ss:$48 sps:$4 sm:$0xff]   ;;  %v7264_v55 = vld [vmem:[#allocation3 + $0x4f8] ss:$48 sps:$4 sm:$0xff]   ;;  %v7265_v56 = vld [vmem:[#allocation3 + $0x544] ss:$48 sps:$4 sm:$0xff]  }
  0xa0   :  { %3573 = vmatprep.subr.bf16.mxu1 %v7935_v0  ;;  %4440 = vmatprep.subr.bf16.mxu0 %v7935_v0 }
  0xa3   :  { %3574 = vmatpush1.bf16.msra.mxu1 %v7243_v57  ;;  %4441 = vmatpush1.bf16.msra.mxu0 %v7244_v58  ;;  %v7267_v57 = vld [vmem:[#allocation3 + $0x55c] ss:$48 sps:$4 sm:$0xff]   ;;  %v7269_v58 = vld [vmem:[#allocation3 + $0x540] ss:$48 sps:$4 sm:$0xff]  }
  0xa4   :  { %3575 = vmatprep.subr.bf16.mxu1 %v7935_v0  ;;  %4442 = vmatprep.subr.bf16.mxu0 %v7935_v0 }
  0xa5   :  { %3331 = vmatmul.mubr.bf16.gmra.mrb[12].mxu1 %v7193_v59  ;;  %4198 = vmatmul.mubr.bf16.gmra.mrb[12].mxu0 %v7194_v60  ;;  %v7270_v59 = vld [vmem:[#allocation3 + $0x558] ss:$48 sps:$4 sm:$0xff]   ;;  %v7273_v60 = vld [vmem:[#allocation3 + $0x5a4] ss:$48 sps:$4 sm:$0xff]  }
  0xa6   :  { %3338 = vmatprep.mubr.bf16.mxu1 %v7195_v61  ;;  %4205 = vmatprep.mubr.bf16.mxu0 %v7197_v62  ;;  %v7275_v61 = vld [vmem:[#allocation3 + $0x5bc] ss:$48 sps:$4 sm:$0xff]  }
  0xa7   :  { %3576 = vmatpush1.bf16.msra.mxu1 %v7257_v63  ;;  %4443 = vmatpush1.bf16.msra.mxu0 %v7258_v1  ;;  %v7383_v62 = vld [vmem:[#allocation6 + $0xf8] sm:$0xff]   ;;  %v7277_v1 = vld [vmem:[#allocation3 + $0x5a0] ss:$48 sps:$4 sm:$0xff]  }
  0xa8   :  { %3577 = vmatprep.subr.bf16.mxu1 %v7935_v0  ;;  %4444 = vmatprep.subr.bf16.mxu0 %v7935_v0  ;;  %v7384_v63 = vld [vmem:[#allocation6 + $0x278] sm:$0xff]  }
  0xab   :  { %3578 = vmatpush1.bf16.msra.mxu1 %v7271_v3  ;;  %4445 = vmatpush1.bf16.msra.mxu0 %v7272_v5  ;;  %v7279_v3 = vld [vmem:[#allocation3 + $0x604] ss:$48 sps:$4 sm:$0xff]   ;;  %v7283_v5 = vld [vmem:[#allocation3 + $0x600] ss:$48 sps:$4 sm:$0xff]  }
  0xac   :  { %3579 = vmatprep.subr.bf16.mxu1 %v7935_v0  ;;  %4446 = vmatprep.subr.bf16.mxu0 %v7935_v0 }
  0xad   :  { %3339 = vmatmul.mubr.bf16.gmra.mrb[16].mxu1 %v7199_v2  ;;  %4206 = vmatmul.mubr.bf16.gmra.mrb[16].mxu0 %v7200_v4  ;;  %v7278_v2 = vld [vmem:[#allocation3 + $0x5b8] ss:$48 sps:$4 sm:$0xff]   ;;  %v7281_v4 = vld [vmem:[#allocation3 + $0x61c] ss:$48 sps:$4 sm:$0xff]  }
  0xae   :  { %3346 = vmatprep.mubr.bf16.mxu1 %v7203_v6  ;;  %4213 = vmatprep.mubr.bf16.mxu0 %v7205_v7  ;;  %v7284_v6 = vld [vmem:[#allocation3 + $0x618] ss:$48 sps:$4 sm:$0xff]   ;;  %v7287_v7 = vld [vmem:[#allocation3 + $0x664] ss:$48 sps:$4 sm:$0xff]  }
  0xaf   :  { %3580 = vmatpush1.bf16.msra.mxu1 %v7285_v8  ;;  %4447 = vmatpush1.bf16.msra.mxu0 %v7286_v9  ;;  %v7289_v8 = vld [vmem:[#allocation3 + $0x67c] ss:$48 sps:$4 sm:$0xff]   ;;  %v7291_v9 = vld [vmem:[#allocation3 + $0x660] ss:$48 sps:$4 sm:$0xff]  }
  0xb0   :  { %3581 = vmatprep.subr.bf16.mxu1 %v7935_v0  ;;  %4448 = vmatprep.subr.bf16.mxu0 %v7935_v0 }
  0xb3   :  { %3582 = vmatpush1.bf16.msra.mxu1 %v7299_v13  ;;  %4449 = vmatpush1.bf16.msra.mxu0 %v7300_v14  ;;  %v7297_v13 = vld [vmem:[#allocation3 + $0x6c0] ss:$48 sps:$4 sm:$0xff]   ;;  %v7298_v14 = vld [vmem:[#allocation3 + $0x6d8] ss:$48 sps:$4 sm:$0xff]  }
  0xb4   :  { %3583 = vmatprep.subr.bf16.mxu1 %v7935_v0  ;;  %4450 = vmatprep.subr.bf16.mxu0 %v7935_v0 }
  0xb5   :  { %3347 = vmatmul.mubr.bf16.gmra.mrb[20].mxu1 %v7207_v10  ;;  %4214 = vmatmul.mubr.bf16.gmra.mrb[20].mxu0 %v7208_v11  ;;  %v7292_v10 = vld [vmem:[#allocation3 + $0x678] ss:$48 sps:$4 sm:$0xff]   ;;  %v7293_v11 = vld [vmem:[#allocation3 + $0x6c4] ss:$48 sps:$4 sm:$0xff]  }
  0xb6   :  { %3354 = vmatprep.mubr.bf16.mxu1 %v7209_v12  ;;  %4221 = vmatprep.mubr.bf16.mxu0 %v7211_v15  ;;  %v7295_v12 = vld [vmem:[#allocation3 + $0x6dc] ss:$48 sps:$4 sm:$0xff]   ;;  %v7301_v15 = vld [vmem:[#allocation3 + $0x724] ss:$48 sps:$4 sm:$0xff]  }
  0xb7   :  { %3584 = vmatpush1.bf16.msra.mxu1 %v7313_v18  ;;  %4451 = vmatpush1.bf16.msra.mxu0 %v7314_v19  ;;  %v7306_v18 = vld [vmem:[#allocation3 + $0x738] ss:$48 sps:$4 sm:$0xff]   ;;  %v7307_v19 = vld [vmem:[#allocation3 + $0x784] ss:$48 sps:$4 sm:$0xff]  }
  0xb8   :  { %3585 = vmatprep.subr.bf16.mxu1 %v7935_v0  ;;  %4452 = vmatprep.subr.bf16.mxu0 %v7935_v0 }
  0xbb   :  { %3586 = vmatpush1.bf16.msra.mxu1 %v7327_v24  ;;  %4453 = vmatpush1.bf16.msra.mxu0 %v7328_v25  ;;  %v7317_v24 = vld [vmem:[#allocation3 + $0x7fc] ss:$48 sps:$4 sm:$0xff]   ;;  %v7319_v25 = vld [vmem:[#allocation3 + $0x7e0] ss:$48 sps:$4 sm:$0xff]  }
  0xbc   :  { %3587 = vmatprep.subr.bf16.mxu1 %v7935_v0  ;;  %4454 = vmatprep.subr.bf16.mxu0 %v7935_v0 }
  0xbd   :  { %3355 = vmatmul.mubr.bf16.gmra.mrb[24].mxu1 %v7213_v16  ;;  %4222 = vmatmul.mubr.bf16.gmra.mrb[24].mxu0 %v7214_v17  ;;  %v7303_v16 = vld [vmem:[#allocation3 + $0x73c] ss:$48 sps:$4 sm:$0xff]   ;;  %v7305_v17 = vld [vmem:[#allocation3 + $0x720] ss:$48 sps:$4 sm:$0xff]  }
  0xbe   :  { %3362 = vmatprep.mubr.bf16.mxu1 %v7217_v20  ;;  %4229 = vmatprep.mubr.bf16.mxu0 %v7219_v21  ;;  %v7309_v20 = vld [vmem:[#allocation3 + $0x79c] ss:$48 sps:$4 sm:$0xff]   ;;  %v7311_v21 = vld [vmem:[#allocation3 + $0x780] ss:$48 sps:$4 sm:$0xff]  }
  0xbf   :  { %3588 = vmatpush1.bf16.msra.mxu1 %v7341_v32  ;;  %4455 = vmatpush1.bf16.msra.mxu0 %v7342_v33  ;;  %v7331_v32 = vld [vmem:[#allocation3 + $0x8bc] ss:$48 sps:$4 sm:$0xff]   ;;  %v7333_v33 = vld [vmem:[#allocation3 + $0x8a0] ss:$48 sps:$4 sm:$0xff]  }
  0xc0   :  { %3589 = vmatprep.subr.bf16.mxu1 %v7935_v0  ;;  %4456 = vmatprep.subr.bf16.mxu0 %v7935_v0 }
  0xc3   :  { %3590 = vmatpush1.bf16.msra.mxu1 %v7355_v42  ;;  %4457 = vmatpush1.bf16.msra.mxu0 %v7356_v43  ;;  %v7348_v42 = vld [vmem:[#allocation3 + $0x978] ss:$48 sps:$4 sm:$0xff]   ;;  %v7349_v43 = vld [vmem:[#allocation3 + $0x9c4] ss:$48 sps:$4 sm:$0xff]  }
  0xc4   :  { %3591 = vmatprep.subr.bf16.mxu1 %v7935_v0  ;;  %4458 = vmatprep.subr.bf16.mxu0 %v7935_v0 }
  0xc5   :  { %3363 = vmatmul.mubr.bf16.gmra.mrb[28].mxu1 %v7221_v22  ;;  %4230 = vmatmul.mubr.bf16.gmra.mrb[28].mxu0 %v7222_v23  ;;  %v7312_v22 = vld [vmem:[#allocation3 + $0x798] ss:$48 sps:$4 sm:$0xff]   ;;  %v7315_v23 = vld [vmem:[#allocation3 + $0x7e4] ss:$48 sps:$4 sm:$0xff]  }
  0xc6   :  { %3370 = vmatprep.mubr.bf16.mxu1 %v7223_v26  ;;  %4237 = vmatprep.mubr.bf16.mxu0 %v7225_v27  ;;  %v7320_v26 = vld [vmem:[#allocation3 + $0x7f8] ss:$48 sps:$4 sm:$0xff]   ;;  %v7321_v27 = vld [vmem:[#allocation3 + $0x844] ss:$48 sps:$4 sm:$0xff]  }
  0xc7   :  { %3592 = vmatpush1.bf16.msra.mxu1 %v7369_v52  ;;  %4459 = vmatpush1.bf16.msra.mxu0 %v7370_v53  ;;  %v7365_v52 = vld [vmem:[#allocation3 + $0xa9c] ss:$48 sps:$4 sm:$0xff]   ;;  %v7367_v53 = vld [vmem:[#allocation3 + $0xa80] ss:$48 sps:$4 sm:$0xff]  }
  0xc8   :  { %3593 = vmatprep.subr.bf16.mxu1 %v7935_v0  ;;  %4460 = vmatprep.subr.bf16.mxu0 %v7935_v0 }
  0xcb   :  { %3594 = vmatpush1.bf16.msra.mxu1 %v7383_v62  ;;  %4461 = vmatpush1.bf16.msra.mxu0 %v7384_v63  ;;  %v7382_v62 = vld [vmem:[#allocation3 + $0xb58] ss:$48 sps:$4 sm:$0xff]   ;;  %v7385_v63 = vld [vmem:[#allocation3 + $0xba4] ss:$48 sps:$4 sm:$0xff]  }
  0xcc   :  { %3852 = vmatprep.subr.bf16.mxu1 %v7935_v0  ;;  %4719 = vmatprep.subr.bf16.mxu0 %v7935_v0 }
  0xcd   :  { %3371 = vmatmul.mubr.bf16.gmra.mrb[32].mxu1 %v7227_v28  ;;  %4238 = vmatmul.mubr.bf16.gmra.mrb[32].mxu0 %v7228_v29  ;;  %v7323_v28 = vld [vmem:[#allocation3 + $0x85c] ss:$48 sps:$4 sm:$0xff]   ;;  %v7325_v29 = vld [vmem:[#allocation3 + $0x840] ss:$48 sps:$4 sm:$0xff]  }
  0xce   :  { %3378 = vmatprep.mubr.bf16.mxu1 %v7231_v30  ;;  %4245 = vmatprep.mubr.bf16.mxu0 %v7233_v31  ;;  %v7326_v30 = vld [vmem:[#allocation3 + $0x858] ss:$48 sps:$4 sm:$0xff]   ;;  %v7329_v31 = vld [vmem:[#allocation3 + $0x8a4] ss:$48 sps:$4 sm:$0xff]  }
  0xd5   :  { %3379 = vmatmul.mubr.bf16.gmra.mrb[36].mxu1 %v7235_v34  ;;  %4246 = vmatmul.mubr.bf16.gmra.mrb[36].mxu0 %v7236_v35  ;;  %v7334_v34 = vld [vmem:[#allocation3 + $0x8b8] ss:$48 sps:$4 sm:$0xff]   ;;  %v7335_v35 = vld [vmem:[#allocation3 + $0x904] ss:$48 sps:$4 sm:$0xff]  }
  0xd6   :  { %3386 = vmatprep.mubr.bf16.mxu1 %v7237_v36  ;;  %4253 = vmatprep.mubr.bf16.mxu0 %v7239_v37  ;;  %v7337_v36 = vld [vmem:[#allocation3 + $0x91c] ss:$48 sps:$4 sm:$0xff]   ;;  %v7339_v37 = vld [vmem:[#allocation3 + $0x900] ss:$48 sps:$4 sm:$0xff]  }
  0xdd   :  { %3387 = vmatmul.mubr.bf16.gmra.mrb[40].mxu1 %v7241_v38  ;;  %4254 = vmatmul.mubr.bf16.gmra.mrb[40].mxu0 %v7242_v39  ;;  %v7340_v38 = vld [vmem:[#allocation3 + $0x918] ss:$48 sps:$4 sm:$0xff]   ;;  %v7343_v39 = vld [vmem:[#allocation3 + $0x964] ss:$48 sps:$4 sm:$0xff]  }
  0xde   :  { %3394 = vmatprep.mubr.bf16.mxu1 %v7245_v40  ;;  %4261 = vmatprep.mubr.bf16.mxu0 %v7247_v41  ;;  %v7345_v40 = vld [vmem:[#allocation3 + $0x97c] ss:$48 sps:$4 sm:$0xff]   ;;  %v7347_v41 = vld [vmem:[#allocation3 + $0x960] ss:$48 sps:$4 sm:$0xff]  }
  0xe5   :  { %3395 = vmatmul.mubr.bf16.gmra.mrb[44].mxu1 %v7249_v44  ;;  %4262 = vmatmul.mubr.bf16.gmra.mrb[44].mxu0 %v7250_v45  ;;  %v7351_v44 = vld [vmem:[#allocation3 + $0x9dc] ss:$48 sps:$4 sm:$0xff]   ;;  %v7353_v45 = vld [vmem:[#allocation3 + $0x9c0] ss:$48 sps:$4 sm:$0xff]  }
  0xe6   :  { %3402 = vmatprep.mubr.bf16.mxu1 %v7251_v46  ;;  %4269 = vmatprep.mubr.bf16.mxu0 %v7253_v47  ;;  %v7354_v46 = vld [vmem:[#allocation3 + $0x9d8] ss:$48 sps:$4 sm:$0xff]   ;;  %v7357_v47 = vld [vmem:[#allocation3 + $0xa24] ss:$48 sps:$4 sm:$0xff]  }
  0xed   :  { %3403 = vmatmul.mubr.bf16.gmra.mrb[48].mxu1 %v7255_v48  ;;  %4270 = vmatmul.mubr.bf16.gmra.mrb[48].mxu0 %v7256_v49  ;;  %v7359_v48 = vld [vmem:[#allocation3 + $0xa3c] ss:$48 sps:$4 sm:$0xff]   ;;  %v7361_v49 = vld [vmem:[#allocation3 + $0xa20] ss:$48 sps:$4 sm:$0xff]  }
  0xee   :  { %3410 = vmatprep.mubr.bf16.mxu1 %v7259_v50  ;;  %4277 = vmatprep.mubr.bf16.mxu0 %v7261_v51  ;;  %v7362_v50 = vld [vmem:[#allocation3 + $0xa38] ss:$48 sps:$4 sm:$0xff]   ;;  %v7363_v51 = vld [vmem:[#allocation3 + $0xa84] ss:$48 sps:$4 sm:$0xff]  }
  0xf5   :  { %3411 = vmatmul.mubr.bf16.gmra.mrb[52].mxu1 %v7263_v54  ;;  %4278 = vmatmul.mubr.bf16.gmra.mrb[52].mxu0 %v7264_v55  ;;  %v7368_v54 = vld [vmem:[#allocation3 + $0xa98] ss:$48 sps:$4 sm:$0xff]   ;;  %v7371_v55 = vld [vmem:[#allocation3 + $0xae4] ss:$48 sps:$4 sm:$0xff]  }
  0xf6   :  { %3418 = vmatprep.mubr.bf16.mxu1 %v7265_v56  ;;  %4285 = vmatprep.mubr.bf16.mxu0 %v7267_v57  ;;  %v7373_v56 = vld [vmem:[#allocation3 + $0xafc] ss:$48 sps:$4 sm:$0xff]   ;;  %v7375_v57 = vld [vmem:[#allocation3 + $0xae0] ss:$48 sps:$4 sm:$0xff]  }
  0xfd   :  { %3419 = vmatmul.mubr.bf16.gmra.mrb[56].mxu1 %v7269_v58  ;;  %4286 = vmatmul.mubr.bf16.gmra.mrb[56].mxu0 %v7270_v59  ;;  %v7376_v58 = vld [vmem:[#allocation3 + $0xaf8] ss:$48 sps:$4 sm:$0xff]   ;;  %v7377_v59 = vld [vmem:[#allocation3 + $0xb44] ss:$48 sps:$4 sm:$0xff]  }
  0xfe   :  { %3426 = vmatprep.mubr.bf16.mxu1 %v7273_v60  ;;  %4293 = vmatprep.mubr.bf16.mxu0 %v7275_v61  ;;  %v7379_v60 = vld [vmem:[#allocation3 + $0xb5c] ss:$48 sps:$4 sm:$0xff]   ;;  %v7381_v61 = vld [vmem:[#allocation3 + $0xb40] ss:$48 sps:$4 sm:$0xff]  }
 0x105   :  { %3427 = vmatmul.mubr.bf16.gmra.mrb[60].mxu1 %v7277_v1  ;;  %4294 = vmatmul.mubr.bf16.gmra.mrb[60].mxu0 %v7278_v2  ;;  %v7387_v1 = vld [vmem:[#allocation3 + $0xbbc] ss:$48 sps:$4 sm:$0xff]   ;;  %v7389_v2 = vld [vmem:[#allocation3 + $0xba0] ss:$48 sps:$4 sm:$0xff]  }
 0x106   :  { %3434 = vmatprep.mubr.bf16.mxu1 %v7279_v3  ;;  %4301 = vmatprep.mubr.bf16.mxu0 %v7281_v4  ;;  %v7390_v3 = vld [vmem:[#allocation3 + $0xbb8] ss:$48 sps:$4 sm:$0xff]   ;;  %v7393_v4 = vld [vmem:[#allocation3 + $0xc] ss:$48 sps:$4 sm:$0xff]  }
 0x10d   :  { %3435 = vmatmul.mubr.bf16.gmra.mrb[64].mxu1 %v7283_v5  ;;  %4302 = vmatmul.mubr.bf16.gmra.mrb[64].mxu0 %v7284_v6  ;;  %v7396_v5 = vld [vmem:[#allocation3 + $0x24] ss:$48 sps:$4 sm:$0xff]   ;;  %v7391_v6 = vld [vmem:[#allocation3 + $0x8] ss:$48 sps:$4 sm:$0xff]  }
 0x10e   :  { %3442 = vmatprep.mubr.bf16.mxu1 %v7287_v7  ;;  %4309 = vmatprep.mubr.bf16.mxu0 %v7289_v8  ;;  %v7394_v7 = vld [vmem:[#allocation3 + $0x20] ss:$48 sps:$4 sm:$0xff]  }
 0x10f   :  { %v7397_v8 = vld [vmem:[#allocation6 + $0x100] sm:$0xff]  }
 0x115   :  { %3443 = vmatmul.mubr.bf16.gmra.mrb[68].mxu1 %v7291_v9  ;;  %4310 = vmatmul.mubr.bf16.gmra.mrb[68].mxu0 %v7292_v10  ;;  %v7398_v9 = vld [vmem:[#allocation6 + $0x280] sm:$0xff]   ;;  %v7399_v10 = vld [vmem:[#allocation3 + $0x6c] ss:$48 sps:$4 sm:$0xff]  }
 0x116   :  { %3450 = vmatprep.mubr.bf16.mxu1 %v7293_v11  ;;  %4317 = vmatprep.mubr.bf16.mxu0 %v7295_v12  ;;  %v7401_v11 = vld [vmem:[#allocation3 + $0x84] ss:$48 sps:$4 sm:$0xff]   ;;  %v7411_v12 = vld [vmem:[#allocation6 + $0x108] sm:$0xff]  }
 0x11d   :  { %3451 = vmatmul.mubr.bf16.gmra.mrb[72].mxu1 %v7297_v13  ;;  %4318 = vmatmul.mubr.bf16.gmra.mrb[72].mxu0 %v7298_v14  ;;  %v7412_v13 = vld [vmem:[#allocation6 + $0x288] sm:$0xff]  }
 0x11e   :  { %3458 = vmatprep.mubr.bf16.mxu1 %v7301_v15  ;;  %4325 = vmatprep.mubr.bf16.mxu0 %v7303_v16  ;;  %v7403_v14 = vld [vmem:[#allocation3 + $0x68] ss:$48 sps:$4 sm:$0xff]   ;;  %v7404_v15 = vld [vmem:[#allocation3 + $0x80] ss:$48 sps:$4 sm:$0xff]   ;;  %v7405_v16 = vld [vmem:[#allocation3 + $0xcc] ss:$48 sps:$4 sm:$0xff]  }
 0x125   :  { %3459 = vmatmul.mubr.bf16.gmra.mrb[76].mxu1 %v7305_v17  ;;  %4326 = vmatmul.mubr.bf16.gmra.mrb[76].mxu0 %v7306_v18  ;;  %v7407_v17 = vld [vmem:[#allocation3 + $0xe4] ss:$48 sps:$4 sm:$0xff]  }
 0x126   :  { %3466 = vmatprep.mubr.bf16.mxu1 %v7307_v19  ;;  %4333 = vmatprep.mubr.bf16.mxu0 %v7309_v20  ;;  %v7425_v18 = vld [vmem:[#allocation6 + $0x110] sm:$0xff]   ;;  %v7439_v20 = vld [vmem:[#allocation6 + $0x118] sm:$0xff]  }
 0x127   :  { %v7426_v19 = vld [vmem:[#allocation6 + $0x290] sm:$0xff]  }
 0x12d   :  { %3467 = vmatmul.mubr.bf16.gmra.mrb[80].mxu1 %v7311_v21  ;;  %4334 = vmatmul.mubr.bf16.gmra.mrb[80].mxu0 %v7312_v22  ;;  %v7440_v21 = vld [vmem:[#allocation6 + $0x298] sm:$0xff]  }
 0x12e   :  { %3474 = vmatprep.mubr.bf16.mxu1 %v7315_v23  ;;  %4341 = vmatprep.mubr.bf16.mxu0 %v7317_v24  ;;  %v7409_v22 = vld [vmem:[#allocation3 + $0xc8] ss:$48 sps:$4 sm:$0xff]   ;;  %v7410_v23 = vld [vmem:[#allocation3 + $0xe0] ss:$48 sps:$4 sm:$0xff]   ;;  %v7413_v24 = vld [vmem:[#allocation3 + $0x12c] ss:$48 sps:$4 sm:$0xff]  }
 0x135   :  { %3475 = vmatmul.mubr.bf16.gmra.mrb[84].mxu1 %v7319_v25  ;;  %4342 = vmatmul.mubr.bf16.gmra.mrb[84].mxu0 %v7320_v26  ;;  %v7415_v25 = vld [vmem:[#allocation3 + $0x144] ss:$48 sps:$4 sm:$0xff]  }
 0x136   :  { %3482 = vmatprep.mubr.bf16.mxu1 %v7321_v27  ;;  %4349 = vmatprep.mubr.bf16.mxu0 %v7323_v28  ;;  %v7453_v26 = vld [vmem:[#allocation6 + $0x120] sm:$0xff]   ;;  %v7467_v28 = vld [vmem:[#allocation6 + $0x128] sm:$0xff]  }
 0x137   :  { %v7454_v27 = vld [vmem:[#allocation6 + $0x2a0] sm:$0xff]  }
 0x13d   :  { %3483 = vmatmul.mubr.bf16.gmra.mrb[88].mxu1 %v7325_v29  ;;  %4350 = vmatmul.mubr.bf16.gmra.mrb[88].mxu0 %v7326_v30  ;;  %v7468_v29 = vld [vmem:[#allocation6 + $0x2a8] sm:$0xff]  }
 0x13e   :  { %3490 = vmatprep.mubr.bf16.mxu1 %v7329_v31  ;;  %4357 = vmatprep.mubr.bf16.mxu0 %v7331_v32  ;;  %v7417_v30 = vld [vmem:[#allocation3 + $0x128] ss:$48 sps:$4 sm:$0xff]   ;;  %v7418_v31 = vld [vmem:[#allocation3 + $0x140] ss:$48 sps:$4 sm:$0xff]   ;;  %v7419_v32 = vld [vmem:[#allocation3 + $0x18c] ss:$48 sps:$4 sm:$0xff]  }
 0x145   :  { %3491 = vmatmul.mubr.bf16.gmra.mrb[92].mxu1 %v7333_v33  ;;  %4358 = vmatmul.mubr.bf16.gmra.mrb[92].mxu0 %v7334_v34  ;;  %v7421_v33 = vld [vmem:[#allocation3 + $0x1a4] ss:$48 sps:$4 sm:$0xff]  }
 0x146   :  { %3498 = vmatprep.mubr.bf16.mxu1 %v7335_v35  ;;  %4365 = vmatprep.mubr.bf16.mxu0 %v7337_v36  ;;  %v7481_v34 = vld [vmem:[#allocation6 + $0x130] sm:$0xff]   ;;  %v7495_v36 = vld [vmem:[#allocation6 + $0x138] sm:$0xff]  }
 0x147   :  { %v7482_v35 = vld [vmem:[#allocation6 + $0x2b0] sm:$0xff]  }
 0x14d   :  { %3499 = vmatmul.mubr.bf16.gmra.mrb[96].mxu1 %v7339_v37  ;;  %4366 = vmatmul.mubr.bf16.gmra.mrb[96].mxu0 %v7340_v38  ;;  %v7496_v37 = vld [vmem:[#allocation6 + $0x2b8] sm:$0xff]  }
 0x14e   :  { %3506 = vmatprep.mubr.bf16.mxu1 %v7343_v39  ;;  %4373 = vmatprep.mubr.bf16.mxu0 %v7345_v40  ;;  %v7423_v38 = vld [vmem:[#allocation3 + $0x188] ss:$48 sps:$4 sm:$0xff]   ;;  %v7424_v39 = vld [vmem:[#allocation3 + $0x1a0] ss:$48 sps:$4 sm:$0xff]   ;;  %v7427_v40 = vld [vmem:[#allocation3 + $0x1ec] ss:$48 sps:$4 sm:$0xff]  }
 0x155   :  { %3507 = vmatmul.mubr.bf16.gmra.mrb[100].mxu1 %v7347_v41  ;;  %4374 = vmatmul.mubr.bf16.gmra.mrb[100].mxu0 %v7348_v42  ;;  %v7429_v41 = vld [vmem:[#allocation3 + $0x204] ss:$48 sps:$4 sm:$0xff]  }
 0x156   :  { %3514 = vmatprep.mubr.bf16.mxu1 %v7349_v43  ;;  %4381 = vmatprep.mubr.bf16.mxu0 %v7351_v44  ;;  %v7509_v42 = vld [vmem:[#allocation6 + $0x140] sm:$0xff]   ;;  %v7523_v44 = vld [vmem:[#allocation6 + $0x148] sm:$0xff]  }
 0x157   :  { %v7510_v43 = vld [vmem:[#allocation6 + $0x2c0] sm:$0xff]  }
 0x15d   :  { %3515 = vmatmul.mubr.bf16.gmra.mrb[104].mxu1 %v7353_v45  ;;  %4382 = vmatmul.mubr.bf16.gmra.mrb[104].mxu0 %v7354_v46  ;;  %v7524_v45 = vld [vmem:[#allocation6 + $0x2c8] sm:$0xff]  }
 0x15e   :  { %3522 = vmatprep.mubr.bf16.mxu1 %v7357_v47  ;;  %4389 = vmatprep.mubr.bf16.mxu0 %v7359_v48  ;;  %v7431_v46 = vld [vmem:[#allocation3 + $0x1e8] ss:$48 sps:$4 sm:$0xff]   ;;  %v7432_v47 = vld [vmem:[#allocation3 + $0x200] ss:$48 sps:$4 sm:$0xff]   ;;  %v7433_v48 = vld [vmem:[#allocation3 + $0x24c] ss:$48 sps:$4 sm:$0xff]  }
 0x165   :  { %3523 = vmatmul.mubr.bf16.gmra.mrb[108].mxu1 %v7361_v49  ;;  %4390 = vmatmul.mubr.bf16.gmra.mrb[108].mxu0 %v7362_v50  ;;  %v7435_v49 = vld [vmem:[#allocation3 + $0x264] ss:$48 sps:$4 sm:$0xff]  }
 0x166   :  { %3530 = vmatprep.mubr.bf16.mxu1 %v7363_v51  ;;  %4397 = vmatprep.mubr.bf16.mxu0 %v7365_v52  ;;  %v7537_v50 = vld [vmem:[#allocation6 + $0x150] sm:$0xff]   ;;  %v7437_v52 = vld [vmem:[#allocation3 + $0x248] ss:$48 sps:$4 sm:$0xff]  }
 0x167   :  { %v7538_v51 = vld [vmem:[#allocation6 + $0x2d0] sm:$0xff]  }
 0x16d   :  { %3531 = vmatmul.mubr.bf16.gmra.mrb[112].mxu1 %v7367_v53  ;;  %4398 = vmatmul.mubr.bf16.gmra.mrb[112].mxu0 %v7368_v54  ;;  %v7438_v53 = vld [vmem:[#allocation3 + $0x260] ss:$48 sps:$4 sm:$0xff]   ;;  %v7441_v54 = vld [vmem:[#allocation3 + $0x2ac] ss:$48 sps:$4 sm:$0xff]  }
 0x16e   :  { %3538 = vmatprep.mubr.bf16.mxu1 %v7371_v55  ;;  %4405 = vmatprep.mubr.bf16.mxu0 %v7373_v56  ;;  %v7443_v55 = vld [vmem:[#allocation3 + $0x2c4] ss:$48 sps:$4 sm:$0xff]   ;;  %v7551_v56 = vld [vmem:[#allocation6 + $0x158] sm:$0xff]  }
 0x175   :  { %3539 = vmatmul.mubr.bf16.gmra.mrb[116].mxu1 %v7375_v57  ;;  %4406 = vmatmul.mubr.bf16.gmra.mrb[116].mxu0 %v7376_v58  ;;  %v7552_v57 = vld [vmem:[#allocation6 + $0x2d8] sm:$0xff]  }
 0x176   :  { %3546 = vmatprep.mubr.bf16.mxu1 %v7377_v59  ;;  %4413 = vmatprep.mubr.bf16.mxu0 %v7379_v60  ;;  %v7445_v58 = vld [vmem:[#allocation3 + $0x2a8] ss:$48 sps:$4 sm:$0xff]   ;;  %v7446_v59 = vld [vmem:[#allocation3 + $0x2c0] ss:$48 sps:$4 sm:$0xff]   ;;  %v7447_v60 = vld [vmem:[#allocation3 + $0x30c] ss:$48 sps:$4 sm:$0xff]  }
 0x17d   :  { %3547 = vmatmul.mubr.bf16.gmra.mrb[120].mxu1 %v7381_v61  ;;  %4414 = vmatmul.mubr.bf16.gmra.mrb[120].mxu0 %v7382_v62  ;;  %v7449_v61 = vld [vmem:[#allocation3 + $0x324] ss:$48 sps:$4 sm:$0xff]   ;;  %v7451_v62 = vld [vmem:[#allocation3 + $0x308] ss:$48 sps:$4 sm:$0xff]  }
 0x17e   :  { %3554 = vmatprep.mubr.bf16.mxu1 %v7385_v63  ;;  %4421 = vmatprep.mubr.bf16.mxu0 %v7387_v1  ;;  %v7452_v63 = vld [vmem:[#allocation3 + $0x320] ss:$48 sps:$4 sm:$0xff]   ;;  %v7455_v1 = vld [vmem:[#allocation3 + $0x36c] ss:$48 sps:$4 sm:$0xff]  }
 0x185   :  { %3555 = vmatmul.mubr.bf16.gmra.mrb[124].mxu1 %v7389_v2  ;;  %4422 = vmatmul.mubr.bf16.gmra.mrb[124].mxu0 %v7390_v3  ;;  %v7457_v2 = vld [vmem:[#allocation3 + $0x384] ss:$48 sps:$4 sm:$0xff]  }
 0x186   :  { %3595 = vmatprep.mubr.bf16.mxu1 %v7393_v4  ;;  %4462 = vmatprep.mubr.bf16.mxu0 %v7396_v5  ;;  %v7565_v3 = vld [vmem:[#allocation6 + $0x160] sm:$0xff]   ;;  %v7459_v5 = vld [vmem:[#allocation3 + $0x368] ss:$48 sps:$4 sm:$0xff]  }
 0x187   :  { %v7566_v4 = vld [vmem:[#allocation6 + $0x2e0] sm:$0xff]  }
 0x18d   :  { %3596 = vmatmul.mubr.bf16.vlgmr.msra.gmra.mrb[0].mxu1 %v7391_v6  ;;  %4463 = vmatmul.mubr.bf16.vlgmr.msra.gmra.mrb[0].mxu0 %v7394_v7  ;;  %v7460_v6 = vld [vmem:[#allocation3 + $0x380] ss:$48 sps:$4 sm:$0xff]   ;;  %v7461_v7 = vld [vmem:[#allocation3 + $0x3cc] ss:$48 sps:$4 sm:$0xff]  }
 0x18e   :  { %3853 = vmatpush1.bf16.msra.mxu1 %v7397_v8  ;;  %4720 = vmatpush1.bf16.msra.mxu0 %v7398_v9  ;;  %v7463_v8 = vld [vmem:[#allocation3 + $0x3e4] ss:$48 sps:$4 sm:$0xff]   ;;  %v7465_v9 = vld [vmem:[#allocation3 + $0x3c8] ss:$48 sps:$4 sm:$0xff]  }
 0x18f   :  { %3603 = vmatprep.mubr.bf16.mxu1 %v7399_v10  ;;  %4470 = vmatprep.mubr.bf16.mxu0 %v7401_v11  ;;  %v7466_v10 = vld [vmem:[#allocation3 + $0x3e0] ss:$48 sps:$4 sm:$0xff]   ;;  %v7469_v11 = vld [vmem:[#allocation3 + $0x42c] ss:$48 sps:$4 sm:$0xff]  }
 0x190   :  { %3854 = vmatprep.subr.bf16.mxu1 %v7935_v0  ;;  %4721 = vmatprep.subr.bf16.mxu0 %v7935_v0 }
 0x192   :  { %3855 = vmatpush1.bf16.msra.mxu1 %v7411_v12  ;;  %4722 = vmatpush1.bf16.msra.mxu0 %v7412_v13  ;;  %v7471_v12 = vld [vmem:[#allocation3 + $0x444] ss:$48 sps:$4 sm:$0xff]   ;;  %v7579_v13 = vld [vmem:[#allocation6 + $0x168] sm:$0xff]  }
 0x193   :  { %3856 = vmatprep.subr.bf16.mxu1 %v7935_v0  ;;  %4723 = vmatprep.subr.bf16.mxu0 %v7935_v0 }
 0x195   :  { %3604 = vmatmul.mubr.bf16.gmra.mrb[4].mxu1 %v7403_v14  ;;  %4471 = vmatmul.mubr.bf16.gmra.mrb[4].mxu0 %v7404_v15  ;;  %v7580_v14 = vld [vmem:[#allocation6 + $0x2e8] sm:$0xff]  }
 0x196   :  { %3611 = vmatprep.mubr.bf16.mxu1 %v7405_v16  ;;  %4478 = vmatprep.mubr.bf16.mxu0 %v7407_v17  ;;  %v7473_v15 = vld [vmem:[#allocation3 + $0x428] ss:$48 sps:$4 sm:$0xff]   ;;  %v7474_v16 = vld [vmem:[#allocation3 + $0x440] ss:$48 sps:$4 sm:$0xff]   ;;  %v7475_v17 = vld [vmem:[#allocation3 + $0x48c] ss:$48 sps:$4 sm:$0xff]  }
 0x197   :  { %3857 = vmatpush1.bf16.msra.mxu1 %v7425_v18  ;;  %4724 = vmatpush1.bf16.msra.mxu0 %v7426_v19  ;;  %v7477_v18 = vld [vmem:[#allocation3 + $0x4a4] ss:$48 sps:$4 sm:$0xff]   ;;  %v7479_v19 = vld [vmem:[#allocation3 + $0x488] ss:$48 sps:$4 sm:$0xff]  }
 0x198   :  { %3858 = vmatprep.subr.bf16.mxu1 %v7935_v0  ;;  %4725 = vmatprep.subr.bf16.mxu0 %v7935_v0 }
 0x19b   :  { %3859 = vmatpush1.bf16.msra.mxu1 %v7439_v20  ;;  %4726 = vmatpush1.bf16.msra.mxu0 %v7440_v21  ;;  %v7480_v20 = vld [vmem:[#allocation3 + $0x4a0] ss:$48 sps:$4 sm:$0xff]   ;;  %v7483_v21 = vld [vmem:[#allocation3 + $0x4ec] ss:$48 sps:$4 sm:$0xff]  }
 0x19c   :  { %3860 = vmatprep.subr.bf16.mxu1 %v7935_v0  ;;  %4727 = vmatprep.subr.bf16.mxu0 %v7935_v0 }
 0x19d   :  { %3612 = vmatmul.mubr.bf16.gmra.mrb[8].mxu1 %v7409_v22  ;;  %4479 = vmatmul.mubr.bf16.gmra.mrb[8].mxu0 %v7410_v23  ;;  %v7485_v22 = vld [vmem:[#allocation3 + $0x504] ss:$48 sps:$4 sm:$0xff]  }
 0x19e   :  { %3619 = vmatprep.mubr.bf16.mxu1 %v7413_v24  ;;  %4486 = vmatprep.mubr.bf16.mxu0 %v7415_v25  ;;  %v7593_v23 = vld [vmem:[#allocation6 + $0x170] sm:$0xff]   ;;  %v7487_v25 = vld [vmem:[#allocation3 + $0x4e8] ss:$48 sps:$4 sm:$0xff]  }
 0x19f   :  { %3861 = vmatpush1.bf16.msra.mxu1 %v7453_v26  ;;  %4728 = vmatpush1.bf16.msra.mxu0 %v7454_v27  ;;  %v7594_v24 = vld [vmem:[#allocation6 + $0x2f0] sm:$0xff]   ;;  %v7489_v27 = vld [vmem:[#allocation3 + $0x54c] ss:$48 sps:$4 sm:$0xff]  }
 0x1a0   :  { %3862 = vmatprep.subr.bf16.mxu1 %v7935_v0  ;;  %4729 = vmatprep.subr.bf16.mxu0 %v7935_v0  ;;  %v7488_v26 = vld [vmem:[#allocation3 + $0x500] ss:$48 sps:$4 sm:$0xff]  }
 0x1a3   :  { %3863 = vmatpush1.bf16.msra.mxu1 %v7467_v28  ;;  %4730 = vmatpush1.bf16.msra.mxu0 %v7468_v29  ;;  %v7491_v28 = vld [vmem:[#allocation3 + $0x564] ss:$48 sps:$4 sm:$0xff]   ;;  %v7493_v29 = vld [vmem:[#allocation3 + $0x548] ss:$48 sps:$4 sm:$0xff]  }
 0x1a4   :  { %3864 = vmatprep.subr.bf16.mxu1 %v7935_v0  ;;  %4731 = vmatprep.subr.bf16.mxu0 %v7935_v0 }
 0x1a5   :  { %3620 = vmatmul.mubr.bf16.gmra.mrb[12].mxu1 %v7417_v30  ;;  %4487 = vmatmul.mubr.bf16.gmra.mrb[12].mxu0 %v7418_v31  ;;  %v7494_v30 = vld [vmem:[#allocation3 + $0x560] ss:$48 sps:$4 sm:$0xff]   ;;  %v7497_v31 = vld [vmem:[#allocation3 + $0x5ac] ss:$48 sps:$4 sm:$0xff]  }
 0x1a6   :  { %3627 = vmatprep.mubr.bf16.mxu1 %v7419_v32  ;;  %4494 = vmatprep.mubr.bf16.mxu0 %v7421_v33  ;;  %v7499_v32 = vld [vmem:[#allocation3 + $0x5c4] ss:$48 sps:$4 sm:$0xff]   ;;  %v7607_v33 = vld [vmem:[#allocation6 + $0x178] sm:$0xff]  }
 0x1a7   :  { %3865 = vmatpush1.bf16.msra.mxu1 %v7481_v34  ;;  %4732 = vmatpush1.bf16.msra.mxu0 %v7482_v35  ;;  %v7608_v34 = vld [vmem:[#allocation6 + $0x2f8] sm:$0xff]   ;;  %v7502_v35 = vld [vmem:[#allocation3 + $0x5c0] ss:$48 sps:$4 sm:$0xff]  }
 0x1a8   :  { %3866 = vmatprep.subr.bf16.mxu1 %v7935_v0  ;;  %4733 = vmatprep.subr.bf16.mxu0 %v7935_v0 }
 0x1ab   :  { %3867 = vmatpush1.bf16.msra.mxu1 %v7495_v36  ;;  %4734 = vmatpush1.bf16.msra.mxu0 %v7496_v37  ;;  %v7503_v36 = vld [vmem:[#allocation3 + $0x60c] ss:$48 sps:$4 sm:$0xff]   ;;  %v7505_v37 = vld [vmem:[#allocation3 + $0x624] ss:$48 sps:$4 sm:$0xff]  }
 0x1ac   :  { %3868 = vmatprep.subr.bf16.mxu1 %v7935_v0  ;;  %4735 = vmatprep.subr.bf16.mxu0 %v7935_v0 }
 0x1ad   :  { %3628 = vmatmul.mubr.bf16.gmra.mrb[16].mxu1 %v7423_v38  ;;  %4495 = vmatmul.mubr.bf16.gmra.mrb[16].mxu0 %v7424_v39  ;;  %v7507_v38 = vld [vmem:[#allocation3 + $0x608] ss:$48 sps:$4 sm:$0xff]   ;;  %v7508_v39 = vld [vmem:[#allocation3 + $0x620] ss:$48 sps:$4 sm:$0xff]  }
 0x1ae   :  { %3635 = vmatprep.mubr.bf16.mxu1 %v7427_v40  ;;  %4502 = vmatprep.mubr.bf16.mxu0 %v7429_v41  ;;  %v7511_v40 = vld [vmem:[#allocation3 + $0x66c] ss:$48 sps:$4 sm:$0xff]   ;;  %v7513_v41 = vld [vmem:[#allocation3 + $0x684] ss:$48 sps:$4 sm:$0xff]  }
 0x1af   :  { %3869 = vmatpush1.bf16.msra.mxu1 %v7509_v42  ;;  %4736 = vmatpush1.bf16.msra.mxu0 %v7510_v43  ;;  %v7515_v42 = vld [vmem:[#allocation3 + $0x668] ss:$48 sps:$4 sm:$0xff]   ;;  %v7516_v43 = vld [vmem:[#allocation3 + $0x680] ss:$48 sps:$4 sm:$0xff]  }
 0x1b0   :  { %3870 = vmatprep.subr.bf16.mxu1 %v7935_v0  ;;  %4737 = vmatprep.subr.bf16.mxu0 %v7935_v0 }
 0x1b3   :  { %3871 = vmatpush1.bf16.msra.mxu1 %v7523_v44  ;;  %4738 = vmatpush1.bf16.msra.mxu0 %v7524_v45  ;;  %v7517_v44 = vld [vmem:[#allocation3 + $0x6cc] ss:$48 sps:$4 sm:$0xff]   ;;  %v7519_v45 = vld [vmem:[#allocation3 + $0x6e4] ss:$48 sps:$4 sm:$0xff]  }
 0x1b4   :  { %3872 = vmatprep.subr.bf16.mxu1 %v7935_v0  ;;  %4739 = vmatprep.subr.bf16.mxu0 %v7935_v0 }
 0x1b5   :  { %3636 = vmatmul.mubr.bf16.gmra.mrb[20].mxu1 %v7431_v46  ;;  %4503 = vmatmul.mubr.bf16.gmra.mrb[20].mxu0 %v7432_v47  ;;  %v7521_v46 = vld [vmem:[#allocation3 + $0x6c8] ss:$48 sps:$4 sm:$0xff]   ;;  %v7522_v47 = vld [vmem:[#allocation3 + $0x6e0] ss:$48 sps:$4 sm:$0xff]  }
 0x1b6   :  { %3643 = vmatprep.mubr.bf16.mxu1 %v7433_v48  ;;  %4510 = vmatprep.mubr.bf16.mxu0 %v7435_v49  ;;  %v7525_v48 = vld [vmem:[#allocation3 + $0x72c] ss:$48 sps:$4 sm:$0xff]   ;;  %v7527_v49 = vld [vmem:[#allocation3 + $0x744] ss:$48 sps:$4 sm:$0xff]  }
 0x1b7   :  { %3873 = vmatpush1.bf16.msra.mxu1 %v7537_v50  ;;  %4740 = vmatpush1.bf16.msra.mxu0 %v7538_v51  ;;  %v7529_v50 = vld [vmem:[#allocation3 + $0x728] ss:$48 sps:$4 sm:$0xff]   ;;  %v7530_v51 = vld [vmem:[#allocation3 + $0x740] ss:$48 sps:$4 sm:$0xff]  }
 0x1b8   :  { %3874 = vmatprep.subr.bf16.mxu1 %v7935_v0  ;;  %4741 = vmatprep.subr.bf16.mxu0 %v7935_v0 }
 0x1bb   :  { %3875 = vmatpush1.bf16.msra.mxu1 %v7551_v56  ;;  %4742 = vmatpush1.bf16.msra.mxu0 %v7552_v57  ;;  %v7539_v56 = vld [vmem:[#allocation3 + $0x7ec] ss:$48 sps:$4 sm:$0xff]   ;;  %v7541_v57 = vld [vmem:[#allocation3 + $0x804] ss:$48 sps:$4 sm:$0xff]  }
 0x1bc   :  { %3876 = vmatprep.subr.bf16.mxu1 %v7935_v0  ;;  %4743 = vmatprep.subr.bf16.mxu0 %v7935_v0 }
 0x1bd   :  { %3644 = vmatmul.mubr.bf16.gmra.mrb[24].mxu1 %v7437_v52  ;;  %4511 = vmatmul.mubr.bf16.gmra.mrb[24].mxu0 %v7438_v53  ;;  %v7531_v52 = vld [vmem:[#allocation3 + $0x78c] ss:$48 sps:$4 sm:$0xff]   ;;  %v7533_v53 = vld [vmem:[#allocation3 + $0x7a4] ss:$48 sps:$4 sm:$0xff]  }
 0x1be   :  { %3651 = vmatprep.mubr.bf16.mxu1 %v7441_v54  ;;  %4518 = vmatprep.mubr.bf16.mxu0 %v7443_v55  ;;  %v7535_v54 = vld [vmem:[#allocation3 + $0x788] ss:$48 sps:$4 sm:$0xff]   ;;  %v7536_v55 = vld [vmem:[#allocation3 + $0x7a0] ss:$48 sps:$4 sm:$0xff]  }
 0x1bf   :  { %3877 = vmatpush1.bf16.msra.mxu1 %v7565_v3  ;;  %4744 = vmatpush1.bf16.msra.mxu0 %v7566_v4  ;;  %v7557_v3 = vld [vmem:[#allocation3 + $0x8a8] ss:$48 sps:$4 sm:$0xff]   ;;  %v7558_v4 = vld [vmem:[#allocation3 + $0x8c0] ss:$48 sps:$4 sm:$0xff]  }
 0x1c0   :  { %3878 = vmatprep.subr.bf16.mxu1 %v7935_v0  ;;  %4745 = vmatprep.subr.bf16.mxu0 %v7935_v0 }
 0x1c3   :  { %3879 = vmatpush1.bf16.msra.mxu1 %v7579_v13  ;;  %4746 = vmatpush1.bf16.msra.mxu0 %v7580_v14  ;;  %v7573_v13 = vld [vmem:[#allocation3 + $0x9cc] ss:$48 sps:$4 sm:$0xff]   ;;  %v7575_v14 = vld [vmem:[#allocation3 + $0x9e4] ss:$48 sps:$4 sm:$0xff]  }
 0x1c4   :  { %3880 = vmatprep.subr.bf16.mxu1 %v7935_v0  ;;  %4747 = vmatprep.subr.bf16.mxu0 %v7935_v0 }
 0x1c5   :  { %3652 = vmatmul.mubr.bf16.gmra.mrb[28].mxu1 %v7445_v58  ;;  %4519 = vmatmul.mubr.bf16.gmra.mrb[28].mxu0 %v7446_v59  ;;  %v7543_v58 = vld [vmem:[#allocation3 + $0x7e8] ss:$48 sps:$4 sm:$0xff]   ;;  %v7544_v59 = vld [vmem:[#allocation3 + $0x800] ss:$48 sps:$4 sm:$0xff]  }
 0x1c6   :  { %3659 = vmatprep.mubr.bf16.mxu1 %v7447_v60  ;;  %4526 = vmatprep.mubr.bf16.mxu0 %v7449_v61  ;;  %v7545_v60 = vld [vmem:[#allocation3 + $0x84c] ss:$48 sps:$4 sm:$0xff]   ;;  %v7547_v61 = vld [vmem:[#allocation3 + $0x864] ss:$48 sps:$4 sm:$0xff]  }
 0x1c7   :  { %3881 = vmatpush1.bf16.msra.mxu1 %v7593_v23  ;;  %4748 = vmatpush1.bf16.msra.mxu0 %v7594_v24  ;;  %v7591_v23 = vld [vmem:[#allocation3 + $0xa88] ss:$48 sps:$4 sm:$0xff]   ;;  %v7592_v24 = vld [vmem:[#allocation3 + $0xaa0] ss:$48 sps:$4 sm:$0xff]  }
 0x1c8   :  { %3882 = vmatprep.subr.bf16.mxu1 %v7935_v0  ;;  %4749 = vmatprep.subr.bf16.mxu0 %v7935_v0  ;;  %v7501_v0 = vld [vmem:[#allocation3 + $0x5a8] ss:$48 sps:$4 sm:$0xff]  }
 0x1cb   :  { %3883 = vmatpush1.bf16.msra.mxu1 %v7607_v33  ;;  %4750 = vmatpush1.bf16.msra.mxu0 %v7608_v34  ;;  %v7609_v33 = vld [vmem:[#allocation3 + $0xbac] ss:$48 sps:$4 sm:$0xff]   ;;  %v7611_v34 = vld [vmem:[#allocation3 + $0xbc4] ss:$48 sps:$4 sm:$0xff]  }
 0x1cd   :  { %3660 = vmatmul.mubr.bf16.gmra.mrb[32].mxu1 %v7451_v62  ;;  %4527 = vmatmul.mubr.bf16.gmra.mrb[32].mxu0 %v7452_v63  ;;  %v7549_v62 = vld [vmem:[#allocation3 + $0x848] ss:$48 sps:$4 sm:$0xff]   ;;  %v7550_v63 = vld [vmem:[#allocation3 + $0x860] ss:$48 sps:$4 sm:$0xff]  }
 0x1ce   :  { %3667 = vmatprep.mubr.bf16.mxu1 %v7455_v1  ;;  %4534 = vmatprep.mubr.bf16.mxu0 %v7457_v2  ;;  %v7553_v1 = vld [vmem:[#allocation3 + $0x8ac] ss:$48 sps:$4 sm:$0xff]   ;;  %v7555_v2 = vld [vmem:[#allocation3 + $0x8c4] ss:$48 sps:$4 sm:$0xff]  }
 0x1d5   :  { %3668 = vmatmul.mubr.bf16.gmra.mrb[36].mxu1 %v7459_v5  ;;  %4535 = vmatmul.mubr.bf16.gmra.mrb[36].mxu0 %v7460_v6  ;;  %v7559_v5 = vld [vmem:[#allocation3 + $0x90c] ss:$48 sps:$4 sm:$0xff]   ;;  %v7561_v6 = vld [vmem:[#allocation3 + $0x924] ss:$48 sps:$4 sm:$0xff]  }
 0x1d6   :  { %3675 = vmatprep.mubr.bf16.mxu1 %v7461_v7  ;;  %4542 = vmatprep.mubr.bf16.mxu0 %v7463_v8  ;;  %v7563_v7 = vld [vmem:[#allocation3 + $0x908] ss:$48 sps:$4 sm:$0xff]   ;;  %v7564_v8 = vld [vmem:[#allocation3 + $0x920] ss:$48 sps:$4 sm:$0xff]  }
 0x1dd   :  { %3676 = vmatmul.mubr.bf16.gmra.mrb[40].mxu1 %v7465_v9  ;;  %4543 = vmatmul.mubr.bf16.gmra.mrb[40].mxu0 %v7466_v10  ;;  %v7567_v9 = vld [vmem:[#allocation3 + $0x96c] ss:$48 sps:$4 sm:$0xff]   ;;  %v7569_v10 = vld [vmem:[#allocation3 + $0x984] ss:$48 sps:$4 sm:$0xff]  }
 0x1de   :  { %3683 = vmatprep.mubr.bf16.mxu1 %v7469_v11  ;;  %4550 = vmatprep.mubr.bf16.mxu0 %v7471_v12  ;;  %v7571_v11 = vld [vmem:[#allocation3 + $0x968] ss:$48 sps:$4 sm:$0xff]   ;;  %v7572_v12 = vld [vmem:[#allocation3 + $0x980] ss:$48 sps:$4 sm:$0xff]  }
 0x1e5   :  { %3684 = vmatmul.mubr.bf16.gmra.mrb[44].mxu1 %v7473_v15  ;;  %4551 = vmatmul.mubr.bf16.gmra.mrb[44].mxu0 %v7474_v16  ;;  %v7577_v15 = vld [vmem:[#allocation3 + $0x9c8] ss:$48 sps:$4 sm:$0xff]   ;;  %v7578_v16 = vld [vmem:[#allocation3 + $0x9e0] ss:$48 sps:$4 sm:$0xff]  }
 0x1e6   :  { %3691 = vmatprep.mubr.bf16.mxu1 %v7475_v17  ;;  %4558 = vmatprep.mubr.bf16.mxu0 %v7477_v18  ;;  %v7581_v17 = vld [vmem:[#allocation3 + $0xa2c] ss:$48 sps:$4 sm:$0xff]   ;;  %v7583_v18 = vld [vmem:[#allocation3 + $0xa44] ss:$48 sps:$4 sm:$0xff]  }
 0x1ed   :  { %3692 = vmatmul.mubr.bf16.gmra.mrb[48].mxu1 %v7479_v19  ;;  %4559 = vmatmul.mubr.bf16.gmra.mrb[48].mxu0 %v7480_v20  ;;  %v7585_v19 = vld [vmem:[#allocation3 + $0xa28] ss:$48 sps:$4 sm:$0xff]   ;;  %v7586_v20 = vld [vmem:[#allocation3 + $0xa40] ss:$48 sps:$4 sm:$0xff]  }
 0x1ee   :  { %3699 = vmatprep.mubr.bf16.mxu1 %v7483_v21  ;;  %4566 = vmatprep.mubr.bf16.mxu0 %v7485_v22  ;;  %v7587_v21 = vld [vmem:[#allocation3 + $0xa8c] ss:$48 sps:$4 sm:$0xff]   ;;  %v7589_v22 = vld [vmem:[#allocation3 + $0xaa4] ss:$48 sps:$4 sm:$0xff]  }
 0x1f5   :  { %3700 = vmatmul.mubr.bf16.gmra.mrb[52].mxu1 %v7487_v25  ;;  %4567 = vmatmul.mubr.bf16.gmra.mrb[52].mxu0 %v7488_v26  ;;  %v7595_v25 = vld [vmem:[#allocation3 + $0xaec] ss:$48 sps:$4 sm:$0xff]   ;;  %v7597_v26 = vld [vmem:[#allocation3 + $0xb04] ss:$48 sps:$4 sm:$0xff]  }
 0x1f6   :  { %3707 = vmatprep.mubr.bf16.mxu1 %v7489_v27  ;;  %4574 = vmatprep.mubr.bf16.mxu0 %v7491_v28  ;;  %v7599_v27 = vld [vmem:[#allocation3 + $0xae8] ss:$48 sps:$4 sm:$0xff]   ;;  %v7600_v28 = vld [vmem:[#allocation3 + $0xb00] ss:$48 sps:$4 sm:$0xff]  }
 0x1fd   :  { %3708 = vmatmul.mubr.bf16.gmra.mrb[56].mxu1 %v7493_v29  ;;  %4575 = vmatmul.mubr.bf16.gmra.mrb[56].mxu0 %v7494_v30  ;;  %v7601_v29 = vld [vmem:[#allocation3 + $0xb4c] ss:$48 sps:$4 sm:$0xff]   ;;  %v7603_v30 = vld [vmem:[#allocation3 + $0xb64] ss:$48 sps:$4 sm:$0xff]  }
 0x1fe   :  { %3715 = vmatprep.mubr.bf16.mxu1 %v7497_v31  ;;  %4582 = vmatprep.mubr.bf16.mxu0 %v7499_v32  ;;  %v7605_v31 = vld [vmem:[#allocation3 + $0xb48] ss:$48 sps:$4 sm:$0xff]   ;;  %v7606_v32 = vld [vmem:[#allocation3 + $0xb60] ss:$48 sps:$4 sm:$0xff]  }
 0x205   :  { %3716 = vmatmul.mubr.bf16.gmra.mrb[60].mxu1 %v7501_v0  ;;  %4583 = vmatmul.mubr.bf16.gmra.mrb[60].mxu0 %v7502_v35  ;;  %v7613_v0 = vld [vmem:[#allocation3 + $0xba8] ss:$48 sps:$4 sm:$0xff]   ;;  %v7614_v35 = vld [vmem:[#allocation3 + $0xbc0] ss:$48 sps:$4 sm:$0xff]  }
 0x206   :  { %3723 = vmatprep.mubr.bf16.mxu1 %v7503_v36  ;;  %4590 = vmatprep.mubr.bf16.mxu0 %v7505_v37  ;;  %v7617_v36 = vld [vmem:[#allocation3 + $0x14] ss:$48 sps:$4 sm:$0xff]   ;;  %v7620_v37 = vld [vmem:[#allocation3 + $0x2c] ss:$48 sps:$4 sm:$0xff]  }
 0x20d   :  { %3724 = vmatmul.mubr.bf16.gmra.mrb[64].mxu1 %v7507_v38  ;;  %4591 = vmatmul.mubr.bf16.gmra.mrb[64].mxu0 %v7508_v39  ;;  %v7615_v38 = vld [vmem:[#allocation3 + $0x10] ss:$48 sps:$4 sm:$0xff]   ;;  %v7618_v39 = vld [vmem:[#allocation3 + $0x28] ss:$48 sps:$4 sm:$0xff]  }
 0x20e   :  { %3731 = vmatprep.mubr.bf16.mxu1 %v7511_v40  ;;  %4598 = vmatprep.mubr.bf16.mxu0 %v7513_v41  ;;  %v7621_v40 = vld [vmem:[#allocation3 + $0x74] ss:$48 sps:$4 sm:$0xff]   ;;  %v7623_v41 = vld [vmem:[#allocation3 + $0x8c] ss:$48 sps:$4 sm:$0xff]  }
 0x215   :  { %3732 = vmatmul.mubr.bf16.gmra.mrb[68].mxu1 %v7515_v42  ;;  %4599 = vmatmul.mubr.bf16.gmra.mrb[68].mxu0 %v7516_v43  ;;  %v7625_v42 = vld [vmem:[#allocation3 + $0x70] ss:$48 sps:$4 sm:$0xff]   ;;  %v7626_v43 = vld [vmem:[#allocation3 + $0x88] ss:$48 sps:$4 sm:$0xff]  }
 0x216   :  { %3739 = vmatprep.mubr.bf16.mxu1 %v7517_v44  ;;  %4606 = vmatprep.mubr.bf16.mxu0 %v7519_v45  ;;  %v7627_v44 = vld [vmem:[#allocation3 + $0xd4] ss:$48 sps:$4 sm:$0xff]   ;;  %v7629_v45 = vld [vmem:[#allocation3 + $0xec] ss:$48 sps:$4 sm:$0xff]  }
 0x21d   :  { %3740 = vmatmul.mubr.bf16.gmra.mrb[72].mxu1 %v7521_v46  ;;  %4607 = vmatmul.mubr.bf16.gmra.mrb[72].mxu0 %v7522_v47  ;;  %v7631_v46 = vld [vmem:[#allocation3 + $0xd0] ss:$48 sps:$4 sm:$0xff]   ;;  %v7632_v47 = vld [vmem:[#allocation3 + $0xe8] ss:$48 sps:$4 sm:$0xff]  }
 0x21e   :  { %3747 = vmatprep.mubr.bf16.mxu1 %v7525_v48  ;;  %4614 = vmatprep.mubr.bf16.mxu0 %v7527_v49  ;;  %v7633_v48 = vld [vmem:[#allocation3 + $0x134] ss:$48 sps:$4 sm:$0xff]   ;;  %v7635_v49 = vld [vmem:[#allocation3 + $0x14c] ss:$48 sps:$4 sm:$0xff]  }
 0x225   :  { %3748 = vmatmul.mubr.bf16.gmra.mrb[76].mxu1 %v7529_v50  ;;  %4615 = vmatmul.mubr.bf16.gmra.mrb[76].mxu0 %v7530_v51  ;;  %v7637_v50 = vld [vmem:[#allocation3 + $0x130] ss:$48 sps:$4 sm:$0xff]   ;;  %v7638_v51 = vld [vmem:[#allocation3 + $0x148] ss:$48 sps:$4 sm:$0xff]  }
 0x226   :  { %3755 = vmatprep.mubr.bf16.mxu1 %v7531_v52  ;;  %4622 = vmatprep.mubr.bf16.mxu0 %v7533_v53  ;;  %v7639_v52 = vld [vmem:[#allocation3 + $0x194] ss:$48 sps:$4 sm:$0xff]   ;;  %v7641_v53 = vld [vmem:[#allocation3 + $0x1ac] ss:$48 sps:$4 sm:$0xff]  }
 0x22d   :  { %3756 = vmatmul.mubr.bf16.gmra.mrb[80].mxu1 %v7535_v54  ;;  %4623 = vmatmul.mubr.bf16.gmra.mrb[80].mxu0 %v7536_v55  ;;  %v7643_v54 = vld [vmem:[#allocation3 + $0x190] ss:$48 sps:$4 sm:$0xff]   ;;  %v7644_v55 = vld [vmem:[#allocation3 + $0x1a8] ss:$48 sps:$4 sm:$0xff]  }
 0x22e   :  { %3763 = vmatprep.mubr.bf16.mxu1 %v7539_v56  ;;  %4630 = vmatprep.mubr.bf16.mxu0 %v7541_v57  ;;  %v7645_v56 = vld [vmem:[#allocation3 + $0x1f4] ss:$48 sps:$4 sm:$0xff]   ;;  %v7647_v57 = vld [vmem:[#allocation3 + $0x20c] ss:$48 sps:$4 sm:$0xff]  }
 0x235   :  { %3764 = vmatmul.mubr.bf16.gmra.mrb[84].mxu1 %v7543_v58  ;;  %4631 = vmatmul.mubr.bf16.gmra.mrb[84].mxu0 %v7544_v59  ;;  %v7649_v58 = vld [vmem:[#allocation3 + $0x1f0] ss:$48 sps:$4 sm:$0xff]   ;;  %v7650_v59 = vld [vmem:[#allocation3 + $0x208] ss:$48 sps:$4 sm:$0xff]  }
 0x236   :  { %3771 = vmatprep.mubr.bf16.mxu1 %v7545_v60  ;;  %4638 = vmatprep.mubr.bf16.mxu0 %v7547_v61  ;;  %v7651_v60 = vld [vmem:[#allocation3 + $0x254] ss:$48 sps:$4 sm:$0xff]   ;;  %v7653_v61 = vld [vmem:[#allocation3 + $0x26c] ss:$48 sps:$4 sm:$0xff]  }
 0x23d   :  { %3772 = vmatmul.mubr.bf16.gmra.mrb[88].mxu1 %v7549_v62  ;;  %4639 = vmatmul.mubr.bf16.gmra.mrb[88].mxu0 %v7550_v63  ;;  %v7655_v62 = vld [vmem:[#allocation3 + $0x250] ss:$48 sps:$4 sm:$0xff]   ;;  %v7656_v63 = vld [vmem:[#allocation3 + $0x268] ss:$48 sps:$4 sm:$0xff]  }
 0x23e   :  { %3779 = vmatprep.mubr.bf16.mxu1 %v7553_v1  ;;  %4646 = vmatprep.mubr.bf16.mxu0 %v7555_v2  ;;  %v7657_v1 = vld [vmem:[#allocation3 + $0x2b4] ss:$48 sps:$4 sm:$0xff]   ;;  %v7659_v2 = vld [vmem:[#allocation3 + $0x2cc] ss:$48 sps:$4 sm:$0xff]  }
 0x245   :  { %3780 = vmatmul.mubr.bf16.gmra.mrb[92].mxu1 %v7557_v3  ;;  %4647 = vmatmul.mubr.bf16.gmra.mrb[92].mxu0 %v7558_v4  ;;  %v7661_v3 = vld [vmem:[#allocation3 + $0x2b0] ss:$48 sps:$4 sm:$0xff]   ;;  %v7662_v4 = vld [vmem:[#allocation3 + $0x2c8] ss:$48 sps:$4 sm:$0xff]  }
 0x246   :  { %3787 = vmatprep.mubr.bf16.mxu1 %v7559_v5  ;;  %4654 = vmatprep.mubr.bf16.mxu0 %v7561_v6  ;;  %v7663_v5 = vld [vmem:[#allocation3 + $0x314] ss:$48 sps:$4 sm:$0xff]   ;;  %v7665_v6 = vld [vmem:[#allocation3 + $0x32c] ss:$48 sps:$4 sm:$0xff]  }
 0x24d   :  { %3788 = vmatmul.mubr.bf16.gmra.mrb[96].mxu1 %v7563_v7  ;;  %4655 = vmatmul.mubr.bf16.gmra.mrb[96].mxu0 %v7564_v8  ;;  %v7667_v7 = vld [vmem:[#allocation3 + $0x310] ss:$48 sps:$4 sm:$0xff]   ;;  %v7668_v8 = vld [vmem:[#allocation3 + $0x328] ss:$48 sps:$4 sm:$0xff]  }
 0x24e   :  { %3795 = vmatprep.mubr.bf16.mxu1 %v7567_v9  ;;  %4662 = vmatprep.mubr.bf16.mxu0 %v7569_v10  ;;  %v7669_v9 = vld [vmem:[#allocation3 + $0x374] ss:$48 sps:$4 sm:$0xff]   ;;  %v7671_v10 = vld [vmem:[#allocation3 + $0x38c] ss:$48 sps:$4 sm:$0xff]  }
 0x255   :  { %3796 = vmatmul.mubr.bf16.gmra.mrb[100].mxu1 %v7571_v11  ;;  %4663 = vmatmul.mubr.bf16.gmra.mrb[100].mxu0 %v7572_v12  ;;  %v7673_v11 = vld [vmem:[#allocation3 + $0x370] ss:$48 sps:$4 sm:$0xff]   ;;  %v7674_v12 = vld [vmem:[#allocation3 + $0x388] ss:$48 sps:$4 sm:$0xff]  }
 0x256   :  { %3803 = vmatprep.mubr.bf16.mxu1 %v7573_v13  ;;  %4670 = vmatprep.mubr.bf16.mxu0 %v7575_v14  ;;  %v7675_v13 = vld [vmem:[#allocation3 + $0x3d4] ss:$48 sps:$4 sm:$0xff]   ;;  %v7677_v14 = vld [vmem:[#allocation3 + $0x3ec] ss:$48 sps:$4 sm:$0xff]  }
 0x25d   :  { %3804 = vmatmul.mubr.bf16.gmra.mrb[104].mxu1 %v7577_v15  ;;  %4671 = vmatmul.mubr.bf16.gmra.mrb[104].mxu0 %v7578_v16  ;;  %v7679_v15 = vld [vmem:[#allocation3 + $0x3d0] ss:$48 sps:$4 sm:$0xff]   ;;  %v7680_v16 = vld [vmem:[#allocation3 + $0x3e8] ss:$48 sps:$4 sm:$0xff]  }
 0x25e   :  { %3811 = vmatprep.mubr.bf16.mxu1 %v7581_v17  ;;  %4678 = vmatprep.mubr.bf16.mxu0 %v7583_v18  ;;  %v7681_v17 = vld [vmem:[#allocation3 + $0x434] ss:$48 sps:$4 sm:$0xff]   ;;  %v7683_v18 = vld [vmem:[#allocation3 + $0x44c] ss:$48 sps:$4 sm:$0xff]  }
 0x265   :  { %3812 = vmatmul.mubr.bf16.gmra.mrb[108].mxu1 %v7585_v19  ;;  %4679 = vmatmul.mubr.bf16.gmra.mrb[108].mxu0 %v7586_v20  ;;  %v7685_v19 = vld [vmem:[#allocation3 + $0x430] ss:$48 sps:$4 sm:$0xff]   ;;  %v7686_v20 = vld [vmem:[#allocation3 + $0x448] ss:$48 sps:$4 sm:$0xff]  }
 0x266   :  { %3819 = vmatprep.mubr.bf16.mxu1 %v7587_v21  ;;  %4686 = vmatprep.mubr.bf16.mxu0 %v7589_v22  ;;  %v7687_v21 = vld [vmem:[#allocation3 + $0x494] ss:$48 sps:$4 sm:$0xff]   ;;  %v7689_v22 = vld [vmem:[#allocation3 + $0x4ac] ss:$48 sps:$4 sm:$0xff]  }
 0x26d   :  { %3820 = vmatmul.mubr.bf16.gmra.mrb[112].mxu1 %v7591_v23  ;;  %4687 = vmatmul.mubr.bf16.gmra.mrb[112].mxu0 %v7592_v24  ;;  %v7691_v23 = vld [vmem:[#allocation3 + $0x490] ss:$48 sps:$4 sm:$0xff]   ;;  %v7692_v24 = vld [vmem:[#allocation3 + $0x4a8] ss:$48 sps:$4 sm:$0xff]  }
 0x26e   :  { %3827 = vmatprep.mubr.bf16.mxu1 %v7595_v25  ;;  %4694 = vmatprep.mubr.bf16.mxu0 %v7597_v26  ;;  %v7693_v25 = vld [vmem:[#allocation3 + $0x4f4] ss:$48 sps:$4 sm:$0xff]   ;;  %v7695_v26 = vld [vmem:[#allocation3 + $0x50c] ss:$48 sps:$4 sm:$0xff]  }
 0x275   :  { %3828 = vmatmul.mubr.bf16.gmra.mrb[116].mxu1 %v7599_v27  ;;  %4695 = vmatmul.mubr.bf16.gmra.mrb[116].mxu0 %v7600_v28  ;;  %v7697_v27 = vld [vmem:[#allocation3 + $0x4f0] ss:$48 sps:$4 sm:$0xff]   ;;  %v7698_v28 = vld [vmem:[#allocation3 + $0x508] ss:$48 sps:$4 sm:$0xff]  }
 0x276   :  { %3835 = vmatprep.mubr.bf16.mxu1 %v7601_v29  ;;  %4702 = vmatprep.mubr.bf16.mxu0 %v7603_v30  ;;  %v7699_v29 = vld [vmem:[#allocation3 + $0x554] ss:$48 sps:$4 sm:$0xff]   ;;  %v7701_v30 = vld [vmem:[#allocation3 + $0x56c] ss:$48 sps:$4 sm:$0xff]  }
 0x27d   :  { %3836 = vmatmul.mubr.bf16.gmra.mrb[120].mxu1 %v7605_v31  ;;  %4703 = vmatmul.mubr.bf16.gmra.mrb[120].mxu0 %v7606_v32  ;;  %v7703_v31 = vld [vmem:[#allocation3 + $0x550] ss:$48 sps:$4 sm:$0xff]   ;;  %v7704_v32 = vld [vmem:[#allocation3 + $0x568] ss:$48 sps:$4 sm:$0xff]  }
 0x27e   :  { %3843 = vmatprep.mubr.bf16.mxu1 %v7609_v33  ;;  %4710 = vmatprep.mubr.bf16.mxu0 %v7611_v34  ;;  %v7705_v33 = vld [vmem:[#allocation3 + $0x5b4] ss:$48 sps:$4 sm:$0xff]   ;;  %v7707_v34 = vld [vmem:[#allocation3 + $0x5cc] ss:$48 sps:$4 sm:$0xff]  }
 0x285   :  { %3844 = vmatmul.mubr.bf16.gmra.mrb[124].mxu1 %v7613_v0  ;;  %4711 = vmatmul.mubr.bf16.gmra.mrb[124].mxu0 %v7614_v35  ;;  %v7709_v0 = vld [vmem:[#allocation3 + $0x5b0] ss:$48 sps:$4 sm:$0xff]   ;;  %v7710_v35 = vld [vmem:[#allocation3 + $0x5c8] ss:$48 sps:$4 sm:$0xff]  }
 0x286   :  { %3884 = vmatprep.mubr.bf16.mxu1 %v7617_v36  ;;  %4751 = vmatprep.mubr.bf16.mxu0 %v7620_v37  ;;  %v7711_v36 = vld [vmem:[#allocation3 + $0x614] ss:$48 sps:$4 sm:$0xff]   ;;  %v7713_v37 = vld [vmem:[#allocation3 + $0x62c] ss:$48 sps:$4 sm:$0xff]  }
 0x28d   :  { %3885 = vmatmul.mubr.bf16.vlgmr.msra.gmra.mrb[0].mxu1 %v7615_v38  ;;  %4752 = vmatmul.mubr.bf16.vlgmr.msra.gmra.mrb[0].mxu0 %v7618_v39  ;;  %v7715_v38 = vld [vmem:[#allocation3 + $0x610] ss:$48 sps:$4 sm:$0xff]   ;;  %v7716_v39 = vld [vmem:[#allocation3 + $0x628] ss:$48 sps:$4 sm:$0xff]  }
 0x28e   :  { %3892 = vmatprep.mubr.bf16.mxu1 %v7621_v40  ;;  %4759 = vmatprep.mubr.bf16.mxu0 %v7623_v41  ;;  %v7717_v40 = vld [vmem:[#allocation3 + $0x674] ss:$48 sps:$4 sm:$0xff]   ;;  %v7719_v41 = vld [vmem:[#allocation3 + $0x68c] ss:$48 sps:$4 sm:$0xff]  }
 0x295   :  { %3893 = vmatmul.mubr.bf16.gmra.mrb[4].mxu1 %v7625_v42  ;;  %4760 = vmatmul.mubr.bf16.gmra.mrb[4].mxu0 %v7626_v43  ;;  %v7721_v42 = vld [vmem:[#allocation3 + $0x670] ss:$48 sps:$4 sm:$0xff]   ;;  %v7722_v43 = vld [vmem:[#allocation3 + $0x688] ss:$48 sps:$4 sm:$0xff]  }
 0x296   :  { %3900 = vmatprep.mubr.bf16.mxu1 %v7627_v44  ;;  %4767 = vmatprep.mubr.bf16.mxu0 %v7629_v45  ;;  %v7723_v44 = vld [vmem:[#allocation3 + $0x6d4] ss:$48 sps:$4 sm:$0xff]   ;;  %v7725_v45 = vld [vmem:[#allocation3 + $0x6ec] ss:$48 sps:$4 sm:$0xff]  }
 0x29d   :  { %3901 = vmatmul.mubr.bf16.gmra.mrb[8].mxu1 %v7631_v46  ;;  %4768 = vmatmul.mubr.bf16.gmra.mrb[8].mxu0 %v7632_v47  ;;  %v7727_v46 = vld [vmem:[#allocation3 + $0x6d0] ss:$48 sps:$4 sm:$0xff]   ;;  %v7728_v47 = vld [vmem:[#allocation3 + $0x6e8] ss:$48 sps:$4 sm:$0xff]  }
 0x29e   :  { %3908 = vmatprep.mubr.bf16.mxu1 %v7633_v48  ;;  %4775 = vmatprep.mubr.bf16.mxu0 %v7635_v49  ;;  %v7729_v48 = vld [vmem:[#allocation3 + $0x734] ss:$48 sps:$4 sm:$0xff]   ;;  %v7731_v49 = vld [vmem:[#allocation3 + $0x74c] ss:$48 sps:$4 sm:$0xff]  }
 0x2a5   :  { %3909 = vmatmul.mubr.bf16.gmra.mrb[12].mxu1 %v7637_v50  ;;  %4776 = vmatmul.mubr.bf16.gmra.mrb[12].mxu0 %v7638_v51  ;;  %v7733_v50 = vld [vmem:[#allocation3 + $0x730] ss:$48 sps:$4 sm:$0xff]   ;;  %v7734_v51 = vld [vmem:[#allocation3 + $0x748] ss:$48 sps:$4 sm:$0xff]  }
 0x2a6   :  { %3916 = vmatprep.mubr.bf16.mxu1 %v7639_v52  ;;  %4783 = vmatprep.mubr.bf16.mxu0 %v7641_v53  ;;  %v7735_v52 = vld [vmem:[#allocation3 + $0x794] ss:$48 sps:$4 sm:$0xff]   ;;  %v7737_v53 = vld [vmem:[#allocation3 + $0x7ac] ss:$48 sps:$4 sm:$0xff]  }
 0x2ad   :  { %3917 = vmatmul.mubr.bf16.gmra.mrb[16].mxu1 %v7643_v54  ;;  %4784 = vmatmul.mubr.bf16.gmra.mrb[16].mxu0 %v7644_v55  ;;  %v7739_v54 = vld [vmem:[#allocation3 + $0x790] ss:$48 sps:$4 sm:$0xff]   ;;  %v7740_v55 = vld [vmem:[#allocation3 + $0x7a8] ss:$48 sps:$4 sm:$0xff]  }
 0x2ae   :  { %3924 = vmatprep.mubr.bf16.mxu1 %v7645_v56  ;;  %4791 = vmatprep.mubr.bf16.mxu0 %v7647_v57  ;;  %v7741_v56 = vld [vmem:[#allocation3 + $0x7f4] ss:$48 sps:$4 sm:$0xff]   ;;  %v7743_v57 = vld [vmem:[#allocation3 + $0x80c] ss:$48 sps:$4 sm:$0xff]  }
 0x2b5   :  { %3925 = vmatmul.mubr.bf16.gmra.mrb[20].mxu1 %v7649_v58  ;;  %4792 = vmatmul.mubr.bf16.gmra.mrb[20].mxu0 %v7650_v59  ;;  %v7745_v58 = vld [vmem:[#allocation3 + $0x7f0] ss:$48 sps:$4 sm:$0xff]   ;;  %v7746_v59 = vld [vmem:[#allocation3 + $0x808] ss:$48 sps:$4 sm:$0xff]  }
 0x2b6   :  { %3932 = vmatprep.mubr.bf16.mxu1 %v7651_v60  ;;  %4799 = vmatprep.mubr.bf16.mxu0 %v7653_v61  ;;  %v7747_v60 = vld [vmem:[#allocation3 + $0x854] ss:$48 sps:$4 sm:$0xff]   ;;  %v7749_v61 = vld [vmem:[#allocation3 + $0x86c] ss:$48 sps:$4 sm:$0xff]  }
 0x2bd   :  { %3933 = vmatmul.mubr.bf16.gmra.mrb[24].mxu1 %v7655_v62  ;;  %4800 = vmatmul.mubr.bf16.gmra.mrb[24].mxu0 %v7656_v63  ;;  %v7751_v62 = vld [vmem:[#allocation3 + $0x850] ss:$48 sps:$4 sm:$0xff]   ;;  %v7752_v63 = vld [vmem:[#allocation3 + $0x868] ss:$48 sps:$4 sm:$0xff]  }
 0x2be   :  { %3940 = vmatprep.mubr.bf16.mxu1 %v7657_v1  ;;  %4807 = vmatprep.mubr.bf16.mxu0 %v7659_v2  ;;  %v7753_v1 = vld [vmem:[#allocation3 + $0x8b4] ss:$48 sps:$4 sm:$0xff]   ;;  %v7755_v2 = vld [vmem:[#allocation3 + $0x8cc] ss:$48 sps:$4 sm:$0xff]  }
 0x2c5   :  { %3941 = vmatmul.mubr.bf16.gmra.mrb[28].mxu1 %v7661_v3  ;;  %4808 = vmatmul.mubr.bf16.gmra.mrb[28].mxu0 %v7662_v4  ;;  %v7757_v3 = vld [vmem:[#allocation3 + $0x8b0] ss:$48 sps:$4 sm:$0xff]   ;;  %v7758_v4 = vld [vmem:[#allocation3 + $0x8c8] ss:$48 sps:$4 sm:$0xff]  }
 0x2c6   :  { %3948 = vmatprep.mubr.bf16.mxu1 %v7663_v5  ;;  %4815 = vmatprep.mubr.bf16.mxu0 %v7665_v6  ;;  %v7759_v5 = vld [vmem:[#allocation3 + $0x914] ss:$48 sps:$4 sm:$0xff]   ;;  %v7761_v6 = vld [vmem:[#allocation3 + $0x92c] ss:$48 sps:$4 sm:$0xff]  }
 0x2cd   :  { %3949 = vmatmul.mubr.bf16.gmra.mrb[32].mxu1 %v7667_v7  ;;  %4816 = vmatmul.mubr.bf16.gmra.mrb[32].mxu0 %v7668_v8  ;;  %v7763_v7 = vld [vmem:[#allocation3 + $0x910] ss:$48 sps:$4 sm:$0xff]   ;;  %v7764_v8 = vld [vmem:[#allocation3 + $0x928] ss:$48 sps:$4 sm:$0xff]  }
 0x2ce   :  { %3956 = vmatprep.mubr.bf16.mxu1 %v7669_v9  ;;  %4823 = vmatprep.mubr.bf16.mxu0 %v7671_v10  ;;  %v7765_v9 = vld [vmem:[#allocation3 + $0x974] ss:$48 sps:$4 sm:$0xff]   ;;  %v7767_v10 = vld [vmem:[#allocation3 + $0x98c] ss:$48 sps:$4 sm:$0xff]  }
 0x2d5   :  { %3957 = vmatmul.mubr.bf16.gmra.mrb[36].mxu1 %v7673_v11  ;;  %4824 = vmatmul.mubr.bf16.gmra.mrb[36].mxu0 %v7674_v12  ;;  %v7769_v11 = vld [vmem:[#allocation3 + $0x970] ss:$48 sps:$4 sm:$0xff]   ;;  %v7770_v12 = vld [vmem:[#allocation3 + $0x988] ss:$48 sps:$4 sm:$0xff]  }
 0x2d6   :  { %3964 = vmatprep.mubr.bf16.mxu1 %v7675_v13  ;;  %4831 = vmatprep.mubr.bf16.mxu0 %v7677_v14  ;;  %v7771_v13 = vld [vmem:[#allocation3 + $0x9d4] ss:$48 sps:$4 sm:$0xff]   ;;  %v7773_v14 = vld [vmem:[#allocation3 + $0x9ec] ss:$48 sps:$4 sm:$0xff]  }
 0x2dd   :  { %3965 = vmatmul.mubr.bf16.gmra.mrb[40].mxu1 %v7679_v15  ;;  %4832 = vmatmul.mubr.bf16.gmra.mrb[40].mxu0 %v7680_v16  ;;  %v7775_v15 = vld [vmem:[#allocation3 + $0x9d0] ss:$48 sps:$4 sm:$0xff]   ;;  %v7776_v16 = vld [vmem:[#allocation3 + $0x9e8] ss:$48 sps:$4 sm:$0xff]  }
 0x2de   :  { %3972 = vmatprep.mubr.bf16.mxu1 %v7681_v17  ;;  %4839 = vmatprep.mubr.bf16.mxu0 %v7683_v18  ;;  %v7777_v17 = vld [vmem:[#allocation3 + $0xa34] ss:$48 sps:$4 sm:$0xff]   ;;  %v7779_v18 = vld [vmem:[#allocation3 + $0xa4c] ss:$48 sps:$4 sm:$0xff]  }
 0x2e5   :  { %3973 = vmatmul.mubr.bf16.gmra.mrb[44].mxu1 %v7685_v19  ;;  %4840 = vmatmul.mubr.bf16.gmra.mrb[44].mxu0 %v7686_v20 }
 0x2e6   :  { %3980 = vmatprep.mubr.bf16.mxu1 %v7687_v21  ;;  %4847 = vmatprep.mubr.bf16.mxu0 %v7689_v22  ;;  %v8109_v21 = vld [vmem:[#allocation8] ss:$0 sm:$0xff] }
 0x2ed   :  { %3981 = vmatmul.mubr.bf16.gmra.mrb[48].mxu1 %v7691_v23  ;;  %4848 = vmatmul.mubr.bf16.gmra.mrb[48].mxu0 %v7692_v24  ;;  %v7781_v23 = vld [vmem:[#allocation3 + $0xa30] ss:$48 sps:$4 sm:$0xff]  }
 0x2ee   :  { %3988 = vmatprep.mubr.bf16.mxu1 %v7693_v25  ;;  %4855 = vmatprep.mubr.bf16.mxu0 %v7695_v26 }
 0x2f5   :  { %3989 = vmatmul.mubr.bf16.gmra.mrb[52].mxu1 %v7697_v27  ;;  %4856 = vmatmul.mubr.bf16.gmra.mrb[52].mxu0 %v7698_v28  ;;  %v7782_v27 = vld [vmem:[#allocation3 + $0xa48] ss:$48 sps:$4 sm:$0xff]   ;;  %v7783_v28 = vld [vmem:[#allocation3 + $0xa94] ss:$48 sps:$4 sm:$0xff]  }
 0x2f6   :  { %3996 = vmatprep.mubr.bf16.mxu1 %v7699_v29  ;;  %4863 = vmatprep.mubr.bf16.mxu0 %v7701_v30  ;;  %v8111_v29 = vld [vmem:[#allocation9] ss:$0 sm:$0xff] }
 0x2fd   :  { %3997 = vmatmul.mubr.bf16.gmra.mrb[56].mxu1 %v7703_v31  ;;  %4864 = vmatmul.mubr.bf16.gmra.mrb[56].mxu0 %v7704_v32  ;;  %v7785_v32 = vld [vmem:[#allocation3 + $0xaac] ss:$48 sps:$4 sm:$0xff]  }
 0x2fe   :  { %4004 = vmatprep.mubr.bf16.mxu1 %v7705_v33  ;;  %4871 = vmatprep.mubr.bf16.mxu0 %v7707_v34 }
 0x305   :  { %4005 = vmatmul.mubr.bf16.gmra.mrb[60].mxu1 %v7709_v0  ;;  %4872 = vmatmul.mubr.bf16.gmra.mrb[60].mxu0 %v7710_v35 }
 0x306   :  { %4012 = vmatprep.mubr.bf16.mxu1 %v7711_v36  ;;  %4879 = vmatprep.mubr.bf16.mxu0 %v7713_v37 }
 0x30d   :  { %4013 = vmatmul.mubr.bf16.gmra.mrb[64].mxu1 %v7715_v38  ;;  %4880 = vmatmul.mubr.bf16.gmra.mrb[64].mxu0 %v7716_v39 }
 0x30e   :  { %4020 = vmatprep.mubr.bf16.mxu1 %v7717_v40  ;;  %4887 = vmatprep.mubr.bf16.mxu0 %v7719_v41  ;;  %v7787_v41 = vld [vmem:[#allocation3 + $0xa90] ss:$48 sps:$4 sm:$0xff]  }
 0x315   :  { %4021 = vmatmul.mubr.bf16.gmra.mrb[68].mxu1 %v7721_v42  ;;  %4888 = vmatmul.mubr.bf16.gmra.mrb[68].mxu0 %v7722_v43  ;;  %v7788_v42 = vld [vmem:[#allocation3 + $0xaa8] ss:$48 sps:$4 sm:$0xff]  }
 0x316   :  { %4028 = vmatprep.mubr.bf16.mxu1 %v7723_v44  ;;  %4895 = vmatprep.mubr.bf16.mxu0 %v7725_v45 }
 0x31d   :  { %4029 = vmatmul.mubr.bf16.gmra.mrb[72].mxu1 %v7727_v46  ;;  %4896 = vmatmul.mubr.bf16.gmra.mrb[72].mxu0 %v7728_v47 }
 0x31e   :  { %4036 = vmatprep.mubr.bf16.mxu1 %v7729_v48  ;;  %4903 = vmatprep.mubr.bf16.mxu0 %v7731_v49  ;;  %v7789_v48 = vld [vmem:[#allocation3 + $0xaf4] ss:$48 sps:$4 sm:$0xff]  }
 0x325   :  { %4037 = vmatmul.mubr.bf16.gmra.mrb[76].mxu1 %v7733_v50  ;;  %4904 = vmatmul.mubr.bf16.gmra.mrb[76].mxu0 %v7734_v51  ;;  %v7791_v51 = vld [vmem:[#allocation3 + $0xb0c] ss:$48 sps:$4 sm:$0xff]  }
 0x326   :  { %4044 = vmatprep.mubr.bf16.mxu1 %v7735_v52  ;;  %4911 = vmatprep.mubr.bf16.mxu0 %v7737_v53 }
 0x32d   :  { %4045 = vmatmul.mubr.bf16.gmra.mrb[80].mxu1 %v7739_v54  ;;  %4912 = vmatmul.mubr.bf16.gmra.mrb[80].mxu0 %v7740_v55 }
 0x32e   :  { %4052 = vmatprep.mubr.bf16.mxu1 %v7741_v56  ;;  %4919 = vmatprep.mubr.bf16.mxu0 %v7743_v57 }
 0x335   :  { %4053 = vmatmul.mubr.bf16.gmra.mrb[84].mxu1 %v7745_v58  ;;  %4920 = vmatmul.mubr.bf16.gmra.mrb[84].mxu0 %v7746_v59 }
 0x336   :  { %4060 = vmatprep.mubr.bf16.mxu1 %v7747_v60  ;;  %4927 = vmatprep.mubr.bf16.mxu0 %v7749_v61 }
 0x33d   :  { %4061 = vmatmul.mubr.bf16.gmra.mrb[88].mxu1 %v7751_v62  ;;  %4928 = vmatmul.mubr.bf16.gmra.mrb[88].mxu0 %v7752_v63  ;;  %v7793_v62 = vld [vmem:[#allocation3 + $0xaf0] ss:$48 sps:$4 sm:$0xff]   ;;  %v7794_v63 = vld [vmem:[#allocation3 + $0xb08] ss:$48 sps:$4 sm:$0xff]  }
 0x33e   :  { %4068 = vmatprep.mubr.bf16.mxu1 %v7753_v1  ;;  %4935 = vmatprep.mubr.bf16.mxu0 %v7755_v2 }
 0x345   :  { %4069 = vmatmul.mubr.bf16.gmra.mrb[92].mxu1 %v7757_v3  ;;  %4936 = vmatmul.mubr.bf16.gmra.mrb[92].mxu0 %v7758_v4 }
 0x346   :  { %4076 = vmatprep.mubr.bf16.mxu1 %v7759_v5  ;;  %4943 = vmatprep.mubr.bf16.mxu0 %v7761_v6  ;;  %v7795_v6 = vld [vmem:[#allocation3 + $0xb54] ss:$48 sps:$4 sm:$0xff]  }
 0x34d   :  { %4077 = vmatmul.mubr.bf16.gmra.mrb[96].mxu1 %v7763_v7  ;;  %4944 = vmatmul.mubr.bf16.gmra.mrb[96].mxu0 %v7764_v8 }
 0x34e   :  { %4084 = vmatprep.mubr.bf16.mxu1 %v7765_v9  ;;  %4951 = vmatprep.mubr.bf16.mxu0 %v7767_v10  ;;  %v7797_v9 = vld [vmem:[#allocation3 + $0xb6c] ss:$48 sps:$4 sm:$0xff]  }
 0x355   :  { %4085 = vmatmul.mubr.bf16.gmra.mrb[100].mxu1 %v7769_v11  ;;  %4952 = vmatmul.mubr.bf16.gmra.mrb[100].mxu0 %v7770_v12 }
 0x356   :  { %4092 = vmatprep.mubr.bf16.mxu1 %v7771_v13  ;;  %4959 = vmatprep.mubr.bf16.mxu0 %v7773_v14 }
 0x35d   :  { %4093 = vmatmul.mubr.bf16.gmra.mrb[104].mxu1 %v7775_v15  ;;  %4960 = vmatmul.mubr.bf16.gmra.mrb[104].mxu0 %v7776_v16 }
 0x35e   :  { %4100 = vmatprep.mubr.bf16.mxu1 %v7777_v17  ;;  %4967 = vmatprep.mubr.bf16.mxu0 %v7779_v18 }
 0x360   :  { %v3886_v19 = vpop.f32.mrb[0].mxu1  ;;  %v4753_v20 = vpop.f32.mrb[0].mxu0 }
 0x361   :  { %v3888_v22 = vpop.f32.mrb[1].mxu1  ;;  %v6549_v24 = vadd.f32 %v4753_v20, %v3886_v19  ;;  %v4755_v25 = vpop.f32.mrb[1].mxu0  ;;  %v7799_v20 = vld [vmem:[#allocation3 + $0xb50] ss:$48 sps:$4 sm:$0xff]  }
 0x362   :  { %v3889_v26 = vpop.f32.mrb[2].mxu1  ;;  %v4756_v30 = vpop.f32.mrb[2].mxu0  ;;  %v7800_v22 = vld [vmem:[#allocation3 + $0xb68] ss:$48 sps:$4 sm:$0xff]  }
 0x363   :  { %v3891_v31 = vpop.f32.mrb[3].mxu1  ;;  %v5210_v33 = vmul.f32 %v6549_v24, %v8109_v21  ;;  %v6550_v34 = vadd.f32 %v4756_v30, %v3889_v26  ;;  %v4758_v0 = vpop.f32.mrb[3].mxu0 }
 0x365   :  { %4101 = vmatmul.mubr.bf16.gmra.mrb[108].mxu1 %v7781_v23  ;;  %v5281_v35 = vadd.f32 %v8111_v29, %v5210_v33  ;;  %v5211_v36 = vmul.f32 %v6550_v34, %v8109_v21  ;;  %4968 = vmatmul.mubr.bf16.gmra.mrb[108].mxu0 %v7782_v27 }
 0x366   :  { %4108 = vmatprep.mubr.bf16.mxu1 %v7783_v28  ;;  %4975 = vmatprep.mubr.bf16.mxu0 %v7785_v32  ;;  %v7801_v28 = vld [vmem:[#allocation3 + $0xbb4] ss:$48 sps:$4 sm:$0xff]   ;;  %v7803_v32 = vld [vmem:[#allocation3 + $0xbcc] ss:$48 sps:$4 sm:$0xff]  }
 0x367   :  { %v5282_v37 = vadd.f32 %v8111_v29, %v5211_v36  ;;  %v5345_v43 = vmax.f32 %v5281_v35, 0.0 }
 0x368   :  { %v3894_v38 = vpop.f32.mrb[4].mxu1  ;;  %v4761_v39 = vpop.f32.mrb[4].mxu0 }
 0x369   :  { %v3896_v40 = vpop.f32.mrb[5].mxu1  ;;  %v5346_v44 = vmax.f32 %v5282_v37, 0.0  ;;  %v6551_v45 = vadd.f32 %v4761_v39, %v3894_v38  ;;  %v4763_v46 = vpop.f32.mrb[5].mxu0 }
 0x36a   :  { %v3897_v47 = vpop.f32.mrb[6].mxu1  ;;  %v4764_v49 = vpop.f32.mrb[6].mxu0 }
 0x36b   :  { %v3899_v50 = vpop.f32.mrb[7].mxu1  ;;  %v6361_v52 = vpack.c.bf16 %v5346_v44, %v5345_v43  ;;  %v5212_v53 = vmul.f32 %v6551_v45, %v8109_v21  ;;  %v6552_v54 = vadd.f32 %v4764_v49, %v3897_v47  ;;  %v4766_v55 = vpop.f32.mrb[7].mxu0 }
 0x36d   :  { %4109 = vmatmul.mubr.bf16.gmra.mrb[112].mxu1 %v7787_v41  ;;  %6362 = vst [vmem:[#allocation11] sm:$0xff] %v6361_v52   ;;  %v5283_v56 = vadd.f32 %v8111_v29, %v5212_v53  ;;  %v5213_v57 = vmul.f32 %v6552_v54, %v8109_v21  ;;  %4976 = vmatmul.mubr.bf16.gmra.mrb[112].mxu0 %v7788_v42  ;;  %v7805_v42 = vld [vmem:[#allocation3 + $0xbb0] ss:$48 sps:$4 sm:$0xff]  }
 0x36e   :  { %4116 = vmatprep.mubr.bf16.mxu1 %v7789_v48  ;;  %4983 = vmatprep.mubr.bf16.mxu0 %v7791_v51  ;;  %v7806_v48 = vld [vmem:[#allocation3 + $0xbc8] ss:$48 sps:$4 sm:$0xff]  }
 0x36f   :  { %v5284_v58 = vadd.f32 %v8111_v29, %v5213_v57  ;;  %v5347_v1 = vmax.f32 %v5283_v56, 0.0 }
 0x370   :  { %v3902_v59 = vpop.f32.mrb[8].mxu1  ;;  %v4769_v60 = vpop.f32.mrb[8].mxu0 }
 0x371   :  { %v3904_v61 = vpop.f32.mrb[9].mxu1  ;;  %v5348_v2 = vmax.f32 %v5284_v58, 0.0  ;;  %v6553_v3 = vadd.f32 %v4769_v60, %v3902_v59  ;;  %v4771_v4 = vpop.f32.mrb[9].mxu0 }
 0x372   :  { %v3905_v5 = vpop.f32.mrb[10].mxu1  ;;  %v4772_v7 = vpop.f32.mrb[10].mxu0 }
 0x373   :  { %v3907_v8 = vpop.f32.mrb[11].mxu1  ;;  %v6366_v10 = vpack.c.bf16 %v5348_v2, %v5347_v1  ;;  %v5214_v11 = vmul.f32 %v6553_v3, %v8109_v21  ;;  %v6554_v12 = vadd.f32 %v4772_v7, %v3905_v5  ;;  %v4774_v13 = vpop.f32.mrb[11].mxu0 }
 0x375   :  { %4117 = vmatmul.mubr.bf16.gmra.mrb[116].mxu1 %v7793_v62  ;;  %6518 = vst [vmem:[#allocation11 + $0x8] sm:$0xff] %v6366_v10   ;;  %v5285_v14 = vadd.f32 %v8111_v29, %v5214_v11  ;;  %v5215_v15 = vmul.f32 %v6554_v12, %v8109_v21  ;;  %4984 = vmatmul.mubr.bf16.gmra.mrb[116].mxu0 %v7794_v63 }
 0x376   :  { %4124 = vmatprep.mubr.bf16.mxu1 %v7795_v6  ;;  %4991 = vmatprep.mubr.bf16.mxu0 %v7797_v9 }
 0x377   :  { %v5286_v16 = vadd.f32 %v8111_v29, %v5215_v15  ;;  %v5349_v23 = vmax.f32 %v5285_v14, 0.0 }
 0x378   :  { %v3910_v17 = vpop.f32.mrb[12].mxu1  ;;  %v4777_v18 = vpop.f32.mrb[12].mxu0 }
 0x379   :  { %v3912_v19 = vpop.f32.mrb[13].mxu1  ;;  %v5350_v24 = vmax.f32 %v5286_v16, 0.0  ;;  %v6555_v25 = vadd.f32 %v4777_v18, %v3910_v17  ;;  %v4779_v26 = vpop.f32.mrb[13].mxu0 }
 0x37a   :  { %v3913_v27 = vpop.f32.mrb[14].mxu1  ;;  %v4780_v30 = vpop.f32.mrb[14].mxu0 }
 0x37b   :  { %v3915_v31 = vpop.f32.mrb[15].mxu1  ;;  %v6371_v33 = vpack.c.bf16 %v5350_v24, %v5349_v23  ;;  %v5216_v34 = vmul.f32 %v6555_v25, %v8109_v21  ;;  %v6556_v0 = vadd.f32 %v4780_v30, %v3913_v27  ;;  %v4782_v35 = vpop.f32.mrb[15].mxu0 }
 0x37d   :  { %4125 = vmatmul.mubr.bf16.gmra.mrb[120].mxu1 %v7799_v20  ;;  %6519 = vst [vmem:[#allocation11 + $0x10] sm:$0xff] %v6371_v33   ;;  %v5287_v36 = vadd.f32 %v8111_v29, %v5216_v34  ;;  %v5217_v37 = vmul.f32 %v6556_v0, %v8109_v21  ;;  %4992 = vmatmul.mubr.bf16.gmra.mrb[120].mxu0 %v7800_v22 }
 0x37e   :  { %4132 = vmatprep.mubr.bf16.mxu1 %v7801_v28  ;;  %4999 = vmatprep.mubr.bf16.mxu0 %v7803_v32 }
 0x37f   :  { %v5288_v38 = vadd.f32 %v8111_v29, %v5217_v37  ;;  %v5351_v43 = vmax.f32 %v5287_v36, 0.0 }
 0x380   :  { %v3918_v39 = vpop.f32.mrb[16].mxu1  ;;  %v4785_v40 = vpop.f32.mrb[16].mxu0 }
 0x381   :  { %v3920_v41 = vpop.f32.mrb[17].mxu1  ;;  %v5352_v44 = vmax.f32 %v5288_v38, 0.0  ;;  %v6557_v45 = vadd.f32 %v4785_v40, %v3918_v39  ;;  %v4787_v46 = vpop.f32.mrb[17].mxu0 }
 0x382   :  { %v3921_v47 = vpop.f32.mrb[18].mxu1  ;;  %v4788_v49 = vpop.f32.mrb[18].mxu0 }
 0x383   :  { %v3923_v50 = vpop.f32.mrb[19].mxu1  ;;  %v6376_v51 = vpack.c.bf16 %v5352_v44, %v5351_v43  ;;  %v5218_v52 = vmul.f32 %v6557_v45, %v8109_v21  ;;  %v6558_v53 = vadd.f32 %v4788_v49, %v3921_v47  ;;  %v4790_v54 = vpop.f32.mrb[19].mxu0 }
 0x385   :  { %4133 = vmatmul.mubr.bf16.gmra.mrb[124].mxu1 %v7805_v42  ;;  %6520 = vst [vmem:[#allocation11 + $0x18] sm:$0xff] %v6376_v51   ;;  %v5289_v55 = vadd.f32 %v8111_v29, %v5218_v52  ;;  %v5219_v56 = vmul.f32 %v6558_v53, %v8109_v21  ;;  %5000 = vmatmul.mubr.bf16.gmra.mrb[124].mxu0 %v7806_v48 }
 0x387   :  { %v5290_v57 = vadd.f32 %v8111_v29, %v5219_v56  ;;  %v5353_v61 = vmax.f32 %v5289_v55, 0.0 }
 0x388   :  { %v3926_v58 = vpop.f32.mrb[20].mxu1  ;;  %v4793_v59 = vpop.f32.mrb[20].mxu0 }
 0x389   :  { %v3928_v60 = vpop.f32.mrb[21].mxu1  ;;  %v5354_v62 = vmax.f32 %v5290_v57, 0.0  ;;  %v6559_v63 = vadd.f32 %v4793_v59, %v3926_v58  ;;  %v4795_v1 = vpop.f32.mrb[21].mxu0 }
 0x38a   :  { %v3929_v2 = vpop.f32.mrb[22].mxu1  ;;  %v4796_v3 = vpop.f32.mrb[22].mxu0 }
 0x38b   :  { %v3931_v4 = vpop.f32.mrb[23].mxu1  ;;  %v6381_v5 = vpack.c.bf16 %v5354_v62, %v5353_v61  ;;  %v5220_v6 = vmul.f32 %v6559_v63, %v8109_v21  ;;  %v6560_v7 = vadd.f32 %v4796_v3, %v3929_v2  ;;  %v4798_v8 = vpop.f32.mrb[23].mxu0 }
 0x38d   :  { %6521 = vst [vmem:[#allocation11 + $0x20] sm:$0xff] %v6381_v5   ;;  %v5291_v9 = vadd.f32 %v8111_v29, %v5220_v6  ;;  %v5221_v10 = vmul.f32 %v6560_v7, %v8109_v21 }
 0x38f   :  { %v5292_v11 = vadd.f32 %v8111_v29, %v5221_v10  ;;  %v5355_v15 = vmax.f32 %v5291_v9, 0.0 }
 0x390   :  { %v3934_v12 = vpop.f32.mrb[24].mxu1  ;;  %v4801_v13 = vpop.f32.mrb[24].mxu0 }
 0x391   :  { %v3936_v14 = vpop.f32.mrb[25].mxu1  ;;  %v5356_v16 = vmax.f32 %v5292_v11, 0.0  ;;  %v6561_v17 = vadd.f32 %v4801_v13, %v3934_v12  ;;  %v4803_v18 = vpop.f32.mrb[25].mxu0 }
 0x392   :  { %v3937_v19 = vpop.f32.mrb[26].mxu1  ;;  %v4804_v20 = vpop.f32.mrb[26].mxu0 }
 0x393   :  { %v3939_v22 = vpop.f32.mrb[27].mxu1  ;;  %v6386_v23 = vpack.c.bf16 %v5356_v16, %v5355_v15  ;;  %v5222_v24 = vmul.f32 %v6561_v17, %v8109_v21  ;;  %v6562_v25 = vadd.f32 %v4804_v20, %v3937_v19  ;;  %v4806_v26 = vpop.f32.mrb[27].mxu0 }
 0x395   :  { %6522 = vst [vmem:[#allocation11 + $0x28] sm:$0xff] %v6386_v23   ;;  %v5293_v27 = vadd.f32 %v8111_v29, %v5222_v24  ;;  %v5223_v28 = vmul.f32 %v6562_v25, %v8109_v21 }
 0x397   :  { %v5294_v30 = vadd.f32 %v8111_v29, %v5223_v28  ;;  %v5357_v34 = vmax.f32 %v5293_v27, 0.0 }
 0x398   :  { %v3942_v31 = vpop.f32.mrb[28].mxu1  ;;  %v4809_v32 = vpop.f32.mrb[28].mxu0 }
 0x399   :  { %v3944_v33 = vpop.f32.mrb[29].mxu1  ;;  %v5358_v0 = vmax.f32 %v5294_v30, 0.0  ;;  %v6563_v35 = vadd.f32 %v4809_v32, %v3942_v31  ;;  %v4811_v36 = vpop.f32.mrb[29].mxu0 }
 0x39a   :  { %v3945_v37 = vpop.f32.mrb[30].mxu1  ;;  %v4812_v38 = vpop.f32.mrb[30].mxu0 }
 0x39b   :  { %v3947_v39 = vpop.f32.mrb[31].mxu1  ;;  %v6391_v40 = vpack.c.bf16 %v5358_v0, %v5357_v34  ;;  %v5224_v41 = vmul.f32 %v6563_v35, %v8109_v21  ;;  %v6564_v42 = vadd.f32 %v4812_v38, %v3945_v37  ;;  %v4814_v43 = vpop.f32.mrb[31].mxu0 }
 0x39d   :  { %6523 = vst [vmem:[#allocation11 + $0x30] sm:$0xff] %v6391_v40   ;;  %v5295_v44 = vadd.f32 %v8111_v29, %v5224_v41  ;;  %v5225_v45 = vmul.f32 %v6564_v42, %v8109_v21 }
 0x39f   :  { %v5296_v46 = vadd.f32 %v8111_v29, %v5225_v45  ;;  %v5359_v50 = vmax.f32 %v5295_v44, 0.0 }
 0x3a0   :  { %v3950_v47 = vpop.f32.mrb[32].mxu1  ;;  %v4817_v48 = vpop.f32.mrb[32].mxu0 }
 0x3a1   :  { %v3952_v49 = vpop.f32.mrb[33].mxu1  ;;  %v5360_v51 = vmax.f32 %v5296_v46, 0.0  ;;  %v6565_v52 = vadd.f32 %v4817_v48, %v3950_v47  ;;  %v4819_v53 = vpop.f32.mrb[33].mxu0 }
 0x3a2   :  { %v3953_v54 = vpop.f32.mrb[34].mxu1  ;;  %v4820_v55 = vpop.f32.mrb[34].mxu0 }
 0x3a3   :  { %v3955_v56 = vpop.f32.mrb[35].mxu1  ;;  %v6396_v57 = vpack.c.bf16 %v5360_v51, %v5359_v50  ;;  %v5226_v58 = vmul.f32 %v6565_v52, %v8109_v21  ;;  %v6566_v59 = vadd.f32 %v4820_v55, %v3953_v54  ;;  %v4822_v60 = vpop.f32.mrb[35].mxu0 }
 0x3a5   :  { %6524 = vst [vmem:[#allocation11 + $0x38] sm:$0xff] %v6396_v57   ;;  %v5297_v61 = vadd.f32 %v8111_v29, %v5226_v58  ;;  %v5227_v62 = vmul.f32 %v6566_v59, %v8109_v21 }
 0x3a7   :  { %v5298_v63 = vadd.f32 %v8111_v29, %v5227_v62  ;;  %v5361_v4 = vmax.f32 %v5297_v61, 0.0 }
 0x3a8   :  { %v3958_v1 = vpop.f32.mrb[36].mxu1  ;;  %v4825_v2 = vpop.f32.mrb[36].mxu0 }
 0x3a9   :  { %v3960_v3 = vpop.f32.mrb[37].mxu1  ;;  %v5362_v5 = vmax.f32 %v5298_v63, 0.0  ;;  %v6567_v6 = vadd.f32 %v4825_v2, %v3958_v1  ;;  %v4827_v7 = vpop.f32.mrb[37].mxu0 }
 0x3aa   :  { %v3961_v8 = vpop.f32.mrb[38].mxu1  ;;  %v4828_v9 = vpop.f32.mrb[38].mxu0 }
 0x3ab   :  { %v3963_v10 = vpop.f32.mrb[39].mxu1  ;;  %v6401_v11 = vpack.c.bf16 %v5362_v5, %v5361_v4  ;;  %v5228_v12 = vmul.f32 %v6567_v6, %v8109_v21  ;;  %v6568_v13 = vadd.f32 %v4828_v9, %v3961_v8  ;;  %v4830_v14 = vpop.f32.mrb[39].mxu0 }
 0x3ad   :  { %6525 = vst [vmem:[#allocation11 + $0x40] sm:$0xff] %v6401_v11   ;;  %v5299_v15 = vadd.f32 %v8111_v29, %v5228_v12  ;;  %v5229_v16 = vmul.f32 %v6568_v13, %v8109_v21 }
 0x3af   :  { %v5300_v17 = vadd.f32 %v8111_v29, %v5229_v16  ;;  %v5363_v22 = vmax.f32 %v5299_v15, 0.0 }
 0x3b0   :  { %v3966_v18 = vpop.f32.mrb[40].mxu1  ;;  %v4833_v19 = vpop.f32.mrb[40].mxu0 }
 0x3b1   :  { %v3968_v20 = vpop.f32.mrb[41].mxu1  ;;  %v5364_v23 = vmax.f32 %v5300_v17, 0.0  ;;  %v6569_v24 = vadd.f32 %v4833_v19, %v3966_v18  ;;  %v4835_v25 = vpop.f32.mrb[41].mxu0 }
 0x3b2   :  { %v3969_v26 = vpop.f32.mrb[42].mxu1  ;;  %v4836_v27 = vpop.f32.mrb[42].mxu0 }
 0x3b3   :  { %v3971_v28 = vpop.f32.mrb[43].mxu1  ;;  %v6406_v30 = vpack.c.bf16 %v5364_v23, %v5363_v22  ;;  %v5230_v31 = vmul.f32 %v6569_v24, %v8109_v21  ;;  %v6570_v32 = vadd.f32 %v4836_v27, %v3969_v26  ;;  %v4838_v33 = vpop.f32.mrb[43].mxu0 }
 0x3b5   :  { %6526 = vst [vmem:[#allocation11 + $0x48] sm:$0xff] %v6406_v30   ;;  %v5301_v34 = vadd.f32 %v8111_v29, %v5230_v31  ;;  %v5231_v0 = vmul.f32 %v6570_v32, %v8109_v21 }
 0x3b7   :  { %v5302_v35 = vadd.f32 %v8111_v29, %v5231_v0  ;;  %v5365_v39 = vmax.f32 %v5301_v34, 0.0 }
 0x3b8   :  { %v3974_v36 = vpop.f32.mrb[44].mxu1  ;;  %v4841_v37 = vpop.f32.mrb[44].mxu0 }
 0x3b9   :  { %v3976_v38 = vpop.f32.mrb[45].mxu1  ;;  %v5366_v40 = vmax.f32 %v5302_v35, 0.0  ;;  %v6571_v41 = vadd.f32 %v4841_v37, %v3974_v36  ;;  %v4843_v42 = vpop.f32.mrb[45].mxu0 }
 0x3ba   :  { %v3977_v43 = vpop.f32.mrb[46].mxu1  ;;  %v4844_v44 = vpop.f32.mrb[46].mxu0 }
 0x3bb   :  { %v3979_v45 = vpop.f32.mrb[47].mxu1  ;;  %v6411_v46 = vpack.c.bf16 %v5366_v40, %v5365_v39  ;;  %v5232_v47 = vmul.f32 %v6571_v41, %v8109_v21  ;;  %v6572_v48 = vadd.f32 %v4844_v44, %v3977_v43  ;;  %v4846_v49 = vpop.f32.mrb[47].mxu0 }
 0x3bd   :  { %6527 = vst [vmem:[#allocation11 + $0x50] sm:$0xff] %v6411_v46   ;;  %v5303_v50 = vadd.f32 %v8111_v29, %v5232_v47  ;;  %v5233_v51 = vmul.f32 %v6572_v48, %v8109_v21 }
 0x3bf   :  { %v5304_v52 = vadd.f32 %v8111_v29, %v5233_v51  ;;  %v5367_v56 = vmax.f32 %v5303_v50, 0.0 }
 0x3c0   :  { %v3982_v53 = vpop.f32.mrb[48].mxu1  ;;  %v4849_v54 = vpop.f32.mrb[48].mxu0 }
 0x3c1   :  { %v3984_v55 = vpop.f32.mrb[49].mxu1  ;;  %v5368_v57 = vmax.f32 %v5304_v52, 0.0  ;;  %v6573_v58 = vadd.f32 %v4849_v54, %v3982_v53  ;;  %v4851_v59 = vpop.f32.mrb[49].mxu0 }
 0x3c2   :  { %v3985_v60 = vpop.f32.mrb[50].mxu1  ;;  %v4852_v61 = vpop.f32.mrb[50].mxu0 }
 0x3c3   :  { %v3987_v62 = vpop.f32.mrb[51].mxu1  ;;  %v6416_v63 = vpack.c.bf16 %v5368_v57, %v5367_v56  ;;  %v5234_v1 = vmul.f32 %v6573_v58, %v8109_v21  ;;  %v6574_v2 = vadd.f32 %v4852_v61, %v3985_v60  ;;  %v4854_v3 = vpop.f32.mrb[51].mxu0 }
 0x3c5   :  { %6528 = vst [vmem:[#allocation11 + $0x58] sm:$0xff] %v6416_v63   ;;  %v5305_v4 = vadd.f32 %v8111_v29, %v5234_v1  ;;  %v5235_v5 = vmul.f32 %v6574_v2, %v8109_v21 }
 0x3c7   :  { %v5306_v6 = vadd.f32 %v8111_v29, %v5235_v5  ;;  %v5369_v10 = vmax.f32 %v5305_v4, 0.0 }
 0x3c8   :  { %v3990_v7 = vpop.f32.mrb[52].mxu1  ;;  %v4857_v8 = vpop.f32.mrb[52].mxu0 }
 0x3c9   :  { %v3992_v9 = vpop.f32.mrb[53].mxu1  ;;  %v5370_v11 = vmax.f32 %v5306_v6, 0.0  ;;  %v6575_v12 = vadd.f32 %v4857_v8, %v3990_v7  ;;  %v4859_v13 = vpop.f32.mrb[53].mxu0 }
 0x3ca   :  { %v3993_v14 = vpop.f32.mrb[54].mxu1  ;;  %v4860_v15 = vpop.f32.mrb[54].mxu0 }
 0x3cb   :  { %v3995_v16 = vpop.f32.mrb[55].mxu1  ;;  %v6421_v17 = vpack.c.bf16 %v5370_v11, %v5369_v10  ;;  %v5236_v18 = vmul.f32 %v6575_v12, %v8109_v21  ;;  %v6576_v19 = vadd.f32 %v4860_v15, %v3993_v14  ;;  %v4862_v20 = vpop.f32.mrb[55].mxu0 }
 0x3cd   :  { %6529 = vst [vmem:[#allocation11 + $0x60] sm:$0xff] %v6421_v17   ;;  %v5307_v22 = vadd.f32 %v8111_v29, %v5236_v18  ;;  %v5237_v23 = vmul.f32 %v6576_v19, %v8109_v21 }
 0x3cf   :  { %v5308_v24 = vadd.f32 %v8111_v29, %v5237_v23  ;;  %v5371_v28 = vmax.f32 %v5307_v22, 0.0 }
 0x3d0   :  { %v3998_v25 = vpop.f32.mrb[56].mxu1  ;;  %v4865_v26 = vpop.f32.mrb[56].mxu0 }
 0x3d1   :  { %v4000_v27 = vpop.f32.mrb[57].mxu1  ;;  %v5372_v30 = vmax.f32 %v5308_v24, 0.0  ;;  %v6577_v31 = vadd.f32 %v4865_v26, %v3998_v25  ;;  %v4867_v32 = vpop.f32.mrb[57].mxu0 }
 0x3d2   :  { %v4001_v33 = vpop.f32.mrb[58].mxu1  ;;  %v4868_v34 = vpop.f32.mrb[58].mxu0 }
 0x3d3   :  { %v4003_v0 = vpop.f32.mrb[59].mxu1  ;;  %v6426_v35 = vpack.c.bf16 %v5372_v30, %v5371_v28  ;;  %v5238_v36 = vmul.f32 %v6577_v31, %v8109_v21  ;;  %v6578_v37 = vadd.f32 %v4868_v34, %v4001_v33  ;;  %v4870_v38 = vpop.f32.mrb[59].mxu0 }
 0x3d5   :  { %6530 = vst [vmem:[#allocation11 + $0x68] sm:$0xff] %v6426_v35   ;;  %v5309_v39 = vadd.f32 %v8111_v29, %v5238_v36  ;;  %v5239_v40 = vmul.f32 %v6578_v37, %v8109_v21 }
 0x3d7   :  { %v5310_v41 = vadd.f32 %v8111_v29, %v5239_v40  ;;  %v5373_v45 = vmax.f32 %v5309_v39, 0.0 }
 0x3d8   :  { %v4006_v42 = vpop.f32.mrb[60].mxu1  ;;  %v4873_v43 = vpop.f32.mrb[60].mxu0 }
 0x3d9   :  { %v4008_v44 = vpop.f32.mrb[61].mxu1  ;;  %v5374_v46 = vmax.f32 %v5310_v41, 0.0  ;;  %v6579_v47 = vadd.f32 %v4873_v43, %v4006_v42  ;;  %v4875_v48 = vpop.f32.mrb[61].mxu0 }
 0x3da   :  { %v4009_v49 = vpop.f32.mrb[62].mxu1  ;;  %v4876_v50 = vpop.f32.mrb[62].mxu0 }
 0x3db   :  { %v4011_v51 = vpop.f32.mrb[63].mxu1  ;;  %v6431_v52 = vpack.c.bf16 %v5374_v46, %v5373_v45  ;;  %v5240_v53 = vmul.f32 %v6579_v47, %v8109_v21  ;;  %v6580_v54 = vadd.f32 %v4876_v50, %v4009_v49  ;;  %v4878_v55 = vpop.f32.mrb[63].mxu0 }
 0x3dd   :  { %6531 = vst [vmem:[#allocation11 + $0x70] sm:$0xff] %v6431_v52   ;;  %v5311_v56 = vadd.f32 %v8111_v29, %v5240_v53  ;;  %v5241_v57 = vmul.f32 %v6580_v54, %v8109_v21 }
 0x3df   :  { %v5312_v58 = vadd.f32 %v8111_v29, %v5241_v57  ;;  %v5375_v62 = vmax.f32 %v5311_v56, 0.0 }
 0x3e0   :  { %v4014_v59 = vpop.f32.mrb[64].mxu1  ;;  %v4881_v60 = vpop.f32.mrb[64].mxu0 }
 0x3e1   :  { %v4016_v61 = vpop.f32.mrb[65].mxu1  ;;  %v5376_v63 = vmax.f32 %v5312_v58, 0.0  ;;  %v6581_v1 = vadd.f32 %v4881_v60, %v4014_v59  ;;  %v4883_v2 = vpop.f32.mrb[65].mxu0 }
 0x3e2   :  { %v4017_v3 = vpop.f32.mrb[66].mxu1  ;;  %v4884_v4 = vpop.f32.mrb[66].mxu0 }
 0x3e3   :  { %v4019_v5 = vpop.f32.mrb[67].mxu1  ;;  %v6436_v6 = vpack.c.bf16 %v5376_v63, %v5375_v62  ;;  %v5242_v7 = vmul.f32 %v6581_v1, %v8109_v21  ;;  %v6582_v8 = vadd.f32 %v4884_v4, %v4017_v3  ;;  %v4886_v9 = vpop.f32.mrb[67].mxu0 }
 0x3e5   :  { %6532 = vst [vmem:[#allocation11 + $0x78] sm:$0xff] %v6436_v6   ;;  %v5313_v10 = vadd.f32 %v8111_v29, %v5242_v7  ;;  %v5243_v11 = vmul.f32 %v6582_v8, %v8109_v21 }
 0x3e7   :  { %v5314_v12 = vadd.f32 %v8111_v29, %v5243_v11  ;;  %v5377_v16 = vmax.f32 %v5313_v10, 0.0 }
 0x3e8   :  { %v4022_v13 = vpop.f32.mrb[68].mxu1  ;;  %v4889_v14 = vpop.f32.mrb[68].mxu0 }
 0x3e9   :  { %v4024_v15 = vpop.f32.mrb[69].mxu1  ;;  %v5378_v17 = vmax.f32 %v5314_v12, 0.0  ;;  %v6583_v18 = vadd.f32 %v4889_v14, %v4022_v13  ;;  %v4891_v19 = vpop.f32.mrb[69].mxu0 }
 0x3ea   :  { %v4025_v20 = vpop.f32.mrb[70].mxu1  ;;  %v4892_v22 = vpop.f32.mrb[70].mxu0 }
 0x3eb   :  { %v4027_v23 = vpop.f32.mrb[71].mxu1  ;;  %v6441_v24 = vpack.c.bf16 %v5378_v17, %v5377_v16  ;;  %v5244_v25 = vmul.f32 %v6583_v18, %v8109_v21  ;;  %v6584_v26 = vadd.f32 %v4892_v22, %v4025_v20  ;;  %v4894_v27 = vpop.f32.mrb[71].mxu0 }
 0x3ed   :  { %6533 = vst [vmem:[#allocation11 + $0x80] sm:$0xff] %v6441_v24   ;;  %v5315_v28 = vadd.f32 %v8111_v29, %v5244_v25  ;;  %v5245_v30 = vmul.f32 %v6584_v26, %v8109_v21 }
 0x3ef   :  { %v5316_v31 = vadd.f32 %v8111_v29, %v5245_v30  ;;  %v5379_v0 = vmax.f32 %v5315_v28, 0.0 }
 0x3f0   :  { %v4030_v32 = vpop.f32.mrb[72].mxu1  ;;  %v4897_v33 = vpop.f32.mrb[72].mxu0 }
 0x3f1   :  { %v4032_v34 = vpop.f32.mrb[73].mxu1  ;;  %v5380_v35 = vmax.f32 %v5316_v31, 0.0  ;;  %v6585_v36 = vadd.f32 %v4897_v33, %v4030_v32  ;;  %v4899_v37 = vpop.f32.mrb[73].mxu0 }
 0x3f2   :  { %v4033_v38 = vpop.f32.mrb[74].mxu1  ;;  %v4900_v39 = vpop.f32.mrb[74].mxu0 }
 0x3f3   :  { %v4035_v40 = vpop.f32.mrb[75].mxu1  ;;  %v6446_v41 = vpack.c.bf16 %v5380_v35, %v5379_v0  ;;  %v5246_v42 = vmul.f32 %v6585_v36, %v8109_v21  ;;  %v6586_v43 = vadd.f32 %v4900_v39, %v4033_v38  ;;  %v4902_v44 = vpop.f32.mrb[75].mxu0 }
 0x3f5   :  { %6534 = vst [vmem:[#allocation11 + $0x88] sm:$0xff] %v6446_v41   ;;  %v5317_v45 = vadd.f32 %v8111_v29, %v5246_v42  ;;  %v5247_v46 = vmul.f32 %v6586_v43, %v8109_v21 }
 0x3f7   :  { %v5318_v47 = vadd.f32 %v8111_v29, %v5247_v46  ;;  %v5381_v51 = vmax.f32 %v5317_v45, 0.0 }
 0x3f8   :  { %v4038_v48 = vpop.f32.mrb[76].mxu1  ;;  %v4905_v49 = vpop.f32.mrb[76].mxu0 }
 0x3f9   :  { %v4040_v50 = vpop.f32.mrb[77].mxu1  ;;  %v5382_v52 = vmax.f32 %v5318_v47, 0.0  ;;  %v6587_v53 = vadd.f32 %v4905_v49, %v4038_v48  ;;  %v4907_v54 = vpop.f32.mrb[77].mxu0 }
 0x3fa   :  { %v4041_v55 = vpop.f32.mrb[78].mxu1  ;;  %v4908_v56 = vpop.f32.mrb[78].mxu0 }
 0x3fb   :  { %v4043_v57 = vpop.f32.mrb[79].mxu1  ;;  %v6451_v58 = vpack.c.bf16 %v5382_v52, %v5381_v51  ;;  %v5248_v59 = vmul.f32 %v6587_v53, %v8109_v21  ;;  %v6588_v60 = vadd.f32 %v4908_v56, %v4041_v55  ;;  %v4910_v61 = vpop.f32.mrb[79].mxu0 }
 0x3fd   :  { %6535 = vst [vmem:[#allocation11 + $0x90] sm:$0xff] %v6451_v58   ;;  %v5319_v62 = vadd.f32 %v8111_v29, %v5248_v59  ;;  %v5249_v63 = vmul.f32 %v6588_v60, %v8109_v21 }
 0x3ff   :  { %v5320_v1 = vadd.f32 %v8111_v29, %v5249_v63  ;;  %v5383_v5 = vmax.f32 %v5319_v62, 0.0 }
 0x400   :  { %v4046_v2 = vpop.f32.mrb[80].mxu1  ;;  %v4913_v3 = vpop.f32.mrb[80].mxu0 }
 0x401   :  { %v4048_v4 = vpop.f32.mrb[81].mxu1  ;;  %v5384_v6 = vmax.f32 %v5320_v1, 0.0  ;;  %v6589_v7 = vadd.f32 %v4913_v3, %v4046_v2  ;;  %v4915_v8 = vpop.f32.mrb[81].mxu0 }
 0x402   :  { %v4049_v9 = vpop.f32.mrb[82].mxu1  ;;  %v4916_v10 = vpop.f32.mrb[82].mxu0 }
 0x403   :  { %v4051_v11 = vpop.f32.mrb[83].mxu1  ;;  %v6456_v12 = vpack.c.bf16 %v5384_v6, %v5383_v5  ;;  %v5250_v13 = vmul.f32 %v6589_v7, %v8109_v21  ;;  %v6590_v14 = vadd.f32 %v4916_v10, %v4049_v9  ;;  %v4918_v15 = vpop.f32.mrb[83].mxu0 }
 0x405   :  { %6536 = vst [vmem:[#allocation11 + $0x98] sm:$0xff] %v6456_v12   ;;  %v5321_v16 = vadd.f32 %v8111_v29, %v5250_v13  ;;  %v5251_v17 = vmul.f32 %v6590_v14, %v8109_v21 }
 0x407   :  { %v5322_v18 = vadd.f32 %v8111_v29, %v5251_v17  ;;  %v5385_v23 = vmax.f32 %v5321_v16, 0.0 }
 0x408   :  { %v4054_v19 = vpop.f32.mrb[84].mxu1  ;;  %v4921_v20 = vpop.f32.mrb[84].mxu0 }
 0x409   :  { %v4056_v22 = vpop.f32.mrb[85].mxu1  ;;  %v5386_v24 = vmax.f32 %v5322_v18, 0.0  ;;  %v6591_v25 = vadd.f32 %v4921_v20, %v4054_v19  ;;  %v4923_v26 = vpop.f32.mrb[85].mxu0 }
 0x40a   :  { %v4057_v27 = vpop.f32.mrb[86].mxu1  ;;  %v4924_v28 = vpop.f32.mrb[86].mxu0 }
 0x40b   :  { %v4059_v30 = vpop.f32.mrb[87].mxu1  ;;  %v6461_v31 = vpack.c.bf16 %v5386_v24, %v5385_v23  ;;  %v5252_v32 = vmul.f32 %v6591_v25, %v8109_v21  ;;  %v6592_v33 = vadd.f32 %v4924_v28, %v4057_v27  ;;  %v4926_v34 = vpop.f32.mrb[87].mxu0 }
 0x40d   :  { %6537 = vst [vmem:[#allocation11 + $0xa0] sm:$0xff] %v6461_v31   ;;  %v5323_v0 = vadd.f32 %v8111_v29, %v5252_v32  ;;  %v5253_v35 = vmul.f32 %v6592_v33, %v8109_v21 }
 0x40f   :  { %v5324_v36 = vadd.f32 %v8111_v29, %v5253_v35  ;;  %v5387_v40 = vmax.f32 %v5323_v0, 0.0 }
 0x410   :  { %v4062_v37 = vpop.f32.mrb[88].mxu1  ;;  %v4929_v38 = vpop.f32.mrb[88].mxu0 }
 0x411   :  { %v4064_v39 = vpop.f32.mrb[89].mxu1  ;;  %v5388_v41 = vmax.f32 %v5324_v36, 0.0  ;;  %v6593_v42 = vadd.f32 %v4929_v38, %v4062_v37  ;;  %v4931_v43 = vpop.f32.mrb[89].mxu0 }
 0x412   :  { %v4065_v44 = vpop.f32.mrb[90].mxu1  ;;  %v4932_v45 = vpop.f32.mrb[90].mxu0 }
 0x413   :  { %v4067_v46 = vpop.f32.mrb[91].mxu1  ;;  %v6466_v47 = vpack.c.bf16 %v5388_v41, %v5387_v40  ;;  %v5254_v48 = vmul.f32 %v6593_v42, %v8109_v21  ;;  %v6594_v49 = vadd.f32 %v4932_v45, %v4065_v44  ;;  %v4934_v50 = vpop.f32.mrb[91].mxu0 }
 0x415   :  { %6538 = vst [vmem:[#allocation11 + $0xa8] sm:$0xff] %v6466_v47   ;;  %v5325_v51 = vadd.f32 %v8111_v29, %v5254_v48  ;;  %v5255_v52 = vmul.f32 %v6594_v49, %v8109_v21 }
 0x417   :  { %v5326_v53 = vadd.f32 %v8111_v29, %v5255_v52  ;;  %v5389_v57 = vmax.f32 %v5325_v51, 0.0 }
 0x418   :  { %v4070_v54 = vpop.f32.mrb[92].mxu1  ;;  %v4937_v55 = vpop.f32.mrb[92].mxu0 }
 0x419   :  { %v4072_v56 = vpop.f32.mrb[93].mxu1  ;;  %v5390_v58 = vmax.f32 %v5326_v53, 0.0  ;;  %v6595_v59 = vadd.f32 %v4937_v55, %v4070_v54  ;;  %v4939_v60 = vpop.f32.mrb[93].mxu0 }
 0x41a   :  { %v4073_v61 = vpop.f32.mrb[94].mxu1  ;;  %v4940_v62 = vpop.f32.mrb[94].mxu0 }
 0x41b   :  { %v4075_v63 = vpop.f32.mrb[95].mxu1  ;;  %v6471_v1 = vpack.c.bf16 %v5390_v58, %v5389_v57  ;;  %v5256_v2 = vmul.f32 %v6595_v59, %v8109_v21  ;;  %v6596_v3 = vadd.f32 %v4940_v62, %v4073_v61  ;;  %v4942_v4 = vpop.f32.mrb[95].mxu0  ;;  %v8219_v58 = vld [vmem:[#allocation8] ss:$0 sm:$0xff] }
 0x41d   :  { %6539 = vst [vmem:[#allocation11 + $0xb0] sm:$0xff] %v6471_v1   ;;  %v5327_v5 = vadd.f32 %v8111_v29, %v5256_v2  ;;  %v5257_v6 = vmul.f32 %v6596_v3, %v8109_v21 }
 0x41f   :  { %v5328_v7 = vadd.f32 %v8111_v29, %v5257_v6  ;;  %v5391_v11 = vmax.f32 %v5327_v5, 0.0 }
 0x420   :  { %v4078_v8 = vpop.f32.mrb[96].mxu1  ;;  %v4945_v9 = vpop.f32.mrb[96].mxu0 }
 0x421   :  { %v4080_v10 = vpop.f32.mrb[97].mxu1  ;;  %v5392_v12 = vmax.f32 %v5328_v7, 0.0  ;;  %v6597_v13 = vadd.f32 %v4945_v9, %v4078_v8  ;;  %v4947_v14 = vpop.f32.mrb[97].mxu0 }
 0x422   :  { %v4081_v15 = vpop.f32.mrb[98].mxu1  ;;  %v4948_v16 = vpop.f32.mrb[98].mxu0 }
 0x423   :  { %v4083_v17 = vpop.f32.mrb[99].mxu1  ;;  %v6476_v18 = vpack.c.bf16 %v5392_v12, %v5391_v11  ;;  %v5258_v19 = vmul.f32 %v6597_v13, %v8109_v21  ;;  %v6598_v20 = vadd.f32 %v4948_v16, %v4081_v15  ;;  %v4950_v22 = vpop.f32.mrb[99].mxu0  ;;  %v8224_v11 = vld [vmem:[#allocation9] ss:$0 sm:$0xff] }
 0x425   :  { %6540 = vst [vmem:[#allocation11 + $0xb8] sm:$0xff] %v6476_v18   ;;  %v5329_v23 = vadd.f32 %v8111_v29, %v5258_v19  ;;  %v5259_v24 = vmul.f32 %v6598_v20, %v8109_v21 }
 0x427   :  { %v5330_v25 = vadd.f32 %v8111_v29, %v5259_v24  ;;  %v5393_v30 = vmax.f32 %v5329_v23, 0.0 }
 0x428   :  { %v4086_v26 = vpop.f32.mrb[100].mxu1  ;;  %v4953_v27 = vpop.f32.mrb[100].mxu0 }
 0x429   :  { %v4088_v28 = vpop.f32.mrb[101].mxu1  ;;  %v5394_v31 = vmax.f32 %v5330_v25, 0.0  ;;  %v6599_v32 = vadd.f32 %v4953_v27, %v4086_v26  ;;  %v4955_v33 = vpop.f32.mrb[101].mxu0 }
 0x42a   :  { %v4089_v34 = vpop.f32.mrb[102].mxu1  ;;  %v4956_v0 = vpop.f32.mrb[102].mxu0 }
 0x42b   :  { %v4091_v35 = vpop.f32.mrb[103].mxu1  ;;  %v6481_v36 = vpack.c.bf16 %v5394_v31, %v5393_v30  ;;  %v5260_v37 = vmul.f32 %v6599_v32, %v8109_v21  ;;  %v6600_v38 = vadd.f32 %v4956_v0, %v4089_v34  ;;  %v4958_v39 = vpop.f32.mrb[103].mxu0 }
 0x42d   :  { %6541 = vst [vmem:[#allocation11 + $0xc0] sm:$0xff] %v6481_v36   ;;  %v5331_v40 = vadd.f32 %v8111_v29, %v5260_v37  ;;  %v5261_v41 = vmul.f32 %v6600_v38, %v8109_v21 }
 0x42f   :  { %v5332_v42 = vadd.f32 %v8111_v29, %v5261_v41  ;;  %v5395_v46 = vmax.f32 %v5331_v40, 0.0 }
 0x430   :  { %v4094_v43 = vpop.f32.mrb[104].mxu1  ;;  %v4961_v44 = vpop.f32.mrb[104].mxu0 }
 0x431   :  { %v4096_v45 = vpop.f32.mrb[105].mxu1  ;;  %v5396_v47 = vmax.f32 %v5332_v42, 0.0  ;;  %v6601_v48 = vadd.f32 %v4961_v44, %v4094_v43  ;;  %v4963_v49 = vpop.f32.mrb[105].mxu0 }
 0x432   :  { %v4097_v50 = vpop.f32.mrb[106].mxu1  ;;  %v4964_v51 = vpop.f32.mrb[106].mxu0 }
 0x433   :  { %v4099_v52 = vpop.f32.mrb[107].mxu1  ;;  %v6486_v53 = vpack.c.bf16 %v5396_v47, %v5395_v46  ;;  %v5262_v54 = vmul.f32 %v6601_v48, %v8109_v21  ;;  %v6602_v55 = vadd.f32 %v4964_v51, %v4097_v50  ;;  %v4966_v56 = vpop.f32.mrb[107].mxu0 }
 0x435   :  { %6542 = vst [vmem:[#allocation11 + $0xc8] sm:$0xff] %v6486_v53   ;;  %v5333_v57 = vadd.f32 %v8111_v29, %v5262_v54  ;;  %v5263_v59 = vmul.f32 %v8219_v58, %v6602_v55 }
 0x437   :  { %v5334_v60 = vadd.f32 %v8111_v29, %v5263_v59  ;;  %v5397_v1 = vmax.f32 %v5333_v57, 0.0 }
 0x438   :  { %v4102_v61 = vpop.f32.mrb[108].mxu1  ;;  %v4969_v62 = vpop.f32.mrb[108].mxu0 }
 0x439   :  { %v4104_v63 = vpop.f32.mrb[109].mxu1  ;;  %v5398_v2 = vmax.f32 %v5334_v60, 0.0  ;;  %v6603_v3 = vadd.f32 %v4969_v62, %v4102_v61  ;;  %v4971_v4 = vpop.f32.mrb[109].mxu0 }
 0x43a   :  { %v4105_v5 = vpop.f32.mrb[110].mxu1  ;;  %v4972_v21 = vpop.f32.mrb[110].mxu0 }
 0x43b   :  { %v4107_v6 = vpop.f32.mrb[111].mxu1  ;;  %v6491_v7 = vpack.c.bf16 %v5398_v2, %v5397_v1  ;;  %v5264_v8 = vmul.f32 %v8219_v58, %v6603_v3  ;;  %v6604_v9 = vadd.f32 %v4972_v21, %v4105_v5  ;;  %v4974_v10 = vpop.f32.mrb[111].mxu0 }
 0x43d   :  { %6543 = vst [vmem:[#allocation11 + $0xd0] sm:$0xff] %v6491_v7   ;;  %v5335_v29 = vadd.f32 %v8224_v11, %v5264_v8  ;;  %v5265_v12 = vmul.f32 %v8219_v58, %v6604_v9 }
 0x43f   :  { %v5336_v13 = vadd.f32 %v8224_v11, %v5265_v12  ;;  %v5399_v17 = vmax.f32 %v5335_v29, 0.0 }
 0x440   :  { %v4110_v14 = vpop.f32.mrb[112].mxu1  ;;  %v4977_v15 = vpop.f32.mrb[112].mxu0 }
 0x441   :  { %v4112_v16 = vpop.f32.mrb[113].mxu1  ;;  %v5400_v18 = vmax.f32 %v5336_v13, 0.0  ;;  %v6605_v19 = vadd.f32 %v4977_v15, %v4110_v14  ;;  %v4979_v20 = vpop.f32.mrb[113].mxu0 }
 0x442   :  { %v4113_v22 = vpop.f32.mrb[114].mxu1  ;;  %v4980_v23 = vpop.f32.mrb[114].mxu0 }
 0x443   :  { %v4115_v24 = vpop.f32.mrb[115].mxu1  ;;  %v6496_v25 = vpack.c.bf16 %v5400_v18, %v5399_v17  ;;  %v5266_v26 = vmul.f32 %v8219_v58, %v6605_v19  ;;  %v6606_v27 = vadd.f32 %v4980_v23, %v4113_v22  ;;  %v4982_v28 = vpop.f32.mrb[115].mxu0 }
 0x445   :  { %6544 = vst [vmem:[#allocation11 + $0xd8] sm:$0xff] %v6496_v25   ;;  %v5337_v30 = vadd.f32 %v8224_v11, %v5266_v26  ;;  %v5267_v31 = vmul.f32 %v8219_v58, %v6606_v27 }
 0x447   :  { %v5338_v32 = vadd.f32 %v8224_v11, %v5267_v31  ;;  %v5401_v35 = vmax.f32 %v5337_v30, 0.0 }
 0x448   :  { %v4118_v33 = vpop.f32.mrb[116].mxu1  ;;  %v4985_v34 = vpop.f32.mrb[116].mxu0 }
 0x449   :  { %v4120_v0 = vpop.f32.mrb[117].mxu1  ;;  %v5402_v36 = vmax.f32 %v5338_v32, 0.0  ;;  %v6607_v37 = vadd.f32 %v4985_v34, %v4118_v33  ;;  %v4987_v38 = vpop.f32.mrb[117].mxu0 }
 0x44a   :  { %v4121_v39 = vpop.f32.mrb[118].mxu1  ;;  %v4988_v40 = vpop.f32.mrb[118].mxu0 }
 0x44b   :  { %v4123_v41 = vpop.f32.mrb[119].mxu1  ;;  %v6501_v42 = vpack.c.bf16 %v5402_v36, %v5401_v35  ;;  %v5268_v43 = vmul.f32 %v8219_v58, %v6607_v37  ;;  %v6608_v44 = vadd.f32 %v4988_v40, %v4121_v39  ;;  %v4990_v45 = vpop.f32.mrb[119].mxu0 }
 0x44d   :  { %6545 = vst [vmem:[#allocation11 + $0xe0] sm:$0xff] %v6501_v42   ;;  %v5339_v46 = vadd.f32 %v8224_v11, %v5268_v43  ;;  %v5269_v47 = vmul.f32 %v8219_v58, %v6608_v44 }
 0x44f   :  { %v5340_v48 = vadd.f32 %v8224_v11, %v5269_v47  ;;  %v5403_v52 = vmax.f32 %v5339_v46, 0.0 }
 0x450   :  { %v4126_v49 = vpop.f32.mrb[120].mxu1  ;;  %v4993_v50 = vpop.f32.mrb[120].mxu0 }
 0x451   :  { %v4128_v51 = vpop.f32.mrb[121].mxu1  ;;  %v5404_v53 = vmax.f32 %v5340_v48, 0.0  ;;  %v6609_v54 = vadd.f32 %v4993_v50, %v4126_v49  ;;  %v4995_v55 = vpop.f32.mrb[121].mxu0 }
 0x452   :  { %v4129_v56 = vpop.f32.mrb[122].mxu1  ;;  %v4996_v57 = vpop.f32.mrb[122].mxu0 }
 0x453   :  { %v4131_v59 = vpop.f32.mrb[123].mxu1  ;;  %v6506_v60 = vpack.c.bf16 %v5404_v53, %v5403_v52  ;;  %v5270_v61 = vmul.f32 %v8219_v58, %v6609_v54  ;;  %v6610_v62 = vadd.f32 %v4996_v57, %v4129_v56  ;;  %v4998_v63 = vpop.f32.mrb[123].mxu0 }
 0x455   :  { %6546 = vst [vmem:[#allocation11 + $0xe8] sm:$0xff] %v6506_v60   ;;  %v5341_v1 = vadd.f32 %v8224_v11, %v5270_v61  ;;  %v5271_v2 = vmul.f32 %v8219_v58, %v6610_v62 }
 0x457   :  { %v5342_v3 = vadd.f32 %v8224_v11, %v5271_v2  ;;  %v5405_v6 = vmax.f32 %v5341_v1, 0.0 }
 0x458   :  { %v4134_v4 = vpop.f32.mrb[124].mxu1  ;;  %v5001_v5 = vpop.f32.mrb[124].mxu0 }
 0x459   :  { %v4136_v21 = vpop.f32.mrb[125].mxu1  ;;  %v5406_v7 = vmax.f32 %v5342_v3, 0.0  ;;  %v6611_v8 = vadd.f32 %v5001_v5, %v4134_v4  ;;  %v5003_v9 = vpop.f32.mrb[125].mxu0 }
 0x45a   :  { %v4137_v10 = vpop.f32.mrb[126].mxu1  ;;  %v5004_v29 = vpop.f32.mrb[126].mxu0 }
 0x45b   :  { %v4139_v12 = vpop.f32.mrb[127].mxu1  ;;  %v6511_v13 = vpack.c.bf16 %v5406_v7, %v5405_v6  ;;  %v5272_v14 = vmul.f32 %v8219_v58, %v6611_v8  ;;  %v6612_v15 = vadd.f32 %v5004_v29, %v4137_v10  ;;  %v5006_v16 = vpop.f32.mrb[127].mxu0 }
 0x45d   :  { %6547 = vst [vmem:[#allocation11 + $0xf0] sm:$0xff] %v6511_v13   ;;  %v5343_v17 = vadd.f32 %v8224_v11, %v5272_v14  ;;  %v5273_v18 = vmul.f32 %v8219_v58, %v6612_v15 }
 0x45f   :  { %v5344_v19 = vadd.f32 %v8224_v11, %v5273_v18  ;;  %v5407_v20 = vmax.f32 %v5343_v17, 0.0 }
 0x461   :  { %v5408_v22 = vmax.f32 %v5344_v19, 0.0 }
 0x463   :  { %v6516_v23 = vpack.c.bf16 %v5408_v22, %v5407_v20 }
 0x465   :  { %6548 = vst [vmem:[#allocation11 + $0xf8] sm:$0xff] %v6516_v23  }
 0x466   :  { %7908 = shalt.err (!%p7905_p8)
}
 0x467   :  { %s7909_s19 = scalar_lea.hbm %s8264_s4, 4096 }
 0x468   :  { %p7910_p9 = scmp.ne.s32.totalorder %s8264_s4, %s7909_s19  ;;  %p7913_p10 = scmp.lt.u32.totalorder %s7909_s19, %s8264_s4 }
 0x46a   :  { %p7915_p11 = pnand %p7913_p10, %p7910_p9 }
 0x46c   :  { %7918 = shalt.err (!%p7915_p11)
}
 0x46d   :  { %5740 = dma.vmem_to_hbm [thread:$0]  %s5735_s15, 4096, %s8264_s4, [#allocation5], %s7928_s25, %s7928_s25, %s7929_s26  }
 0x46e   :  { %7925 = dma.done.wait [#allocation5], 4096  }
 0x46f   :  { %7926 = vsyncadd [#allocation5], 4294963200 }
 0x470   :  { %5744 = vsyncpa [#allocation4], 1 }
 0x471   :  { %5745 = vsyncpa [#allocation7], 1 }
 0x472   :  { %5746 = vsyncpa [#allocation10], 1 }
 0x473   :  { %5747 = vsyncpa [#allocation5], 1 }

</bundles_post_ra>
